<compile_context>
chip_gen: v6e
topology: v6e:2x2x1
jax: 0.10.0
libtpu: 0.0.40
codegen_flags: <defaults>
</compile_context>

<pallas_src>
from functools import partial

import jax
import jax.numpy as jnp
from jax.experimental import pallas as pl
from jax.experimental.pallas import tpu as pltpu

EPS = 1e-5  # nn.BatchNorm2d default eps


# ----------------------------------------------------------------------------
# Pass A kernel: 3x3 conv (9 tap matmuls on the MXU) + BN-stat accumulation.
# One grid step = one image. Input tile is spatially padded (H+2, W+2, Cp).
# ----------------------------------------------------------------------------
def _conv3x3_kernel(xp_ref, w_ref, z_ref, stats_ref, *, H, W):
    cp = w_ref.shape[-1]

    t = 0
    for kh in range(3):
        for kw in range(3):
            # Shifted (H, W, Cp) view of the padded input, flattened for MXU.
            xs = xp_ref[0, kh:kh + H, kw:kw + W, :].reshape(H * W, cp)  # bf16
            contrib = jnp.dot(xs, w_ref[t],
                              preferred_element_type=jnp.float32)
            if t == 0:
                z_ref[...] = contrib          # accumulate directly in the
            else:                             # VMEM-resident output block
                z_ref[...] += contrib
            t += 1

    acc = z_ref[...]                          # (H*W, Cp) f32

    # Per-channel batch-stat partial sums (channels on the lane axis).
    tile_sum = jnp.sum(acc, axis=0, keepdims=True)        # (1, Cp)
    tile_sq = jnp.sum(acc * acc, axis=0, keepdims=True)   # (1, Cp)

    @pl.when(pl.program_id(0) == 0)
    def _init():
        stats_ref[...] = jnp.zeros_like(stats_ref)

    stats_ref[...] = stats_ref[...] + jnp.concatenate([tile_sum, tile_sq],
                                                      axis=0)


def _conv3x3(xp, w_taps, n, h, w):
    """xp: (N, H+2, W+2, Cp) bf16 (spatially zero-padded);
    w_taps: (9, Cp, Cp) bf16.  Returns (z_flat (N*H*W, Cp) f32,
    stats (2, Cp) f32 with [sum; sum_of_squares])."""
    cp = w_taps.shape[-1]
    z, stats = pl.pallas_call(
        partial(_conv3x3_kernel, H=h, W=w),
        grid=(n,),
        in_specs=[
            pl.BlockSpec((1, h + 2, w + 2, cp), lambda i: (i, 0, 0, 0)),
            pl.BlockSpec((9, cp, cp), lambda i: (0, 0, 0)),
        ],
        out_specs=[
            pl.BlockSpec((h * w, cp), lambda i: (i, 0)),
            pl.BlockSpec((2, cp), lambda i: (0, 0)),   # revisited accumulator
        ],
        out_shape=[
            jax.ShapeDtypeStruct((n * h * w, cp), jnp.float32),
            jax.ShapeDtypeStruct((2, cp), jnp.float32),
        ],
        compiler_params=pltpu.CompilerParams(
            dimension_semantics=("arbitrary",)),
    )(xp, w_taps)
    return z, stats


# ----------------------------------------------------------------------------
# Pass B kernel: BatchNorm (from global sum/sumsq) -> [+residual] -> ReLU.
# Purely elementwise over lane-dense (TR, Cp) row tiles.
# ----------------------------------------------------------------------------
def _bn_act_kernel(z_ref, s_ref, g_ref, b_ref, *rest, inv_count, add_residual):
    if add_residual:
        r_ref, o_ref = rest
    else:
        (o_ref,) = rest

    s = s_ref[...]                              # (2, Cp) f32
    mean = s[0:1, :] * inv_count                # (1, Cp)
    var = s[1:2, :] * inv_count - mean * mean   # biased variance (training BN)
    scale = jax.lax.rsqrt(var + EPS) * g_ref[...]
    shift = b_ref[...] - mean * scale

    y = z_ref[...] * scale + shift
    if add_residual:
        y = y + r_ref[...]
    o_ref[...] = jnp.maximum(y, 0.0).astype(o_ref.dtype)


def _bn_act(z_flat, stats, gamma, beta, count, residual=None,
            out_dtype=jnp.float32):
    nhw, cp = z_flat.shape
    tr = 256 if nhw % 256 == 0 else nhw

    row_spec = pl.BlockSpec((tr, cp), lambda i: (i, 0))
    stat_spec = pl.BlockSpec((2, cp), lambda i: (0, 0))
    par_spec = pl.BlockSpec((1, cp), lambda i: (0, 0))

    in_specs = [row_spec, stat_spec, par_spec, par_spec]
    args = [z_flat, stats, gamma, beta]
    if residual is not None:
        in_specs.append(row_spec)
        args.append(residual)

    return pl.pallas_call(
        partial(_bn_act_kernel, inv_count=1.0 / float(count),
                add_residual=residual is not None),
        grid=(nhw // tr,),
        in_specs=in_specs,
        out_specs=row_spec,
        out_shape=jax.ShapeDtypeStruct((nhw, cp), out_dtype),
        compiler_params=pltpu.CompilerParams(
            dimension_semantics=("parallel",)),
    )(*args)


# ----------------------------------------------------------------------------
# Plain-JAX glue: layout conversion, channel padding, weight repacking
# ----------------------------------------------------------------------------
def _round_up(x, m):
    return ((x + m - 1) // m) * m


def _weight_to_taps(w_oihw, cp):
    """PyTorch conv weight (Cout, Cin, 3, 3) -> (9, Cp, Cp) bf16 tap matrices."""
    cout, cin, _, _ = w_oihw.shape
    w = jnp.transpose(w_oihw.astype(jnp.float32), (2, 3, 1, 0))  # (3,3,Cin,Cout)
    w = jnp.pad(w, ((0, 0), (0, 0), (0, cp - cin), (0, cp - cout)))
    return w.reshape(9, cp, cp).astype(jnp.bfloat16)


def _pad_param(v, cp, pad_val):
    c = v.shape[0]
    return jnp.pad(v.astype(jnp.float32), (0, cp - c),
                   constant_values=pad_val).reshape(1, cp)


def basic_block_forward(x_nchw, params):
    """Forward pass of BasicBlock. Input/output are NCHW (PyTorch convention)."""
    n, c, h, w = x_nchw.shape
    cp = _round_up(max(c, 128), 128)
    count = n * h * w

    x = jnp.transpose(x_nchw, (0, 2, 3, 1)).astype(jnp.float32)       # NHWC
    x_res = jnp.pad(x, ((0, 0), (0, 0), (0, 0), (0, cp - c)))          # f32
    xp = jnp.pad(x_res, ((0, 0), (1, 1), (1, 1), (0, 0))).astype(jnp.bfloat16)

    w1 = _weight_to_taps(params["w1"], cp)
    w2 = _weight_to_taps(params["w2"], cp)
    g1 = _pad_param(params["g1"], cp, 1.0)
    be1 = _pad_param(params["be1"], cp, 0.0)
    g2 = _pad_param(params["g2"], cp, 1.0)
    be2 = _pad_param(params["be2"], cp, 0.0)
    # Conv biases b1/b2 are intentionally NOT used: training-mode BatchNorm's
    # mean subtraction cancels any per-channel constant exactly.

    # Stage 1: conv1 -> (stats) -> BN1 -> ReLU  (h1 handed off in bf16)
    z1, s1 = _conv3x3(xp, w1, n, h, w)
    h1 = _bn_act(z1, s1, g1, be1, count, out_dtype=jnp.bfloat16)

    # Stage 2: conv2 -> (stats) -> BN2 -> + x -> ReLU
    h1p = jnp.pad(h1.reshape(n, h, w, cp), ((0, 0), (1, 1), (1, 1), (0, 0)))
    z2, s2 = _conv3x3(h1p, w2, n, h, w)
    out_flat = _bn_act(z2, s2, g2, be2, count,
                       residual=x_res.reshape(n * h * w, cp),
                       out_dtype=jnp.float32)

    out = out_flat.reshape(n, h, w, cp)[..., :c]
    return jnp.transpose(out, (0, 3, 1, 2))  # -> NCHW


# ----------------------------------------------------------------------------
# Pure-JAX f32 reference (mirrors the PyTorch module in training mode)
# ----------------------------------------------------------------------------
def basic_block_reference(x_nchw, params):
    x = jnp.transpose(x_nchw, (0, 2, 3, 1)).astype(jnp.float32)

    def conv(z, w, b):
        y = jax.lax.conv_general_dilated(
            z, jnp.transpose(w, (2, 3, 1, 0)), (1, 1), "SAME",
            dimension_numbers=("NHWC", "HWIO", "NHWC"))
        return y + b

    def bn(z, g, be):
        m = jnp.mean(z, axis=(0, 1, 2))
        v = jnp.mean((z - m) ** 2, axis=(0, 1, 2))   # biased variance
        return (z - m) * jax.lax.rsqrt(v + EPS) * g + be

    h1 = jax.nn.relu(bn(conv(x, params["w1"], params["b1"]),
                        params["g1"], params["be1"]))
    y = bn(conv(h1, params["w2"], params["b2"]), params["g2"], params["be2"])
    y = jax.nn.relu(x + y)
    return jnp.transpose(y, (0, 3, 1, 2))


# ----------------------------------------------------------------------------
# Deterministic parameter init (shapes per BasicBlock.__init__ with depth=C)
# ----------------------------------------------------------------------------
def init_params(key, depth):
    ks = jax.random.split(key, 8)
    return {
        "w1": 0.2 * jax.random.normal(ks[0], (depth, depth, 3, 3), jnp.float32),
        "b1": 0.1 * jax.random.normal(ks[1], (depth,), jnp.float32),
        "g1": 1.0 + 0.1 * jax.random.normal(ks[2], (depth,), jnp.float32),
        "be1": 0.1 * jax.random.normal(ks[3], (depth,), jnp.float32),
        "w2": 0.2 * jax.random.normal(ks[4], (depth, depth, 3, 3), jnp.float32),
        "b2": 0.1 * jax.random.normal(ks[5], (depth,), jnp.float32),
        "g2": 1.0 + 0.1 * jax.random.normal(ks[6], (depth,), jnp.float32),
        "be2": 0.1 * jax.random.normal(ks[7], (depth,), jnp.float32),
    }


if __name__ == "__main__":
    key = jax.random.PRNGKey(0)
    k_x, k_p = jax.random.split(key)

    N, C, H, W = 2, 4, 16, 16  # small shapes consistent with BasicBlock(depth=4)
    x = jax.random.normal(k_x, (N, C, H, W), jnp.float32)
    params = init_params(k_p, C)

    out = jax.block_until_ready(jax.jit(basic_block_forward)(x, params))
    ref = jax.block_until_ready(basic_block_reference(x, params))

    assert out.shape == (N, C, H, W)
    # bf16 MXU operands -> compare against the f32 reference with a loosened
    # tolerance (errors compound through two conv+BN stages).
    assert jnp.allclose(out, ref, rtol=5e-2, atol=8e-2), (
        "mismatch vs reference: max abs err "
        f"{float(jnp.max(jnp.abs(out - ref)))}")

    print("KERNEL_OK")
</pallas_src>

<mosaic_0001>
module attributes {stable_mosaic.version = 11 : i64} {
  func.func @_conv3x3_kernel(%arg0: i32, %arg1: memref<1x18x18x128xbf16, #tpu.memory_space<vmem>>, %arg2: memref<9x128x128xbf16, #tpu.memory_space<vmem>>, %arg3: memref<256x128xf32, #tpu.memory_space<vmem>>, %arg4: memref<2x128xf32, #tpu.memory_space<vmem>>) attributes {dimension_semantics = [#tpu.dimension_semantics<arbitrary>], iteration_bounds = array<i64: 2>, scalar_prefetch = 0 : i64, scratch_operands = 0 : i64, tpu.core_type = #tpu.core_type<tc>, window_params = [{transform_indices = @transform_0, window_bounds = array<i64: 1, 18, 18, 128>}, {pipeline_mode = #tpu.pipeline_mode<synchronous>, transform_indices = @transform_1, window_bounds = array<i64: 9, 128, 128>}, {transform_indices = @transform_2, window_bounds = array<i64: 256, 128>}, {pipeline_mode = #tpu.pipeline_mode<synchronous>, transform_indices = @transform_3, window_bounds = array<i64: 2, 128>}]} {
    %c0 = arith.constant 0 : index
    %c0_0 = arith.constant 0 : index
    %c0_1 = arith.constant 0 : index
    %c0_2 = arith.constant 0 : index
    %0 = vector.load %arg1[%c0, %c0_0, %c0_1, %c0_2] : memref<1x18x18x128xbf16, #tpu.memory_space<vmem>>, vector<1x16x16x128xbf16>
    %1 = vector.shape_cast %0 : vector<1x16x16x128xbf16> to vector<16x16x128xbf16>
    %2 = vector.shape_cast %1 : vector<16x16x128xbf16> to vector<256x128xbf16>
    %c0_3 = arith.constant 0 : index
    %c0_4 = arith.constant 0 : index
    %c0_5 = arith.constant 0 : index
    %3 = vector.load %arg2[%c0_3, %c0_4, %c0_5] : memref<9x128x128xbf16, #tpu.memory_space<vmem>>, vector<1x128x128xbf16>
    %4 = vector.shape_cast %3 : vector<1x128x128xbf16> to vector<128x128xbf16>
    %cst = arith.constant dense<0.000000e+00> : vector<256x128xf32>
    %5 = tpu.matmul %2, %4, %cst {dimension_numbers = #tpu.dot_dimension_numbers<[1], [0], [0], [1], [0, 0, 1, 1], [], []>} : vector<256x128xbf16>, vector<128x128xbf16>, vector<256x128xf32> -> vector<256x128xf32>
    %c0_6 = arith.constant 0 : index
    %c0_7 = arith.constant 0 : index
    %6 = vector.load %arg3[%c0_6, %c0_7] : memref<256x128xf32, #tpu.memory_space<vmem>>, vector<256x128xf32>
    tpu.vector_store %arg3[%c0_6, %c0_7], %5 {strides = array<i32>} : memref<256x128xf32, #tpu.memory_space<vmem>>, vector<256x128xf32>,
    %c0_8 = arith.constant 0 : index
    %c0_9 = arith.constant 0 : index
    %c1 = arith.constant 1 : index
    %c0_10 = arith.constant 0 : index
    %7 = vector.load %arg1[%c0_8, %c0_9, %c1, %c0_10] : memref<1x18x18x128xbf16, #tpu.memory_space<vmem>>, vector<1x16x16x128xbf16>
    %8 = vector.shape_cast %7 : vector<1x16x16x128xbf16> to vector<16x16x128xbf16>
    %9 = vector.shape_cast %8 : vector<16x16x128xbf16> to vector<256x128xbf16>
    %c1_11 = arith.constant 1 : index
    %c0_12 = arith.constant 0 : index
    %c0_13 = arith.constant 0 : index
    %10 = vector.load %arg2[%c1_11, %c0_12, %c0_13] : memref<9x128x128xbf16, #tpu.memory_space<vmem>>, vector<1x128x128xbf16>
    %11 = vector.shape_cast %10 : vector<1x128x128xbf16> to vector<128x128xbf16>
    %cst_14 = arith.constant dense<0.000000e+00> : vector<256x128xf32>
    %12 = tpu.matmul %9, %11, %cst_14 {dimension_numbers = #tpu.dot_dimension_numbers<[1], [0], [0], [1], [0, 0, 1, 1], [], []>} : vector<256x128xbf16>, vector<128x128xbf16>, vector<256x128xf32> -> vector<256x128xf32>
    %c0_15 = arith.constant 0 : index
    %c0_16 = arith.constant 0 : index
    %13 = vector.load %arg3[%c0_15, %c0_16] : memref<256x128xf32, #tpu.memory_space<vmem>>, vector<256x128xf32>
    %14 = arith.addf %13, %12 : vector<256x128xf32>
    %c0_17 = arith.constant 0 : index
    %c0_18 = arith.constant 0 : index
    %15 = vector.load %arg3[%c0_17, %c0_18] : memref<256x128xf32, #tpu.memory_space<vmem>>, vector<256x128xf32>
    tpu.vector_store %arg3[%c0_17, %c0_18], %14 {strides = array<i32>} : memref<256x128xf32, #tpu.memory_space<vmem>>, vector<256x128xf32>,
    %c0_19 = arith.constant 0 : index
    %c0_20 = arith.constant 0 : index
    %c2 = arith.constant 2 : index
    %c0_21 = arith.constant 0 : index
    %16 = vector.load %arg1[%c0_19, %c0_20, %c2, %c0_21] : memref<1x18x18x128xbf16, #tpu.memory_space<vmem>>, vector<1x16x16x128xbf16>
    %17 = vector.shape_cast %16 : vector<1x16x16x128xbf16> to vector<16x16x128xbf16>
    %18 = vector.shape_cast %17 : vector<16x16x128xbf16> to vector<256x128xbf16>
    %c2_22 = arith.constant 2 : index
    %c0_23 = arith.constant 0 : index
    %c0_24 = arith.constant 0 : index
    %19 = vector.load %arg2[%c2_22, %c0_23, %c0_24] : memref<9x128x128xbf16, #tpu.memory_space<vmem>>, vector<1x128x128xbf16>
    %20 = vector.shape_cast %19 : vector<1x128x128xbf16> to vector<128x128xbf16>
    %cst_25 = arith.constant dense<0.000000e+00> : vector<256x128xf32>
    %21 = tpu.matmul %18, %20, %cst_25 {dimension_numbers = #tpu.dot_dimension_numbers<[1], [0], [0], [1], [0, 0, 1, 1], [], []>} : vector<256x128xbf16>, vector<128x128xbf16>, vector<256x128xf32> -> vector<256x128xf32>
    %c0_26 = arith.constant 0 : index
    %c0_27 = arith.constant 0 : index
    %22 = vector.load %arg3[%c0_26, %c0_27] : memref<256x128xf32, #tpu.memory_space<vmem>>, vector<256x128xf32>
    %23 = arith.addf %22, %21 : vector<256x128xf32>
    %c0_28 = arith.constant 0 : index
    %c0_29 = arith.constant 0 : index
    %24 = vector.load %arg3[%c0_28, %c0_29] : memref<256x128xf32, #tpu.memory_space<vmem>>, vector<256x128xf32>
    tpu.vector_store %arg3[%c0_28, %c0_29], %23 {strides = array<i32>} : memref<256x128xf32, #tpu.memory_space<vmem>>, vector<256x128xf32>,
    %c0_30 = arith.constant 0 : index
    %c1_31 = arith.constant 1 : index
    %c0_32 = arith.constant 0 : index
    %c0_33 = arith.constant 0 : index
    %25 = vector.load %arg1[%c0_30, %c1_31, %c0_32, %c0_33] : memref<1x18x18x128xbf16, #tpu.memory_space<vmem>>, vector<1x16x16x128xbf16>
    %26 = vector.shape_cast %25 : vector<1x16x16x128xbf16> to vector<16x16x128xbf16>
    %27 = vector.shape_cast %26 : vector<16x16x128xbf16> to vector<256x128xbf16>
    %c3 = arith.constant 3 : index
    %c0_34 = arith.constant 0 : index
    %c0_35 = arith.constant 0 : index
    %28 = vector.load %arg2[%c3, %c0_34, %c0_35] : memref<9x128x128xbf16, #tpu.memory_space<vmem>>, vector<1x128x128xbf16>
    %29 = vector.shape_cast %28 : vector<1x128x128xbf16> to vector<128x128xbf16>
    %cst_36 = arith.constant dense<0.000000e+00> : vector<256x128xf32>
    %30 = tpu.matmul %27, %29, %cst_36 {dimension_numbers = #tpu.dot_dimension_numbers<[1], [0], [0], [1], [0, 0, 1, 1], [], []>} : vector<256x128xbf16>, vector<128x128xbf16>, vector<256x128xf32> -> vector<256x128xf32>
    %c0_37 = arith.constant 0 : index
    %c0_38 = arith.constant 0 : index
    %31 = vector.load %arg3[%c0_37, %c0_38] : memref<256x128xf32, #tpu.memory_space<vmem>>, vector<256x128xf32>
    %32 = arith.addf %31, %30 : vector<256x128xf32>
    %c0_39 = arith.constant 0 : index
    %c0_40 = arith.constant 0 : index
    %33 = vector.load %arg3[%c0_39, %c0_40] : memref<256x128xf32, #tpu.memory_space<vmem>>, vector<256x128xf32>
    tpu.vector_store %arg3[%c0_39, %c0_40], %32 {strides = array<i32>} : memref<256x128xf32, #tpu.memory_space<vmem>>, vector<256x128xf32>,
    %c0_41 = arith.constant 0 : index
    %c1_42 = arith.constant 1 : index
    %c1_43 = arith.constant 1 : index
    %c0_44 = arith.constant 0 : index
    %34 = vector.load %arg1[%c0_41, %c1_42, %c1_43, %c0_44] : memref<1x18x18x128xbf16, #tpu.memory_space<vmem>>, vector<1x16x16x128xbf16>
    %35 = vector.shape_cast %34 : vector<1x16x16x128xbf16> to vector<16x16x128xbf16>
    %36 = vector.shape_cast %35 : vector<16x16x128xbf16> to vector<256x128xbf16>
    %c4 = arith.constant 4 : index
    %c0_45 = arith.constant 0 : index
    %c0_46 = arith.constant 0 : index
    %37 = vector.load %arg2[%c4, %c0_45, %c0_46] : memref<9x128x128xbf16, #tpu.memory_space<vmem>>, vector<1x128x128xbf16>
    %38 = vector.shape_cast %37 : vector<1x128x128xbf16> to vector<128x128xbf16>
    %cst_47 = arith.constant dense<0.000000e+00> : vector<256x128xf32>
    %39 = tpu.matmul %36, %38, %cst_47 {dimension_numbers = #tpu.dot_dimension_numbers<[1], [0], [0], [1], [0, 0, 1, 1], [], []>} : vector<256x128xbf16>, vector<128x128xbf16>, vector<256x128xf32> -> vector<256x128xf32>
    %c0_48 = arith.constant 0 : index
    %c0_49 = arith.constant 0 : index
    %40 = vector.load %arg3[%c0_48, %c0_49] : memref<256x128xf32, #tpu.memory_space<vmem>>, vector<256x128xf32>
    %41 = arith.addf %40, %39 : vector<256x128xf32>
    %c0_50 = arith.constant 0 : index
    %c0_51 = arith.constant 0 : index
    %42 = vector.load %arg3[%c0_50, %c0_51] : memref<256x128xf32, #tpu.memory_space<vmem>>, vector<256x128xf32>
    tpu.vector_store %arg3[%c0_50, %c0_51], %41 {strides = array<i32>} : memref<256x128xf32, #tpu.memory_space<vmem>>, vector<256x128xf32>,
    %c0_52 = arith.constant 0 : index
    %c1_53 = arith.constant 1 : index
    %c2_54 = arith.constant 2 : index
    %c0_55 = arith.constant 0 : index
    %43 = vector.load %arg1[%c0_52, %c1_53, %c2_54, %c0_55] : memref<1x18x18x128xbf16, #tpu.memory_space<vmem>>, vector<1x16x16x128xbf16>
    %44 = vector.shape_cast %43 : vector<1x16x16x128xbf16> to vector<16x16x128xbf16>
    %45 = vector.shape_cast %44 : vector<16x16x128xbf16> to vector<256x128xbf16>
    %c5 = arith.constant 5 : index
    %c0_56 = arith.constant 0 : index
    %c0_57 = arith.constant 0 : index
    %46 = vector.load %arg2[%c5, %c0_56, %c0_57] : memref<9x128x128xbf16, #tpu.memory_space<vmem>>, vector<1x128x128xbf16>
    %47 = vector.shape_cast %46 : vector<1x128x128xbf16> to vector<128x128xbf16>
    %cst_58 = arith.constant dense<0.000000e+00> : vector<256x128xf32>
    %48 = tpu.matmul %45, %47, %cst_58 {dimension_numbers = #tpu.dot_dimension_numbers<[1], [0], [0], [1], [0, 0, 1, 1], [], []>} : vector<256x128xbf16>, vector<128x128xbf16>, vector<256x128xf32> -> vector<256x128xf32>
    %c0_59 = arith.constant 0 : index
    %c0_60 = arith.constant 0 : index
    %49 = vector.load %arg3[%c0_59, %c0_60] : memref<256x128xf32, #tpu.memory_space<vmem>>, vector<256x128xf32>
    %50 = arith.addf %49, %48 : vector<256x128xf32>
    %c0_61 = arith.constant 0 : index
    %c0_62 = arith.constant 0 : index
    %51 = vector.load %arg3[%c0_61, %c0_62] : memref<256x128xf32, #tpu.memory_space<vmem>>, vector<256x128xf32>
    tpu.vector_store %arg3[%c0_61, %c0_62], %50 {strides = array<i32>} : memref<256x128xf32, #tpu.memory_space<vmem>>, vector<256x128xf32>,
    %c0_63 = arith.constant 0 : index
    %c2_64 = arith.constant 2 : index
    %c0_65 = arith.constant 0 : index
    %c0_66 = arith.constant 0 : index
    %52 = vector.load %arg1[%c0_63, %c2_64, %c0_65, %c0_66] : memref<1x18x18x128xbf16, #tpu.memory_space<vmem>>, vector<1x16x16x128xbf16>
    %53 = vector.shape_cast %52 : vector<1x16x16x128xbf16> to vector<16x16x128xbf16>
    %54 = vector.shape_cast %53 : vector<16x16x128xbf16> to vector<256x128xbf16>
    %c6 = arith.constant 6 : index
    %c0_67 = arith.constant 0 : index
    %c0_68 = arith.constant 0 : index
    %55 = vector.load %arg2[%c6, %c0_67, %c0_68] : memref<9x128x128xbf16, #tpu.memory_space<vmem>>, vector<1x128x128xbf16>
    %56 = vector.shape_cast %55 : vector<1x128x128xbf16> to vector<128x128xbf16>
    %cst_69 = arith.constant dense<0.000000e+00> : vector<256x128xf32>
    %57 = tpu.matmul %54, %56, %cst_69 {dimension_numbers = #tpu.dot_dimension_numbers<[1], [0], [0], [1], [0, 0, 1, 1], [], []>} : vector<256x128xbf16>, vector<128x128xbf16>, vector<256x128xf32> -> vector<256x128xf32>
    %c0_70 = arith.constant 0 : index
    %c0_71 = arith.constant 0 : index
    %58 = vector.load %arg3[%c0_70, %c0_71] : memref<256x128xf32, #tpu.memory_space<vmem>>, vector<256x128xf32>
    %59 = arith.addf %58, %57 : vector<256x128xf32>
    %c0_72 = arith.constant 0 : index
    %c0_73 = arith.constant 0 : index
    %60 = vector.load %arg3[%c0_72, %c0_73] : memref<256x128xf32, #tpu.memory_space<vmem>>, vector<256x128xf32>
    tpu.vector_store %arg3[%c0_72, %c0_73], %59 {strides = array<i32>} : memref<256x128xf32, #tpu.memory_space<vmem>>, vector<256x128xf32>,
    %c0_74 = arith.constant 0 : index
    %c2_75 = arith.constant 2 : index
    %c1_76 = arith.constant 1 : index
    %c0_77 = arith.constant 0 : index
    %61 = vector.load %arg1[%c0_74, %c2_75, %c1_76, %c0_77] : memref<1x18x18x128xbf16, #tpu.memory_space<vmem>>, vector<1x16x16x128xbf16>
    %62 = vector.shape_cast %61 : vector<1x16x16x128xbf16> to vector<16x16x128xbf16>
    %63 = vector.shape_cast %62 : vector<16x16x128xbf16> to vector<256x128xbf16>
    %c7 = arith.constant 7 : index
    %c0_78 = arith.constant 0 : index
    %c0_79 = arith.constant 0 : index
    %64 = vector.load %arg2[%c7, %c0_78, %c0_79] : memref<9x128x128xbf16, #tpu.memory_space<vmem>>, vector<1x128x128xbf16>
    %65 = vector.shape_cast %64 : vector<1x128x128xbf16> to vector<128x128xbf16>
    %cst_80 = arith.constant dense<0.000000e+00> : vector<256x128xf32>
    %66 = tpu.matmul %63, %65, %cst_80 {dimension_numbers = #tpu.dot_dimension_numbers<[1], [0], [0], [1], [0, 0, 1, 1], [], []>} : vector<256x128xbf16>, vector<128x128xbf16>, vector<256x128xf32> -> vector<256x128xf32>
    %c0_81 = arith.constant 0 : index
    %c0_82 = arith.constant 0 : index
    %67 = vector.load %arg3[%c0_81, %c0_82] : memref<256x128xf32, #tpu.memory_space<vmem>>, vector<256x128xf32>
    %68 = arith.addf %67, %66 : vector<256x128xf32>
    %c0_83 = arith.constant 0 : index
    %c0_84 = arith.constant 0 : index
    %69 = vector.load %arg3[%c0_83, %c0_84] : memref<256x128xf32, #tpu.memory_space<vmem>>, vector<256x128xf32>
    tpu.vector_store %arg3[%c0_83, %c0_84], %68 {strides = array<i32>} : memref<256x128xf32, #tpu.memory_space<vmem>>, vector<256x128xf32>,
    %c0_85 = arith.constant 0 : index
    %c2_86 = arith.constant 2 : index
    %c2_87 = arith.constant 2 : index
    %c0_88 = arith.constant 0 : index
    %70 = vector.load %arg1[%c0_85, %c2_86, %c2_87, %c0_88] : memref<1x18x18x128xbf16, #tpu.memory_space<vmem>>, vector<1x16x16x128xbf16>
    %71 = vector.shape_cast %70 : vector<1x16x16x128xbf16> to vector<16x16x128xbf16>
    %72 = vector.shape_cast %71 : vector<16x16x128xbf16> to vector<256x128xbf16>
    %c8 = arith.constant 8 : index
    %c0_89 = arith.constant 0 : index
    %c0_90 = arith.constant 0 : index
    %73 = vector.load %arg2[%c8, %c0_89, %c0_90] : memref<9x128x128xbf16, #tpu.memory_space<vmem>>, vector<1x128x128xbf16>
    %74 = vector.shape_cast %73 : vector<1x128x128xbf16> to vector<128x128xbf16>
    %cst_91 = arith.constant dense<0.000000e+00> : vector<256x128xf32>
    %75 = tpu.matmul %72, %74, %cst_91 {dimension_numbers = #tpu.dot_dimension_numbers<[1], [0], [0], [1], [0, 0, 1, 1], [], []>} : vector<256x128xbf16>, vector<128x128xbf16>, vector<256x128xf32> -> vector<256x128xf32>
    %c0_92 = arith.constant 0 : index
    %c0_93 = arith.constant 0 : index
    %76 = vector.load %arg3[%c0_92, %c0_93] : memref<256x128xf32, #tpu.memory_space<vmem>>, vector<256x128xf32>
    %77 = arith.addf %76, %75 : vector<256x128xf32>
    %c0_94 = arith.constant 0 : index
    %c0_95 = arith.constant 0 : index
    %78 = vector.load %arg3[%c0_94, %c0_95] : memref<256x128xf32, #tpu.memory_space<vmem>>, vector<256x128xf32>
    tpu.vector_store %arg3[%c0_94, %c0_95], %77 {strides = array<i32>} : memref<256x128xf32, #tpu.memory_space<vmem>>, vector<256x128xf32>,
    %c0_96 = arith.constant 0 : index
    %c0_97 = arith.constant 0 : index
    %79 = vector.load %arg3[%c0_96, %c0_97] : memref<256x128xf32, #tpu.memory_space<vmem>>, vector<256x128xf32>
    %cst_98 = arith.constant dense<0.000000e+00> : vector<128xf32>
    %80 = vector.multi_reduction <add>, %79, %cst_98 [0] : vector<256x128xf32> to vector<128xf32>
    %81 = vector.shape_cast %80 : vector<128xf32> to vector<1x128xf32>
    %82 = arith.mulf %79, %79 : vector<256x128xf32>
    %cst_99 = arith.constant dense<0.000000e+00> : vector<128xf32>
    %83 = vector.multi_reduction <add>, %82, %cst_99 [0] : vector<256x128xf32> to vector<128xf32>
    %84 = vector.shape_cast %83 : vector<128xf32> to vector<1x128xf32>
    %c0_i32 = arith.constant 0 : i32
    %85 = arith.cmpi eq, %arg0, %c0_i32 : i32
    %86 = arith.extui %85 : i1 to i32
    %c0_i32_100 = arith.constant 0 : i32
    %87 = arith.cmpi ne, %86, %c0_i32_100 : i32
    scf.if %87 {
      %cst_105 = arith.constant 0.000000e+00 : f32
      %92 = vector.broadcast %cst_105 : f32 to vector<2x128xf32>
      %c0_106 = arith.constant 0 : index
      %c0_107 = arith.constant 0 : index
      %93 = vector.load %arg4[%c0_106, %c0_107] : memref<2x128xf32, #tpu.memory_space<vmem>>, vector<2x128xf32>
      tpu.vector_store %arg4[%c0_106, %c0_107], %92 {strides = array<i32>} : memref<2x128xf32, #tpu.memory_space<vmem>>, vector<2x128xf32>,
    } else {
    }
    %c0_101 = arith.constant 0 : index
    %c0_102 = arith.constant 0 : index
    %88 = vector.load %arg4[%c0_101, %c0_102] : memref<2x128xf32, #tpu.memory_space<vmem>>, vector<2x128xf32>
    %89 = tpu.concatenate %81, %84 in 0 : vector<1x128xf32>, vector<1x128xf32> -> vector<2x128xf32>
    %90 = arith.addf %88, %89 : vector<2x128xf32>
    %c0_103 = arith.constant 0 : index
    %c0_104 = arith.constant 0 : index
    %91 = vector.load %arg4[%c0_103, %c0_104] : memref<2x128xf32, #tpu.memory_space<vmem>>, vector<2x128xf32>
    tpu.vector_store %arg4[%c0_103, %c0_104], %90 {strides = array<i32>} : memref<2x128xf32, #tpu.memory_space<vmem>>, vector<2x128xf32>,
    return
  }
  func.func @transform_0(%arg0: i32) -> (i32, i32, i32, i32) {
    %c0_i32 = arith.constant 0 : i32
    %c0_i32_0 = arith.constant 0 : i32
    %c0_i32_1 = arith.constant 0 : i32
    %c0_i32_2 = arith.constant 0 : i32
    return %arg0, %c0_i32, %c0_i32_0, %c0_i32_1 : i32, i32, i32, i32
  }
  func.func @transform_1(%arg0: i32) -> (i32, i32, i32) {
    %c0_i32 = arith.constant 0 : i32
    %c0_i32_0 = arith.constant 0 : i32
    %c0_i32_1 = arith.constant 0 : i32
    %c0_i32_2 = arith.constant 0 : i32
    return %c0_i32, %c0_i32_0, %c0_i32_1 : i32, i32, i32
  }
  func.func @transform_2(%arg0: i32) -> (i32, i32) {
    %c0_i32 = arith.constant 0 : i32
    %c0_i32_0 = arith.constant 0 : i32
    return %arg0, %c0_i32 : i32, i32
  }
  func.func @transform_3(%arg0: i32) -> (i32, i32) {
    %c0_i32 = arith.constant 0 : i32
    %c0_i32_0 = arith.constant 0 : i32
    %c0_i32_1 = arith.constant 0 : i32
    return %c0_i32, %c0_i32_0 : i32, i32
  }
}

module attributes {stable_mosaic.version = 11 : i64} {
  func.func @_bn_act_kernel(%arg0: i32, %arg1: memref<256x128xf32, #tpu.memory_space<vmem>>, %arg2: memref<2x128xf32, #tpu.memory_space<vmem>>, %arg3: memref<1x128xf32, #tpu.memory_space<vmem>>, %arg4: memref<1x128xf32, #tpu.memory_space<vmem>>, %arg5: memref<256x128xbf16, #tpu.memory_space<vmem>>) attributes {dimension_semantics = [#tpu.dimension_semantics<parallel>], iteration_bounds = array<i64: 2>, scalar_prefetch = 0 : i64, scratch_operands = 0 : i64, tpu.core_type = #tpu.core_type<tc>, window_params = [{transform_indices = @transform_0, window_bounds = array<i64: 256, 128>}, {pipeline_mode = #tpu.pipeline_mode<synchronous>, transform_indices = @transform_1, window_bounds = array<i64: 2, 128>}, {pipeline_mode = #tpu.pipeline_mode<synchronous>, transform_indices = @transform_2, window_bounds = array<i64: 1, 128>}, {pipeline_mode = #tpu.pipeline_mode<synchronous>, transform_indices = @transform_3, window_bounds = array<i64: 1, 128>}, {transform_indices = @transform_4, window_bounds = array<i64: 256, 128>}]} {
    %c0 = arith.constant 0 : index
    %c0_0 = arith.constant 0 : index
    %0 = vector.load %arg2[%c0, %c0_0] : memref<2x128xf32, #tpu.memory_space<vmem>>, vector<2x128xf32>
    %1 = vector.extract_strided_slice %0 {offsets = [0, 0], sizes = [1, 128], strides = [1, 1]} : vector<2x128xf32> to vector<1x128xf32>
    %cst = arith.constant 0.001953125 : f32
    %2 = vector.broadcast %cst : f32 to vector<1x128xf32>
    %3 = arith.mulf %1, %2 : vector<1x128xf32>
    %4 = vector.extract_strided_slice %0 {offsets = [1, 0], sizes = [1, 128], strides = [1, 1]} : vector<2x128xf32> to vector<1x128xf32>
    %cst_1 = arith.constant 0.001953125 : f32
    %5 = vector.broadcast %cst_1 : f32 to vector<1x128xf32>
    %6 = arith.mulf %4, %5 : vector<1x128xf32>
    %7 = arith.mulf %3, %3 : vector<1x128xf32>
    %8 = arith.subf %6, %7 : vector<1x128xf32>
    %cst_2 = arith.constant 9.99999974E-6 : f32
    %9 = vector.broadcast %cst_2 : f32 to vector<1x128xf32>
    %10 = arith.addf %8, %9 : vector<1x128xf32>
    %11 = math.rsqrt %10 : vector<1x128xf32>
    %c0_3 = arith.constant 0 : index
    %c0_4 = arith.constant 0 : index
    %12 = vector.load %arg3[%c0_3, %c0_4] : memref<1x128xf32, #tpu.memory_space<vmem>>, vector<1x128xf32>
    %13 = arith.mulf %11, %12 : vector<1x128xf32>
    %c0_5 = arith.constant 0 : index
    %c0_6 = arith.constant 0 : index
    %14 = vector.load %arg4[%c0_5, %c0_6] : memref<1x128xf32, #tpu.memory_space<vmem>>, vector<1x128xf32>
    %15 = arith.mulf %3, %13 : vector<1x128xf32>
    %16 = arith.subf %14, %15 : vector<1x128xf32>
    %c0_7 = arith.constant 0 : index
    %c0_8 = arith.constant 0 : index
    %17 = vector.load %arg1[%c0_7, %c0_8] : memref<256x128xf32, #tpu.memory_space<vmem>>, vector<256x128xf32>
    %18 = vector.broadcast %13 : vector<1x128xf32> to vector<256x128xf32>
    %19 = arith.mulf %17, %18 : vector<256x128xf32>
    %20 = vector.broadcast %16 : vector<1x128xf32> to vector<256x128xf32>
    %21 = arith.addf %19, %20 : vector<256x128xf32>
    %cst_9 = arith.constant 0.000000e+00 : f32
    %22 = vector.broadcast %cst_9 : f32 to vector<256x128xf32>
    %23 = arith.maximumf %21, %22 : vector<256x128xf32>
    %24 = arith.truncf %23 : vector<256x128xf32> to vector<256x128xbf16>
    %c0_10 = arith.constant 0 : index
    %c0_11 = arith.constant 0 : index
    %25 = vector.load %arg5[%c0_10, %c0_11] : memref<256x128xbf16, #tpu.memory_space<vmem>>, vector<256x128xbf16>
    tpu.vector_store %arg5[%c0_10, %c0_11], %24 {strides = array<i32>} : memref<256x128xbf16, #tpu.memory_space<vmem>>, vector<256x128xbf16>,
    return
  }
  func.func @transform_0(%arg0: i32) -> (i32, i32) {
    %c0_i32 = arith.constant 0 : i32
    %c0_i32_0 = arith.constant 0 : i32
    return %arg0, %c0_i32 : i32, i32
  }
  func.func @transform_1(%arg0: i32) -> (i32, i32) {
    %c0_i32 = arith.constant 0 : i32
    %c0_i32_0 = arith.constant 0 : i32
    %c0_i32_1 = arith.constant 0 : i32
    return %c0_i32, %c0_i32_0 : i32, i32
  }
  func.func @transform_2(%arg0: i32) -> (i32, i32) {
    %c0_i32 = arith.constant 0 : i32
    %c0_i32_0 = arith.constant 0 : i32
    %c0_i32_1 = arith.constant 0 : i32
    return %c0_i32, %c0_i32_0 : i32, i32
  }
  func.func @transform_3(%arg0: i32) -> (i32, i32) {
    %c0_i32 = arith.constant 0 : i32
    %c0_i32_0 = arith.constant 0 : i32
    %c0_i32_1 = arith.constant 0 : i32
    return %c0_i32, %c0_i32_0 : i32, i32
  }
  func.func @transform_4(%arg0: i32) -> (i32, i32) {
    %c0_i32 = arith.constant 0 : i32
    %c0_i32_0 = arith.constant 0 : i32
    return %arg0, %c0_i32 : i32, i32
  }
}

module attributes {stable_mosaic.version = 11 : i64} {
  func.func @_bn_act_kernel(%arg0: i32, %arg1: memref<256x128xf32, #tpu.memory_space<vmem>>, %arg2: memref<2x128xf32, #tpu.memory_space<vmem>>, %arg3: memref<1x128xf32, #tpu.memory_space<vmem>>, %arg4: memref<1x128xf32, #tpu.memory_space<vmem>>, %arg5: memref<256x128xf32, #tpu.memory_space<vmem>>, %arg6: memref<256x128xf32, #tpu.memory_space<vmem>>) attributes {dimension_semantics = [#tpu.dimension_semantics<parallel>], iteration_bounds = array<i64: 2>, scalar_prefetch = 0 : i64, scratch_operands = 0 : i64, tpu.core_type = #tpu.core_type<tc>, window_params = [{transform_indices = @transform_0, window_bounds = array<i64: 256, 128>}, {pipeline_mode = #tpu.pipeline_mode<synchronous>, transform_indices = @transform_1, window_bounds = array<i64: 2, 128>}, {pipeline_mode = #tpu.pipeline_mode<synchronous>, transform_indices = @transform_2, window_bounds = array<i64: 1, 128>}, {pipeline_mode = #tpu.pipeline_mode<synchronous>, transform_indices = @transform_3, window_bounds = array<i64: 1, 128>}, {transform_indices = @transform_4, window_bounds = array<i64: 256, 128>}, {transform_indices = @transform_5, window_bounds = array<i64: 256, 128>}]} {
    %c0 = arith.constant 0 : index
    %c0_0 = arith.constant 0 : index
    %0 = vector.load %arg2[%c0, %c0_0] : memref<2x128xf32, #tpu.memory_space<vmem>>, vector<2x128xf32>
    %1 = vector.extract_strided_slice %0 {offsets = [0, 0], sizes = [1, 128], strides = [1, 1]} : vector<2x128xf32> to vector<1x128xf32>
    %cst = arith.constant 0.001953125 : f32
    %2 = vector.broadcast %cst : f32 to vector<1x128xf32>
    %3 = arith.mulf %1, %2 : vector<1x128xf32>
    %4 = vector.extract_strided_slice %0 {offsets = [1, 0], sizes = [1, 128], strides = [1, 1]} : vector<2x128xf32> to vector<1x128xf32>
    %cst_1 = arith.constant 0.001953125 : f32
    %5 = vector.broadcast %cst_1 : f32 to vector<1x128xf32>
    %6 = arith.mulf %4, %5 : vector<1x128xf32>
    %7 = arith.mulf %3, %3 : vector<1x128xf32>
    %8 = arith.subf %6, %7 : vector<1x128xf32>
    %cst_2 = arith.constant 9.99999974E-6 : f32
    %9 = vector.broadcast %cst_2 : f32 to vector<1x128xf32>
    %10 = arith.addf %8, %9 : vector<1x128xf32>
    %11 = math.rsqrt %10 : vector<1x128xf32>
    %c0_3 = arith.constant 0 : index
    %c0_4 = arith.constant 0 : index
    %12 = vector.load %arg3[%c0_3, %c0_4] : memref<1x128xf32, #tpu.memory_space<vmem>>, vector<1x128xf32>
    %13 = arith.mulf %11, %12 : vector<1x128xf32>
    %c0_5 = arith.constant 0 : index
    %c0_6 = arith.constant 0 : index
    %14 = vector.load %arg4[%c0_5, %c0_6] : memref<1x128xf32, #tpu.memory_space<vmem>>, vector<1x128xf32>
    %15 = arith.mulf %3, %13 : vector<1x128xf32>
    %16 = arith.subf %14, %15 : vector<1x128xf32>
    %c0_7 = arith.constant 0 : index
    %c0_8 = arith.constant 0 : index
    %17 = vector.load %arg1[%c0_7, %c0_8] : memref<256x128xf32, #tpu.memory_space<vmem>>, vector<256x128xf32>
    %18 = vector.broadcast %13 : vector<1x128xf32> to vector<256x128xf32>
    %19 = arith.mulf %17, %18 : vector<256x128xf32>
    %20 = vector.broadcast %16 : vector<1x128xf32> to vector<256x128xf32>
    %21 = arith.addf %19, %20 : vector<256x128xf32>
    %c0_9 = arith.constant 0 : index
    %c0_10 = arith.constant 0 : index
    %22 = vector.load %arg5[%c0_9, %c0_10] : memref<256x128xf32, #tpu.memory_space<vmem>>, vector<256x128xf32>
    %23 = arith.addf %21, %22 : vector<256x128xf32>
    %cst_11 = arith.constant 0.000000e+00 : f32
    %24 = vector.broadcast %cst_11 : f32 to vector<256x128xf32>
    %25 = arith.maximumf %23, %24 : vector<256x128xf32>
    %c0_12 = arith.constant 0 : index
    %c0_13 = arith.constant 0 : index
    %26 = vector.load %arg6[%c0_12, %c0_13] : memref<256x128xf32, #tpu.memory_space<vmem>>, vector<256x128xf32>
    tpu.vector_store %arg6[%c0_12, %c0_13], %25 {strides = array<i32>} : memref<256x128xf32, #tpu.memory_space<vmem>>, vector<256x128xf32>,
    return
  }
  func.func @transform_0(%arg0: i32) -> (i32, i32) {
    %c0_i32 = arith.constant 0 : i32
    %c0_i32_0 = arith.constant 0 : i32
    return %arg0, %c0_i32 : i32, i32
  }
  func.func @transform_1(%arg0: i32) -> (i32, i32) {
    %c0_i32 = arith.constant 0 : i32
    %c0_i32_0 = arith.constant 0 : i32
    %c0_i32_1 = arith.constant 0 : i32
    return %c0_i32, %c0_i32_0 : i32, i32
  }
  func.func @transform_2(%arg0: i32) -> (i32, i32) {
    %c0_i32 = arith.constant 0 : i32
    %c0_i32_0 = arith.constant 0 : i32
    %c0_i32_1 = arith.constant 0 : i32
    return %c0_i32, %c0_i32_0 : i32, i32
  }
  func.func @transform_3(%arg0: i32) -> (i32, i32) {
    %c0_i32 = arith.constant 0 : i32
    %c0_i32_0 = arith.constant 0 : i32
    %c0_i32_1 = arith.constant 0 : i32
    return %c0_i32, %c0_i32_0 : i32, i32
  }
  func.func @transform_4(%arg0: i32) -> (i32, i32) {
    %c0_i32 = arith.constant 0 : i32
    %c0_i32_0 = arith.constant 0 : i32
    return %arg0, %c0_i32 : i32, i32
  }
  func.func @transform_5(%arg0: i32) -> (i32, i32) {
    %c0_i32 = arith.constant 0 : i32
    %c0_i32_0 = arith.constant 0 : i32
    return %arg0, %c0_i32 : i32, i32
  }
}

</mosaic_0001>

<bundles_post_ra>
// kernel: basic_block_forward.5
= control target key start
LH: loop header
LB: loop body
LE: loop exit
PB: predicated region body
PF: predicated region fallthrough
CT: control target
= control target key end

     0   :  { %s792_s15 = smov 0   ;;  %s942_s0 = inlined_call_operand.vmem [shape: f32[512,128], index: 0, kind: input, shape index: {}]   ;;  %s943_s1 = inlined_call_operand.vmem [shape: f32[2,128], index: 1, kind: input, shape index: {}]   ;;  %s944_s2 = inlined_call_operand.vmem [shape: f32[1,128], index: 2, kind: input, shape index: {}]   ;;  %s945_s3 = inlined_call_operand.vmem [shape: f32[1,128], index: 3, kind: input, shape index: {}]   ;;  %s946_s4 = inlined_call_operand.vmem [shape: bf16[512,128], index: 4, kind: output, shape index: {}]  }
   0x1 LB: > { %s578_s16 = sadd.s32 4294967295, %s765_s15   ;;  %p582_p0 = scmp.ge.s32.totalorder %s765_s15, 1  ;;  %s765_s15 = sphi %s792_s15, %s14_s15  }
   0x2   : > { %p163_p1 = scmp.lt.s32.totalorder %s765_s15, 3 }
   0x4   : > { %p164_p2 = pnand %p582_p0, %p163_p1 }
   0x5   : > { %s583_s19 = sshll.u32 (!%p164_p2), %s578_s16, 5 }
   0x6   : > { %167 = sbr.rel (%p164_p2) target bundleno = 74 (0x4a), region = 36  ;;  %p190_p3 = scmp.lt.s32.totalorder (!%p164_p2), %s583_s19, 63 }
   0xb   : > { %v201_v0 = vld [vmem:[%s943_s1] sm:$0x3]  ;;  %s948_s19 = smov (!%p190_p3, %s583_s19), 63  ;;  %v256_v6 = vlaneseq }
   0xc   : > { %v202_v1 = vmul.f32 0.001953125, %v201_v0  ;;  %s584_s20 = sshll.u32 %s948_s19, 3  ;;  %v587_v8 = vld [vmem:[%s944_s2] ss:$0 sm:$0xff]  ;;  %s586_s28 = sshll.u32 %s948_s19, 2 }
   0xd   : > { %v257_v7 = vshrl.u32 %v256_v6, 7  ;;  %s809_s23 = scalar_lea.vmem %s942_s0, %s584_s20  ;;  %v218_v15 = vld [vmem:[%s945_s3] sm:$0x1]  ;;  %s875_s5 = scalar_lea.vmem %s946_s4, %s586_s28 }
   0xe   : > { %v203_v2 = vmul.f32 %v202_v1, %v202_v1  ;;  %v224_v12 = vld [vmem:[%s809_s23] sm:$0xff]  ;;  %v225_v13 = vld [vmem:[%s809_s23 + $0x8] sm:$0xff]  ;;  %v226_v14 = vld [vmem:[%s809_s23 + $0x10] sm:$0xff] }
   0xf   : > { %v258_v9 = vsub.s32 1, %v257_v7  ;;  %v227_v16 = vld [vmem:[%s809_s23 + $0x18] sm:$0xff]  ;;  %v228_v17 = vld [vmem:[%s809_s23 + $0x20] sm:$0xff]  ;;  %v229_v18 = vld [vmem:[%s809_s23 + $0x28] sm:$0xff]  ;;  %v295_v24 = vsub.s32 0, %v257_v7 }
  0x10   : > { %v205_v3 = vrot.slane %v203_v2, 7  ;;  %v230_v21 = vld [vmem:[%s809_s23 + $0x30] sm:$0xff]  ;;  %v231_v22 = vld [vmem:[%s809_s23 + $0x38] sm:$0xff]  ;;  %v232_v23 = vld [vmem:[%s809_s23 + $0x40] sm:$0xff] }
  0x11   : > { %v233_v25 = vld [vmem:[%s809_s23 + $0x48] sm:$0xff]  ;;  %v234_v26 = vld [vmem:[%s809_s23 + $0x50] sm:$0xff]  ;;  %v235_v27 = vld [vmem:[%s809_s23 + $0x58] sm:$0xff] }
  0x12   : > { %v207_v4 = vsub.f32 %v202_v1, %v205_v3  ;;  %v236_v32 = vld [vmem:[%s809_s23 + $0x60] sm:$0xff]  ;;  %v237_v33 = vld [vmem:[%s809_s23 + $0x68] sm:$0xff]  ;;  %v238_v34 = vld [vmem:[%s809_s23 + $0x70] sm:$0xff] }
  0x13   : > { %v239_v39 = vld [vmem:[%s809_s23 + $0x78] sm:$0xff]  ;;  %v240_v40 = vld [vmem:[%s809_s23 + $0x80] sm:$0xff]  ;;  %v241_v41 = vld [vmem:[%s809_s23 + $0x88] sm:$0xff] }
  0x14   : > { %v208_v5 = vadd.f32 1e-05, %v207_v4  ;;  %v242_v46 = vld [vmem:[%s809_s23 + $0x90] sm:$0xff]  ;;  %v243_v47 = vld [vmem:[%s809_s23 + $0x98] sm:$0xff]  ;;  %v244_v48 = vld [vmem:[%s809_s23 + $0xa0] sm:$0xff] }
  0x16   : > { %757 = vrsqrt.f32 %v208_v5 }
  0x23   : > { %v758_v10 = vpop.eup %757 }
  0x24   : > { %v217_v11 = vmul.f32 %v758_v10, %v587_v8 }
  0x26   : > { %v220_v19 = vrot.slane %v217_v11, 1  ;;  %v823_v20 = vrot.slane %v217_v11, %v258_v9 }
  0x28   : > { %v222_v28 = vmul.f32 %v220_v19, %v202_v1  ;;  %v260_v29 = vmul.f32 %v823_v20, %v224_v12  ;;  %v261_v30 = vmul.f32 %v823_v20, %v225_v13  ;;  %v262_v31 = vmul.f32 %v823_v20, %v226_v14 }
  0x29   : > { %v263_v35 = vmul.f32 %v823_v20, %v227_v16  ;;  %v264_v36 = vmul.f32 %v823_v20, %v228_v17  ;;  %v265_v37 = vmul.f32 %v823_v20, %v229_v18  ;;  %v266_v38 = vmul.f32 %v823_v20, %v230_v21 }
  0x2a   : > { %v223_v42 = vsub.f32 %v218_v15, %v222_v28  ;;  %v267_v43 = vmul.f32 %v823_v20, %v231_v22  ;;  %v268_v44 = vmul.f32 %v823_v20, %v232_v23  ;;  %v269_v45 = vmul.f32 %v823_v20, %v233_v25 }
  0x2b   : > { %v270_v49 = vmul.f32 %v823_v20, %v234_v26  ;;  %v271_v50 = vmul.f32 %v823_v20, %v235_v27  ;;  %v272_v51 = vmul.f32 %v823_v20, %v236_v32  ;;  %v273_v52 = vmul.f32 %v823_v20, %v237_v33 }
  0x2c   : > { %v854_v53 = vrot.slane %v223_v42, %v295_v24  ;;  %v274_v54 = vmul.f32 %v823_v20, %v238_v34  ;;  %v275_v55 = vmul.f32 %v823_v20, %v239_v39  ;;  %v276_v56 = vmul.f32 %v823_v20, %v240_v40  ;;  %v245_v34 = vld [vmem:[%s809_s23 + $0xa8] sm:$0xff]  ;;  %v246_v39 = vld [vmem:[%s809_s23 + $0xb0] sm:$0xff]  ;;  %v247_v40 = vld [vmem:[%s809_s23 + $0xb8] sm:$0xff] }
  0x2d   : > { %v277_v57 = vmul.f32 %v823_v20, %v241_v41  ;;  %v278_v58 = vmul.f32 %v823_v20, %v242_v46  ;;  %v279_v59 = vmul.f32 %v823_v20, %v243_v47  ;;  %v280_v60 = vmul.f32 %v823_v20, %v244_v48 }
  0x2e   : > { %v298_v61 = vadd.f32 %v854_v53, %v260_v29  ;;  %v299_v62 = vadd.f32 %v854_v53, %v261_v30  ;;  %v300_v63 = vadd.f32 %v854_v53, %v262_v31  ;;  %v301_v0 = vadd.f32 %v854_v53, %v263_v35 }
  0x2f   : > { %v302_v1 = vadd.f32 %v854_v53, %v264_v36  ;;  %v303_v2 = vadd.f32 %v854_v53, %v265_v37  ;;  %v304_v3 = vadd.f32 %v854_v53, %v266_v38  ;;  %v305_v4 = vadd.f32 %v854_v53, %v267_v43 }
  0x30   : > { %v330_v5 = vmax.f32 %v298_v61, 0.0  ;;  %v331_v6 = vmax.f32 %v299_v62, 0.0  ;;  %v332_v7 = vmax.f32 %v300_v63, 0.0  ;;  %v333_v8 = vmax.f32 %v301_v0, 0.0  ;;  %v252_v62 = vld [vmem:[%s809_s23 + $0xe0] sm:$0xff] }
  0x31   : > { %v334_v9 = vmax.f32 %v302_v1, 0.0  ;;  %v335_v10 = vmax.f32 %v303_v2, 0.0  ;;  %v336_v11 = vmax.f32 %v304_v3, 0.0  ;;  %v337_v12 = vmax.f32 %v305_v4, 0.0 }
  0x32   : > { %v657_v13 = vpack.c.bf16 %v331_v6, %v330_v5  ;;  %v662_v14 = vpack.c.bf16 %v333_v8, %v332_v7  ;;  %v306_v15 = vadd.f32 %v854_v53, %v268_v44  ;;  %v307_v16 = vadd.f32 %v854_v53, %v269_v45  ;;  %v248_v45 = vld [vmem:[%s809_s23 + $0xc0] sm:$0xff]  ;;  %v253_v7 = vld [vmem:[%s809_s23 + $0xe8] sm:$0xff] }
  0x33   : > { %v667_v17 = vpack.c.bf16 %v335_v10, %v334_v9  ;;  %v672_v18 = vpack.c.bf16 %v337_v12, %v336_v11  ;;  %v308_v19 = vadd.f32 %v854_v53, %v270_v49  ;;  %v309_v21 = vadd.f32 %v854_v53, %v271_v50  ;;  %v249_v50 = vld [vmem:[%s809_s23 + $0xc8] sm:$0xff]  ;;  %v254_v12 = vld [vmem:[%s809_s23 + $0xf0] sm:$0xff] }
  0x34   : > { %658 = vst [vmem:[%s875_s5] sm:$0xff] %v657_v13   ;;  %734 = vst [vmem:[%s875_s5 + $0x8] sm:$0xff] %v662_v14   ;;  %v338_v22 = vmax.f32 %v306_v15, 0.0  ;;  %v339_v23 = vmax.f32 %v307_v16, 0.0  ;;  %v310_v24 = vadd.f32 %v854_v53, %v272_v51  ;;  %v311_v25 = vadd.f32 %v854_v53, %v273_v52  ;;  %v255_v13 = vld [vmem:[%s809_s23 + $0xf8] sm:$0xff] }
  0x35   : > { %735 = vst [vmem:[%s875_s5 + $0x10] sm:$0xff] %v667_v17   ;;  %736 = vst [vmem:[%s875_s5 + $0x18] sm:$0xff] %v672_v18   ;;  %v340_v26 = vmax.f32 %v308_v19, 0.0  ;;  %v341_v27 = vmax.f32 %v309_v21, 0.0  ;;  %v312_v28 = vadd.f32 %v854_v53, %v274_v54  ;;  %v313_v29 = vadd.f32 %v854_v53, %v275_v55 }
  0x36   : > { %v677_v30 = vpack.c.bf16 %v339_v23, %v338_v22  ;;  %v342_v31 = vmax.f32 %v310_v24, 0.0  ;;  %v343_v32 = vmax.f32 %v311_v25, 0.0  ;;  %v314_v33 = vadd.f32 %v854_v53, %v276_v56  ;;  %v250_v56 = vld [vmem:[%s809_s23 + $0xd0] sm:$0xff] }
  0x37   : > { %v682_v35 = vpack.c.bf16 %v341_v27, %v340_v26  ;;  %v344_v36 = vmax.f32 %v312_v28, 0.0  ;;  %v345_v37 = vmax.f32 %v313_v29, 0.0  ;;  %v315_v38 = vadd.f32 %v854_v53, %v277_v57  ;;  %v251_v57 = vld [vmem:[%s809_s23 + $0xd8] sm:$0xff] }
  0x38   : > { %737 = vst [vmem:[%s875_s5 + $0x20] sm:$0xff] %v677_v30   ;;  %v687_v41 = vpack.c.bf16 %v343_v32, %v342_v31  ;;  %v346_v42 = vmax.f32 %v314_v33, 0.0  ;;  %v316_v43 = vadd.f32 %v854_v53, %v278_v58  ;;  %v317_v44 = vadd.f32 %v854_v53, %v279_v59 }
  0x39   : > { %738 = vst [vmem:[%s875_s5 + $0x28] sm:$0xff] %v682_v35   ;;  %v692_v46 = vpack.c.bf16 %v345_v37, %v344_v36  ;;  %v347_v47 = vmax.f32 %v315_v38, 0.0  ;;  %v281_v48 = vmul.f32 %v823_v20, %v245_v34  ;;  %v318_v49 = vadd.f32 %v854_v53, %v280_v60 }
  0x3a   : > { %739 = vst [vmem:[%s875_s5 + $0x30] sm:$0xff] %v687_v41   ;;  %v348_v51 = vmax.f32 %v316_v43, 0.0  ;;  %v349_v52 = vmax.f32 %v317_v44, 0.0  ;;  %v282_v54 = vmul.f32 %v823_v20, %v246_v39  ;;  %v283_v55 = vmul.f32 %v823_v20, %v247_v40 }
  0x3b   : > { %740 = vst [vmem:[%s875_s5 + $0x38] sm:$0xff] %v692_v46   ;;  %v697_v58 = vpack.c.bf16 %v347_v47, %v346_v42  ;;  %v319_v59 = vadd.f32 %v854_v53, %v281_v48  ;;  %v350_v61 = vmax.f32 %v318_v49, 0.0  ;;  %v284_v60 = vmul.f32 %v823_v20, %v248_v45 }
  0x3c   : > { %v702_v63 = vpack.c.bf16 %v349_v52, %v348_v51  ;;  %v320_v0 = vadd.f32 %v854_v53, %v282_v54  ;;  %v321_v1 = vadd.f32 %v854_v53, %v283_v55  ;;  %v285_v2 = vmul.f32 %v823_v20, %v249_v50 }
  0x3d   : > { %741 = vst [vmem:[%s875_s5 + $0x40] sm:$0xff] %v697_v58   ;;  %v351_v3 = vmax.f32 %v319_v59, 0.0  ;;  %v322_v4 = vadd.f32 %v854_v53, %v284_v60  ;;  %v286_v5 = vmul.f32 %v823_v20, %v250_v56  ;;  %v287_v6 = vmul.f32 %v823_v20, %v251_v57 }
  0x3e   : > { %742 = vst [vmem:[%s875_s5 + $0x48] sm:$0xff] %v702_v63   ;;  %v352_v8 = vmax.f32 %v320_v0, 0.0  ;;  %v353_v9 = vmax.f32 %v321_v1, 0.0  ;;  %v323_v10 = vadd.f32 %v854_v53, %v285_v2  ;;  %v288_v11 = vmul.f32 %v823_v20, %v252_v62 }
  0x3f   : > { %v707_v14 = vpack.c.bf16 %v351_v3, %v350_v61  ;;  %v354_v15 = vmax.f32 %v322_v4, 0.0  ;;  %v324_v16 = vadd.f32 %v854_v53, %v286_v5  ;;  %v325_v17 = vadd.f32 %v854_v53, %v287_v6 }
  0x40   : > { %v712_v18 = vpack.c.bf16 %v353_v9, %v352_v8  ;;  %v355_v19 = vmax.f32 %v323_v10, 0.0  ;;  %v289_v21 = vmul.f32 %v823_v20, %v253_v7  ;;  %v326_v22 = vadd.f32 %v854_v53, %v288_v11 }
  0x41   : > { %743 = vst [vmem:[%s875_s5 + $0x50] sm:$0xff] %v707_v14   ;;  %v356_v23 = vmax.f32 %v324_v16, 0.0  ;;  %v357_v24 = vmax.f32 %v325_v17, 0.0  ;;  %v290_v25 = vmul.f32 %v823_v20, %v254_v12  ;;  %v291_v26 = vmul.f32 %v823_v20, %v255_v13 }
  0x42   : > { %744 = vst [vmem:[%s875_s5 + $0x58] sm:$0xff] %v712_v18   ;;  %v717_v27 = vpack.c.bf16 %v355_v19, %v354_v15  ;;  %v327_v28 = vadd.f32 %v854_v53, %v289_v21  ;;  %v358_v29 = vmax.f32 %v326_v22, 0.0 }
  0x43   : > { %v722_v30 = vpack.c.bf16 %v357_v24, %v356_v23  ;;  %v328_v31 = vadd.f32 %v854_v53, %v290_v25  ;;  %v329_v32 = vadd.f32 %v854_v53, %v291_v26 }
  0x44   : > { %745 = vst [vmem:[%s875_s5 + $0x60] sm:$0xff] %v717_v27   ;;  %v359_v33 = vmax.f32 %v327_v28, 0.0 }
  0x45   : > { %746 = vst [vmem:[%s875_s5 + $0x68] sm:$0xff] %v722_v30   ;;  %v360_v34 = vmax.f32 %v328_v31, 0.0  ;;  %v361_v35 = vmax.f32 %v329_v32, 0.0 }
  0x46   : > { %v727_v36 = vpack.c.bf16 %v359_v33, %v358_v29 }
  0x47   : > { %v732_v37 = vpack.c.bf16 %v361_v35, %v360_v34 }
  0x48   : > { %747 = vst [vmem:[%s875_s5 + $0x70] sm:$0xff] %v727_v36  }
  0x49   : > { %748 = vst [vmem:[%s875_s5 + $0x78] sm:$0xff] %v732_v37  }
  0x4a PF: > { %s14_s15 = sadd.s32 1, %s765_s15  }
  0x4b   : > { %p11_p4 = scmp.ge.s32.totalorder %s14_s15, 4  }
  0x4d   :  { %13 = sbr.rel (!%p11_p4) target bundleno = 1 (0x1), region = 66 }

// kernel: basic_block_forward.7
= control target key start
LH: loop header
LB: loop body
LE: loop exit
PB: predicated region body
PF: predicated region fallthrough
CT: control target
= control target key end

     0   :  { %s637_s18 = smov 0   ;;  %s862_s0 = inlined_call_operand.vmem [shape: f32[512,128], index: 0, kind: input, shape index: {}]   ;;  %s863_s1 = inlined_call_operand.vmem [shape: f32[2,128], index: 1, kind: input, shape index: {}]   ;;  %s864_s2 = inlined_call_operand.vmem [shape: f32[1,128], index: 2, kind: input, shape index: {}]   ;;  %s865_s3 = inlined_call_operand.vmem [shape: f32[1,128], index: 3, kind: input, shape index: {}]   ;;  %s866_s4 = inlined_call_operand.vmem [shape: f32[512,128], index: 4, kind: input, shape index: {}]   ;;  %s867_s5 = inlined_call_operand.vmem [shape: f32[512,128], index: 5, kind: output, shape index: {}]  }
   0x1 LB: > { %s575_s19 = sadd.s32 4294967295, %s605_s18   ;;  %p579_p0 = scmp.ge.s32.totalorder %s605_s18, 1  ;;  %s605_s18 = sphi %s637_s18, %s15_s18  }
   0x2   : > { %p199_p1 = scmp.lt.s32.totalorder %s605_s18, 3 }
   0x4   : > { %p200_p2 = pnand %p579_p0, %p199_p1 }
   0x5   : > { %s580_s22 = sshll.u32 (!%p200_p2), %s575_s19, 5 }
   0x6   : > { %203 = sbr.rel (%p200_p2) target bundleno = 79 (0x4f), region = 40  ;;  %p233_p3 = scmp.lt.s32.totalorder (!%p200_p2), %s580_s22, 63 }
   0xb   : > { %v250_v0 = vld [vmem:[%s863_s1] sm:$0x3]  ;;  %s869_s22 = smov (!%p233_p3, %s580_s22), 63  ;;  %v305_v6 = vlaneseq }
   0xc   : > { %v251_v1 = vmul.f32 0.001953125, %v250_v0  ;;  %s648_s23 = sshll.u32 %s869_s22, 3  ;;  %v586_v8 = vld [vmem:[%s864_s2] ss:$0 sm:$0xff] }
   0xd   : > { %v306_v7 = vshrl.u32 %v305_v6, 7  ;;  %s654_s26 = scalar_lea.vmem %s862_s0, %s648_s23  ;;  %v267_v15 = vld [vmem:[%s865_s3] sm:$0x1]  ;;  %s686_s8 = scalar_lea.vmem %s866_s4, %s648_s23 }
   0xe   : > { %v252_v2 = vmul.f32 %v251_v1, %v251_v1  ;;  %v273_v12 = vld [vmem:[%s654_s26] sm:$0xff]  ;;  %v274_v13 = vld [vmem:[%s654_s26 + $0x8] sm:$0xff]  ;;  %v275_v14 = vld [vmem:[%s654_s26 + $0x10] sm:$0xff]  ;;  %s748_s11 = scalar_lea.vmem %s867_s5, %s648_s23 }
   0xf   : > { %v307_v9 = vsub.s32 1, %v306_v7  ;;  %v276_v16 = vld [vmem:[%s654_s26 + $0x18] sm:$0xff]  ;;  %v277_v17 = vld [vmem:[%s654_s26 + $0x20] sm:$0xff]  ;;  %v278_v18 = vld [vmem:[%s654_s26 + $0x28] sm:$0xff]  ;;  %v344_v24 = vsub.s32 0, %v306_v7 }
  0x10   : > { %v254_v3 = vrot.slane %v252_v2, 7  ;;  %v279_v21 = vld [vmem:[%s654_s26 + $0x30] sm:$0xff]  ;;  %v280_v22 = vld [vmem:[%s654_s26 + $0x38] sm:$0xff]  ;;  %v281_v23 = vld [vmem:[%s654_s26 + $0x40] sm:$0xff] }
  0x11   : > { %v282_v25 = vld [vmem:[%s654_s26 + $0x48] sm:$0xff]  ;;  %v283_v26 = vld [vmem:[%s654_s26 + $0x50] sm:$0xff]  ;;  %v284_v27 = vld [vmem:[%s654_s26 + $0x58] sm:$0xff] }
  0x12   : > { %v256_v4 = vsub.f32 %v251_v1, %v254_v3  ;;  %v285_v32 = vld [vmem:[%s654_s26 + $0x60] sm:$0xff]  ;;  %v286_v33 = vld [vmem:[%s654_s26 + $0x68] sm:$0xff]  ;;  %v287_v34 = vld [vmem:[%s654_s26 + $0x70] sm:$0xff] }
  0x13   : > { %v288_v39 = vld [vmem:[%s654_s26 + $0x78] sm:$0xff]  ;;  %v289_v40 = vld [vmem:[%s654_s26 + $0x80] sm:$0xff]  ;;  %v290_v41 = vld [vmem:[%s654_s26 + $0x88] sm:$0xff] }
  0x14   : > { %v257_v5 = vadd.f32 1e-05, %v256_v4  ;;  %v291_v46 = vld [vmem:[%s654_s26 + $0x90] sm:$0xff]  ;;  %v292_v47 = vld [vmem:[%s654_s26 + $0x98] sm:$0xff]  ;;  %v293_v48 = vld [vmem:[%s654_s26 + $0xa0] sm:$0xff] }
  0x15   : > { %v379_v54 = vld [vmem:[%s686_s8] sm:$0xff]  ;;  %v380_v55 = vld [vmem:[%s686_s8 + $0x8] sm:$0xff]  ;;  %v381_v59 = vld [vmem:[%s686_s8 + $0x10] sm:$0xff] }
  0x16   : > { %597 = vrsqrt.f32 %v257_v5  ;;  %v382_v60 = vld [vmem:[%s686_s8 + $0x18] sm:$0xff]  ;;  %v383_v61 = vld [vmem:[%s686_s8 + $0x20] sm:$0xff]  ;;  %v384_v6 = vld [vmem:[%s686_s8 + $0x28] sm:$0xff] }
  0x17   : > { %v385_v7 = vld [vmem:[%s686_s8 + $0x30] sm:$0xff] }
  0x23   : > { %v598_v10 = vpop.eup %597 }
  0x24   : > { %v266_v11 = vmul.f32 %v598_v10, %v586_v8  ;;  %v386_v8 = vld [vmem:[%s686_s8 + $0x38] sm:$0xff] }
  0x26   : > { %v269_v19 = vrot.slane %v266_v11, 1  ;;  %v668_v20 = vrot.slane %v266_v11, %v307_v9 }
  0x28   : > { %v271_v28 = vmul.f32 %v269_v19, %v251_v1  ;;  %v309_v29 = vmul.f32 %v668_v20, %v273_v12  ;;  %v310_v30 = vmul.f32 %v668_v20, %v274_v13  ;;  %v311_v31 = vmul.f32 %v668_v20, %v275_v14 }
  0x29   : > { %v312_v35 = vmul.f32 %v668_v20, %v276_v16  ;;  %v313_v36 = vmul.f32 %v668_v20, %v277_v17  ;;  %v314_v37 = vmul.f32 %v668_v20, %v278_v18  ;;  %v315_v38 = vmul.f32 %v668_v20, %v279_v21 }
  0x2a   : > { %v272_v42 = vsub.f32 %v267_v15, %v271_v28  ;;  %v316_v43 = vmul.f32 %v668_v20, %v280_v22  ;;  %v317_v44 = vmul.f32 %v668_v20, %v281_v23  ;;  %v318_v45 = vmul.f32 %v668_v20, %v282_v25  ;;  %v387_v22 = vld [vmem:[%s686_s8 + $0x40] sm:$0xff]  ;;  %v389_v28 = vld [vmem:[%s686_s8 + $0x50] sm:$0xff] }
  0x2b   : > { %v319_v49 = vmul.f32 %v668_v20, %v283_v26  ;;  %v320_v50 = vmul.f32 %v668_v20, %v284_v27  ;;  %v704_v51 = vmul.f32 %v668_v20, %v285_v32  ;;  %v707_v52 = vmul.f32 %v668_v20, %v286_v33  ;;  %v388_v27 = vld [vmem:[%s686_s8 + $0x48] sm:$0xff]  ;;  %v390_v33 = vld [vmem:[%s686_s8 + $0x58] sm:$0xff] }
  0x2c   : > { %v709_v53 = vrot.slane %v272_v42, %v344_v24  ;;  %v323_v56 = vmul.f32 %v668_v20, %v287_v34  ;;  %v324_v57 = vmul.f32 %v668_v20, %v288_v39  ;;  %v716_v58 = vmul.f32 %v668_v20, %v289_v40  ;;  %v391_v34 = vld [vmem:[%s686_s8 + $0x60] sm:$0xff]  ;;  %v392_v39 = vld [vmem:[%s686_s8 + $0x68] sm:$0xff]  ;;  %v393_v40 = vld [vmem:[%s686_s8 + $0x70] sm:$0xff] }
  0x2d   : > { %v722_v62 = vmul.f32 %v668_v20, %v290_v41  ;;  %v725_v63 = vmul.f32 %v668_v20, %v291_v46  ;;  %v728_v0 = vmul.f32 %v668_v20, %v292_v47  ;;  %v731_v1 = vmul.f32 %v668_v20, %v293_v48  ;;  %v394_v41 = vld [vmem:[%s686_s8 + $0x78] sm:$0xff] }
  0x2e   : > { %v347_v2 = vadd.f32 %v709_v53, %v309_v29  ;;  %v348_v3 = vadd.f32 %v709_v53, %v310_v30  ;;  %v349_v4 = vadd.f32 %v709_v53, %v311_v31  ;;  %v350_v5 = vadd.f32 %v709_v53, %v312_v35 }
  0x2f   : > { %v351_v9 = vadd.f32 %v709_v53, %v313_v36  ;;  %v352_v10 = vadd.f32 %v709_v53, %v314_v37  ;;  %v353_v11 = vadd.f32 %v709_v53, %v315_v38  ;;  %v354_v12 = vadd.f32 %v709_v53, %v316_v43 }
  0x30   : > { %v411_v13 = vadd.f32 %v379_v54, %v347_v2  ;;  %v412_v14 = vadd.f32 %v380_v55, %v348_v3  ;;  %v413_v15 = vadd.f32 %v381_v59, %v349_v4  ;;  %v414_v16 = vadd.f32 %v382_v60, %v350_v5  ;;  %v295_v3 = vld [vmem:[%s654_s26 + $0xb0] sm:$0xff]  ;;  %v296_v4 = vld [vmem:[%s654_s26 + $0xb8] sm:$0xff] }
  0x31   : > { %v415_v17 = vadd.f32 %v383_v61, %v351_v9  ;;  %v416_v18 = vadd.f32 %v384_v6, %v352_v10  ;;  %v417_v19 = vadd.f32 %v385_v7, %v353_v11  ;;  %v418_v21 = vadd.f32 %v386_v8, %v354_v12  ;;  %v397_v9 = vld [vmem:[%s686_s8 + $0x90] sm:$0xff]  ;;  %v398_v10 = vld [vmem:[%s686_s8 + $0x98] sm:$0xff] }
  0x32   : > { %v443_v23 = vmax.f32 %v411_v13, 0.0  ;;  %v444_v24 = vmax.f32 %v412_v14, 0.0  ;;  %v445_v25 = vmax.f32 %v413_v15, 0.0  ;;  %v446_v26 = vmax.f32 %v414_v16, 0.0  ;;  %v399_v15 = vld [vmem:[%s686_s8 + $0xa0] sm:$0xff]  ;;  %v400_v16 = vld [vmem:[%s686_s8 + $0xa8] sm:$0xff] }
  0x33   : > { %v447_v29 = vmax.f32 %v415_v17, 0.0  ;;  %v448_v30 = vmax.f32 %v416_v18, 0.0  ;;  %v449_v31 = vmax.f32 %v417_v19, 0.0  ;;  %v450_v32 = vmax.f32 %v418_v21, 0.0 }
  0x34   : > { %475 = vst [vmem:[%s748_s11] sm:$0xff] %v443_v23  ;;  %476 = vst [vmem:[%s748_s11 + $0x8] sm:$0xff] %v444_v24  ;;  %v355_v35 = vadd.f32 %v709_v53, %v317_v44  ;;  %v356_v36 = vadd.f32 %v709_v53, %v318_v45  ;;  %v357_v37 = vadd.f32 %v709_v53, %v319_v49  ;;  %v402_v23 = vld [vmem:[%s686_s8 + $0xb8] sm:$0xff]  ;;  %v297_v24 = vld [vmem:[%s654_s26 + $0xc0] sm:$0xff] }
  0x35   : > { %477 = vst [vmem:[%s748_s11 + $0x10] sm:$0xff] %v445_v25  ;;  %478 = vst [vmem:[%s748_s11 + $0x18] sm:$0xff] %v446_v26  ;;  %v358_v38 = vadd.f32 %v709_v53, %v320_v50  ;;  %v359_v42 = vadd.f32 %v709_v53, %v704_v51  ;;  %v360_v43 = vadd.f32 %v709_v53, %v707_v52  ;;  %v395_v51 = vld [vmem:[%s686_s8 + $0x80] sm:$0xff]  ;;  %v396_v52 = vld [vmem:[%s686_s8 + $0x88] sm:$0xff] }
  0x36   : > { %479 = vst [vmem:[%s748_s11 + $0x20] sm:$0xff] %v447_v29  ;;  %480 = vst [vmem:[%s748_s11 + $0x28] sm:$0xff] %v448_v30  ;;  %v361_v44 = vadd.f32 %v709_v53, %v323_v56  ;;  %v362_v45 = vadd.f32 %v709_v53, %v324_v57  ;;  %v419_v46 = vadd.f32 %v387_v22, %v355_v35  ;;  %v294_v56 = vld [vmem:[%s654_s26 + $0xa8] sm:$0xff]  ;;  %v401_v22 = vld [vmem:[%s686_s8 + $0xb0] sm:$0xff] }
  0x37   : > { %481 = vst [vmem:[%s748_s11 + $0x30] sm:$0xff] %v449_v31  ;;  %482 = vst [vmem:[%s748_s11 + $0x38] sm:$0xff] %v450_v32  ;;  %v420_v47 = vadd.f32 %v388_v27, %v356_v36  ;;  %v421_v48 = vadd.f32 %v389_v28, %v357_v37  ;;  %v422_v49 = vadd.f32 %v390_v33, %v358_v38  ;;  %v298_v28 = vld [vmem:[%s654_s26 + $0xc8] sm:$0xff]  ;;  %v299_v29 = vld [vmem:[%s654_s26 + $0xd0] sm:$0xff] }
  0x38   : > { %v423_v50 = vadd.f32 %v391_v34, %v359_v42  ;;  %v424_v54 = vadd.f32 %v392_v39, %v360_v43  ;;  %v425_v55 = vadd.f32 %v393_v40, %v361_v44  ;;  %v426_v59 = vadd.f32 %v394_v41, %v362_v45  ;;  %v300_v30 = vld [vmem:[%s654_s26 + $0xd8] sm:$0xff]  ;;  %v301_v35 = vld [vmem:[%s654_s26 + $0xe0] sm:$0xff]  ;;  %v302_v45 = vld [vmem:[%s654_s26 + $0xe8] sm:$0xff] }
  0x39   : > { %v451_v57 = vmax.f32 %v419_v46, 0.0  ;;  %v452_v60 = vmax.f32 %v420_v47, 0.0  ;;  %v453_v61 = vmax.f32 %v421_v48, 0.0  ;;  %v454_v2 = vmax.f32 %v422_v49, 0.0  ;;  %v403_v40 = vld [vmem:[%s686_s8 + $0xc0] sm:$0xff]  ;;  %v303_v46 = vld [vmem:[%s654_s26 + $0xf0] sm:$0xff] }
  0x3a   : > { %v455_v5 = vmax.f32 %v423_v50, 0.0  ;;  %v456_v6 = vmax.f32 %v424_v54, 0.0  ;;  %v457_v7 = vmax.f32 %v425_v55, 0.0  ;;  %v458_v8 = vmax.f32 %v426_v59, 0.0  ;;  %v304_v47 = vld [vmem:[%s654_s26 + $0xf8] sm:$0xff]  ;;  %v404_v54 = vld [vmem:[%s686_s8 + $0xc8] sm:$0xff] }
  0x3b   : > { %483 = vst [vmem:[%s748_s11 + $0x40] sm:$0xff] %v451_v57  ;;  %484 = vst [vmem:[%s748_s11 + $0x48] sm:$0xff] %v452_v60  ;;  %v363_v11 = vadd.f32 %v709_v53, %v716_v58  ;;  %v364_v12 = vadd.f32 %v709_v53, %v722_v62  ;;  %v365_v13 = vadd.f32 %v709_v53, %v725_v63  ;;  %v405_v55 = vld [vmem:[%s686_s8 + $0xd0] sm:$0xff]  ;;  %v406_v59 = vld [vmem:[%s686_s8 + $0xd8] sm:$0xff] }
  0x3c   : > { %485 = vst [vmem:[%s748_s11 + $0x50] sm:$0xff] %v453_v61  ;;  %486 = vst [vmem:[%s748_s11 + $0x58] sm:$0xff] %v454_v2  ;;  %v366_v14 = vadd.f32 %v709_v53, %v728_v0  ;;  %v367_v58 = vadd.f32 %v709_v53, %v731_v1  ;;  %v330_v62 = vmul.f32 %v668_v20, %v294_v56  ;;  %v407_v61 = vld [vmem:[%s686_s8 + $0xe0] sm:$0xff] }
  0x3d   : > { %487 = vst [vmem:[%s748_s11 + $0x60] sm:$0xff] %v455_v5  ;;  %488 = vst [vmem:[%s748_s11 + $0x68] sm:$0xff] %v456_v6  ;;  %v331_v63 = vmul.f32 %v668_v20, %v295_v3  ;;  %v332_v0 = vmul.f32 %v668_v20, %v296_v4  ;;  %v427_v17 = vadd.f32 %v395_v51, %v363_v11  ;;  %v409_v11 = vld [vmem:[%s686_s8 + $0xf0] sm:$0xff] }
  0x3e   : > { %489 = vst [vmem:[%s748_s11 + $0x70] sm:$0xff] %v457_v7  ;;  %490 = vst [vmem:[%s748_s11 + $0x78] sm:$0xff] %v458_v8  ;;  %v428_v18 = vadd.f32 %v396_v52, %v364_v12  ;;  %v429_v19 = vadd.f32 %v397_v9, %v365_v13  ;;  %v430_v21 = vadd.f32 %v398_v10, %v366_v14  ;;  %v408_v10 = vld [vmem:[%s686_s8 + $0xe8] sm:$0xff]  ;;  %v410_v12 = vld [vmem:[%s686_s8 + $0xf8] sm:$0xff] }
  0x3f   : > { %v431_v25 = vadd.f32 %v399_v15, %v367_v58  ;;  %v368_v1 = vadd.f32 %v709_v53, %v330_v62  ;;  %v369_v26 = vadd.f32 %v709_v53, %v331_v63  ;;  %v370_v27 = vadd.f32 %v709_v53, %v332_v0 }
  0x40   : > { %v459_v31 = vmax.f32 %v427_v17, 0.0  ;;  %v460_v32 = vmax.f32 %v428_v18, 0.0  ;;  %v461_v33 = vmax.f32 %v429_v19, 0.0  ;;  %v462_v34 = vmax.f32 %v430_v21, 0.0 }
  0x41   : > { %v463_v36 = vmax.f32 %v431_v25, 0.0  ;;  %v432_v37 = vadd.f32 %v400_v16, %v368_v1  ;;  %v433_v38 = vadd.f32 %v401_v22, %v369_v26  ;;  %v434_v39 = vadd.f32 %v402_v23, %v370_v27 }
  0x42   : > { %491 = vst [vmem:[%s748_s11 + $0x80] sm:$0xff] %v459_v31  ;;  %492 = vst [vmem:[%s748_s11 + $0x88] sm:$0xff] %v460_v32  ;;  %v333_v41 = vmul.f32 %v668_v20, %v297_v24  ;;  %v334_v42 = vmul.f32 %v668_v20, %v298_v28  ;;  %v335_v43 = vmul.f32 %v668_v20, %v299_v29 }
  0x43   : > { %493 = vst [vmem:[%s748_s11 + $0x90] sm:$0xff] %v461_v33  ;;  %494 = vst [vmem:[%s748_s11 + $0x98] sm:$0xff] %v462_v34  ;;  %v336_v44 = vmul.f32 %v668_v20, %v300_v30  ;;  %v464_v48 = vmax.f32 %v432_v37, 0.0  ;;  %v465_v49 = vmax.f32 %v433_v38, 0.0  ;;  %v466_v50 = vmax.f32 %v434_v39, 0.0 }
  0x44   : > { %495 = vst [vmem:[%s748_s11 + $0xa0] sm:$0xff] %v463_v36  ;;  %v337_v51 = vmul.f32 %v668_v20, %v301_v35  ;;  %v371_v52 = vadd.f32 %v709_v53, %v333_v41  ;;  %v372_v56 = vadd.f32 %v709_v53, %v334_v42  ;;  %v373_v57 = vadd.f32 %v709_v53, %v335_v43 }
  0x45   : > { %v374_v60 = vadd.f32 %v709_v53, %v336_v44  ;;  %496 = vst [vmem:[%s748_s11 + $0xa8] sm:$0xff] %v464_v48  ;;  %497 = vst [vmem:[%s748_s11 + $0xb0] sm:$0xff] %v465_v49  ;;  %v338_v3 = vmul.f32 %v668_v20, %v302_v45  ;;  %v339_v4 = vmul.f32 %v668_v20, %v303_v46 }
  0x46   : > { %498 = vst [vmem:[%s748_s11 + $0xb8] sm:$0xff] %v466_v50  ;;  %v375_v2 = vadd.f32 %v709_v53, %v337_v51  ;;  %v340_v5 = vmul.f32 %v668_v20, %v304_v47  ;;  %v435_v6 = vadd.f32 %v403_v40, %v371_v52  ;;  %v436_v7 = vadd.f32 %v404_v54, %v372_v56 }
  0x47   : > { %v437_v8 = vadd.f32 %v405_v55, %v373_v57  ;;  %v438_v9 = vadd.f32 %v406_v59, %v374_v60  ;;  %v376_v14 = vadd.f32 %v709_v53, %v338_v3  ;;  %v377_v15 = vadd.f32 %v709_v53, %v339_v4 }
  0x48   : > { %v439_v13 = vadd.f32 %v407_v61, %v375_v2  ;;  %v378_v58 = vadd.f32 %v709_v53, %v340_v5  ;;  %v467_v20 = vmax.f32 %v435_v6, 0.0  ;;  %v468_v62 = vmax.f32 %v436_v7, 0.0 }
  0x49   : > { %v469_v16 = vmax.f32 %v437_v8, 0.0  ;;  %v470_v63 = vmax.f32 %v438_v9, 0.0  ;;  %v440_v17 = vadd.f32 %v408_v10, %v376_v14  ;;  %v441_v18 = vadd.f32 %v409_v11, %v377_v15 }
  0x4a   : > { %v471_v0 = vmax.f32 %v439_v13, 0.0  ;;  %v442_v19 = vadd.f32 %v410_v12, %v378_v58  ;;  %499 = vst [vmem:[%s748_s11 + $0xc0] sm:$0xff] %v467_v20  ;;  %500 = vst [vmem:[%s748_s11 + $0xc8] sm:$0xff] %v468_v62 }
  0x4b   : > { %501 = vst [vmem:[%s748_s11 + $0xd0] sm:$0xff] %v469_v16  ;;  %502 = vst [vmem:[%s748_s11 + $0xd8] sm:$0xff] %v470_v63  ;;  %v472_v21 = vmax.f32 %v440_v17, 0.0  ;;  %v473_v22 = vmax.f32 %v441_v18, 0.0 }
  0x4c   : > { %503 = vst [vmem:[%s748_s11 + $0xe0] sm:$0xff] %v471_v0  ;;  %v474_v23 = vmax.f32 %v442_v19, 0.0 }
  0x4d   : > { %504 = vst [vmem:[%s748_s11 + $0xe8] sm:$0xff] %v472_v21  ;;  %505 = vst [vmem:[%s748_s11 + $0xf0] sm:$0xff] %v473_v22 }
  0x4e   : > { %506 = vst [vmem:[%s748_s11 + $0xf8] sm:$0xff] %v474_v23 }
  0x4f PF: > { %s15_s18 = sadd.s32 1, %s605_s18  }
  0x50   : > { %p12_p4 = scmp.ge.s32.totalorder %s15_s18, 4  }
  0x52   :  { %14 = sbr.rel (!%p12_p4) target bundleno = 1 (0x1), region = 73 }

// kernel: basic_block_forward.4
= control target key start
LH: loop header
LB: loop body
LE: loop exit
PB: predicated region body
PF: predicated region fallthrough
CT: control target
= control target key end

     0   :  { %s7392_s12 = smov 0   ;;  %s9174_s0 = inlined_call_operand.vmem [shape: bf16[2,18,18,128], index: 0, kind: input, shape index: {}]   ;;  %s9175_s1 = inlined_call_operand.vmem [shape: bf16[9,128,128], index: 1, kind: input, shape index: {}]   ;;  %s9176_s2 = inlined_call_operand.vmem [shape: f32[512,128], index: 2, kind: output, shape index: {0}]   ;;  %s9177_s3 = inlined_call_operand.vmem [shape: f32[2,128], index: 3, kind: output, shape index: {1}]  }
   0x1 LB: > { %s7398_s13 = sadd.s32 4294967295, %s7369_s12   ;;  %p5914_p0 = scmp.ge.s32.totalorder %s7369_s12, 1  ;;  %s7369_s12 = sphi %s7392_s12, %s14_s12  }
   0x2   : > { %p135_p1 = scmp.lt.s32.totalorder %s7369_s12, 3 }
   0x4   : > { %p136_p2 = pnand %p5914_p0, %p135_p1 }
   0x6   : > { %139 = sbr.rel (%p136_p2) target bundleno = 613 (0x265), region = 28 }
   0xb   : > { %v7243_v0 = vld [vmem:[%s9175_s1 + $0x38] sm:$0xff]   ;;  %p159_p3 = scmp.lt.s32.totalorder %s7398_s13, 1  ;;  %v7244_v1 = vld [vmem:[%s9175_s1 + $0x30] sm:$0xff]   ;;  %v7245_v2 = vld [vmem:[%s9175_s1 + $0x28] sm:$0xff]   ;;  %vm1473_vm0 = vcmask 1042432   ;;  %vm1474_vm1 = vcmask 1046532  }
   0xc   : > { %7217 = vmatprep.subr.bf16.mxu1 %v7243_v0  ;;  %6785 = vmatprep.subr.bf16.mxu0 %v7243_v0  ;;  %v7246_v3 = vld [vmem:[%s9175_s1 + $0x20] sm:$0xff]   ;;  %v7247_v6 = vld [vmem:[%s9175_s1 + $0x18] sm:$0xff]   ;;  %v7248_v7 = vld [vmem:[%s9175_s1 + $0x10] sm:$0xff]   ;;  %vm604_vm2 = vsmask.f32 3328  ;;  %s5916_s14 = sshll.u32 %s7398_s13, 5 }
   0xd   : > { %s160_s18 = scalar_select %p159_p3, %s7398_s13, 1  ;;  %7225 = vmatpush3.bf16.msra.mxu1 %v7243_v0  ;;  %6786 = vmatpush3.bf16.msra.mxu0 %v7243_v0  ;;  %v7249_v8 = vld [vmem:[%s9175_s1 + $0x8] sm:$0xff]   ;;  %v7250_v9 = vld [vmem:[%s9175_s1] sm:$0xff]   ;;  %v7253_v10 = vld [vmem:[%s9175_s1 + $0x78] sm:$0xff]   ;;  %vm605_vm3 = vsmask.f32 7440 }
   0xe   : > { %7218 = vmatprep.subr.bf16.mxu1 %v7244_v1  ;;  %6787 = vmatprep.subr.bf16.mxu0 %v7244_v1  ;;  %v7257_v11 = vld [vmem:[%s9175_s1 + $0xb8] sm:$0xff]   ;;  %v7255_v13 = vld [vmem:[%s9175_s1 + $0x70] sm:$0xff]   ;;  %v7260_v18 = vld [vmem:[%s9175_s1 + $0x68] sm:$0xff]   ;;  %p8002_p4 = scmp.lt.s32.totalorder %s5916_s14, 63  ;;  %p6566_p5 = scmp.ne.s32.totalorder %s7398_s13, 0 }
   0xf   : > { %s7233_s21 = smul.u32 216, %s160_s18  ;;  %v7261_v16 = vld [vmem:[%s9175_s1 + $0xb0] sm:$0xff]   ;;  %v7265_v20 = vld [vmem:[%s9175_s1 + $0xa8] sm:$0xff]   ;;  %v7263_v22 = vld [vmem:[%s9175_s1 + $0x60] sm:$0xff]  }
  0x10   : > { %v7269_v24 = vld [vmem:[%s9175_s1 + $0xa0] sm:$0xff]   ;;  %v7268_v35 = vld [vmem:[%s9175_s1 + $0x58] sm:$0xff]   ;;  %vm7483_vm4 = vmor %vm604_vm2, %vm605_vm3  ;;  %s9224_s14 = smov (!%p8002_p4, %s5916_s14), 63 }
  0x11   : > { %s7416_s24 = scalar_lea.vmem %s9174_s0, %s7233_s21  ;;  %7226 = vmatpush3.bf16.msra.mxu1 %v7244_v1  ;;  %6788 = vmatpush3.bf16.msra.mxu0 %v7244_v1  ;;  %v7273_v46 = vld [vmem:[%s9175_s1 + $0x98] sm:$0xff]   ;;  %v7490_v55 = vld [vmem:[%s9175_s1 + $0x50] sm:$0xff]   ;;  %vm7503_vm5 = vmor %vm1473_vm0, %vm1474_vm1  ;;  %s5917_s20 = sshll.u32 %s9224_s14, 3 }
  0x12   : > { %7219 = vmatprep.subr.bf16.mxu1 %v7245_v2  ;;  %6789 = vmatprep.subr.bf16.mxu0 %v7245_v2  ;;  %v7251_v4 = vld [vmem:[%s7416_s24 + $0x60] sm:$0xff]   ;;  %v7252_v12 = vld [vmem:[%s7416_s24 + $0x6c] sm:$0xff]   ;;  %v7258_v15 = vld [vmem:[%s7416_s24 + $0x78] sm:$0xff]   ;;  %s8066_s28 = scalar_lea.vmem %s9176_s2, %s5917_s20 }
  0x13   : > { %6817 = vmatprep.mubr.bf16.mxu1 %v7251_v4  ;;  %v7254_v5 = vld [vmem:[%s7416_s24] sm:$0xff]   ;;  %v7256_v14 = vld [vmem:[%s7416_s24 + $0xc] sm:$0xff]   ;;  %v7262_v17 = vld [vmem:[%s7416_s24 + $0x18] sm:$0xff]  }
  0x14   : > { %6801 = vmatprep.mubr.bf16.mxu0 %v7254_v5  ;;  %v7259_v19 = vld [vmem:[%s7416_s24 + $0x84] sm:$0xff]   ;;  %v7266_v23 = vld [vmem:[%s7416_s24 + $0x90] sm:$0xff]   ;;  %v556_v25 = vld [vmem:[%s7416_s24] sm:$0xf] }
  0x15   : > { %7227 = vmatpush3.bf16.msra.mxu1 %v7245_v2  ;;  %6790 = vmatpush3.bf16.msra.mxu0 %v7245_v2  ;;  %v7264_v21 = vld [vmem:[%s7416_s24 + $0x24] sm:$0xff]   ;;  %v608_v28 = vshrl.u32 %v556_v25, 16  ;;  %v611_v29 = vshll.u32 %v556_v25, 16  ;;  %v7270_v30 = vld [vmem:[%s7416_s24 + $0x30] sm:$0xff]   ;;  %v559_v34 = vld [vmem:[%s7416_s24 + $0xc] sm:$0xf] }
  0x16   : > { %7220 = vmatprep.subr.bf16.mxu1 %v7246_v3  ;;  %6791 = vmatprep.subr.bf16.mxu0 %v7246_v3  ;;  %v557_v26 = vld [vmem:[%s7416_s24 + $0x4] sm:$0xf]  ;;  %v558_v27 = vld [vmem:[%s7416_s24 + $0x8] sm:$0x1]  ;;  %v560_v38 = vld [vmem:[%s7416_s24 + $0x10] sm:$0xf] }
  0x17   : > { %v617_v31 = vshll.u32 %v557_v26, 16  ;;  %v621_v32 = vshrl.u32 %v557_v26, 16  ;;  %v627_v33 = vshll.u32 %v558_v27, 16  ;;  %v610_v36 = vrot.slane %v608_v28, 4  ;;  %v561_v39 = vld [vmem:[%s7416_s24 + $0x14] sm:$0x1] }
  0x18   : > { %v613_v37 = vrot.slane %v611_v29, 5  ;;  %v632_v43 = vshrl.u32 %v559_v34, 16  ;;  %v7267_v44 = vld [vmem:[%s7416_s24 + $0x9c] sm:$0xff]   ;;  %v635_v48 = vshll.u32 %v559_v34, 16  ;;  %v641_v49 = vshll.u32 %v560_v38, 16  ;;  %v7274_v56 = vld [vmem:[%s7416_s24 + $0xa8] sm:$0xff]  }
  0x19   : > { %7228 = vmatpush3.bf16.msra.mxu1 %v7246_v3  ;;  %6792 = vmatpush3.bf16.msra.mxu0 %v7246_v3  ;;  %v619_v40 = vrot.slane %v617_v31, 5  ;;  %v623_v41 = vrot.slane %v621_v32, 4  ;;  %v629_v42 = vrot.slane %v627_v33, 5  ;;  %v7272_v45 = vld [vmem:[%s7416_s24 + $0x3c] sm:$0xff]   ;;  %v645_v50 = vshrl.u32 %v560_v38, 16  ;;  %v7277_v62 = vld [vmem:[%s9175_s1 + $0x90] sm:$0xff]  }
  0x1a   : > { %7221 = vmatprep.subr.bf16.mxu1 %v7247_v6  ;;  %6793 = vmatprep.subr.bf16.mxu0 %v7247_v6  ;;  %v614_v47 = vor.u32 %v613_v37, %v610_v36  ;;  %v634_v53 = vrot.slane %v632_v43, 4  ;;  %v651_v54 = vshll.u32 %v561_v39, 16  ;;  %v637_v58 = vrot.slane %v635_v48, 5  ;;  %v1377_v61 = vld [vmem:[%s7416_s24] sm:$0xe]  ;;  %v7275_v27 = vld [vmem:[%s7416_s24 + $0xb4] sm:$0xff]  }
  0x1b   : > { %v624_v52 = vor.u32 %v623_v41, %v619_v40  ;;  %v643_v59 = vrot.slane %v641_v49, 5  ;;  %v647_v60 = vrot.slane %v645_v50, 4  ;;  %v1378_v1 = vld [vmem:[%s7416_s24 + $0x4] sm:$0xf]  ;;  %v1379_v2 = vld [vmem:[%s7416_s24 + $0x8] sm:$0x1] }
  0x1c   : > { %v615_v57 = vrot.slane %v614_v47, 4  ;;  %v653_v0 = vrot.slane %v651_v54, 5  ;;  %v638_v4 = vor.u32 %v637_v58, %v634_v53  ;;  %v563_v25 = vld [vmem:[%s7416_s24 + $0x1c] sm:$0xf]  ;;  %v564_v26 = vld [vmem:[%s7416_s24 + $0x20] sm:$0x1] }
  0x1d   : > { %7229 = vmatpush3.bf16.msra.mxu1 %v7247_v6  ;;  %6794 = vmatpush3.bf16.msra.mxu0 %v7247_v6  ;;  %v625_v63 = vrot.slane %v624_v52, 4  ;;  %v648_v5 = vor.u32 %v647_v60, %v643_v59  ;;  %v7280_v28 = vld [vmem:[%s7416_s24 + $0x54] sm:$0xff]   ;;  %v7281_v29 = vld [vmem:[%s9175_s1 + $0x88] sm:$0xff]   ;;  %v565_v34 = vld [vmem:[%s7416_s24 + $0x24] sm:$0xf]  ;;  %v665_v43 = vshll.u32 %v563_v25, 16 }
  0x1e   : > { %7222 = vmatprep.subr.bf16.mxu1 %v7248_v7  ;;  %6795 = vmatprep.subr.bf16.mxu0 %v7248_v7  ;;  %v620_v3 = vsel %vm7483_vm4, %v615_v57, %v619_v40  ;;  %v567_v40 = vld [vmem:[%s7416_s24 + $0x2c] sm:$0x1]  ;;  %v675_v49 = vshll.u32 %v564_v26, 16  ;;  %v680_v53 = vshrl.u32 %v565_v34, 16  ;;  %v683_v54 = vshll.u32 %v565_v34, 16 }
  0x1f   : > { %v667_v50 = vrot.slane %v665_v43, 5  ;;  %v569_v26 = vld [vmem:[%s7416_s24 + $0x34] sm:$0xf] }
  0x20   : > { %v677_v58 = vrot.slane %v675_v49, 5 }
  0x21   : > { %7230 = vmatpush3.bf16.msra.mxu1 %v7248_v7  ;;  %6796 = vmatpush3.bf16.msra.mxu0 %v7248_v7  ;;  %v5982_v7 = vrot.slane %v1377_v61, 9  ;;  %v1384_v61 = vld [vmem:[%s7416_s24 + $0x1c] sm:$0xf] }
  0x22   : > { %7223 = vmatprep.subr.bf16.mxu1 %v7249_v8  ;;  %6797 = vmatprep.subr.bf16.mxu0 %v7249_v8 }
  0x25   : > { %7231 = vmatpush3.bf16.msra.mxu1 %v7249_v8  ;;  %6798 = vmatpush3.bf16.msra.mxu0 %v7249_v8  ;;  %v1380_v8 = vld [vmem:[%s7416_s24 + $0xc] sm:$0xe] }
  0x26   : > { %7224 = vmatprep.subr.bf16.mxu1 %v7250_v9  ;;  %6799 = vmatprep.subr.bf16.mxu0 %v7250_v9 }
  0x29   : > { %7232 = vmatpush3.bf16.msra.mxu1 %v7250_v9  ;;  %6800 = vmatpush3.bf16.msra.mxu0 %v7250_v9  ;;  %v1381_v9 = vld [vmem:[%s7416_s24 + $0x10] sm:$0xf] }
  0x2a   : > { %6833 = vmatprep.subr.bf16.mxu1 %v7253_v10  ;;  %6881 = vmatprep.subr.bf16.mxu0 %v7257_v11 }
  0x2c   : > { %6818 = vmatmul.mubr.bf16.vlgmr.msra.gmra.mxu1 %v7252_v12  ;;  %6802 = vmatmul.mubr.bf16.vlgmr.msra.gmra.mxu0 %v7256_v14  ;;  %v1478_v12 = vrot.slane %v1378_v1, 5  ;;  %v1382_v14 = vld [vmem:[%s7416_s24 + $0x14] sm:$0x1]  ;;  %v685_v1 = vrot.slane %v683_v54, 5  ;;  %v7286_v54 = vld [vmem:[%s9175_s1 + $0xe8] sm:$0xff]  }
  0x2d   : > { %6834 = vmatpush3.bf16.msra.mxu1 %v7253_v10  ;;  %6882 = vmatpush3.bf16.msra.mxu0 %v7257_v11  ;;  %v7278_v10 = vld [vmem:[%s7416_s24 + $0x48] sm:$0xff]   ;;  %v630_v11 = vsel %vm7483_vm4, %v625_v63, %v629_v42 }
  0x2e   : > { %6835 = vmatprep.subr.bf16.mxu1 %v7255_v13  ;;  %6821 = vmatprep.mubr.bf16.mxu1 %v7258_v15  ;;  %v5983_v15 = vrot.slane %v1380_v8, 9 }
  0x2f   : > { %6883 = vmatprep.subr.bf16.mxu0 %v7261_v16  ;;  %6805 = vmatprep.mubr.bf16.mxu0 %v7262_v17  ;;  %v639_v17 = vrot.slane %v638_v4, 4 }
  0x31   : > { %6836 = vmatpush3.bf16.msra.mxu1 %v7255_v13  ;;  %6884 = vmatpush3.bf16.msra.mxu0 %v7261_v16  ;;  %v1481_v13 = vrot.slane %v1379_v2, 5  ;;  %v7276_v16 = vld [vmem:[%s9175_s1 + $0x48] sm:$0xff]   ;;  %v699_v2 = vshll.u32 %v567_v40, 16  ;;  %v572_v40 = vld [vmem:[%s7416_s24 + $0x40] sm:$0xf] }
  0x32   : > { %6837 = vmatprep.subr.bf16.mxu1 %v7260_v18  ;;  %6885 = vmatprep.subr.bf16.mxu0 %v7265_v20 }
  0x34   : > { %6822 = vmatmul.mubr.bf16.gmra.mxu1 %v7259_v19  ;;  %6806 = vmatmul.mubr.bf16.gmra.mxu0 %v7264_v21  ;;  %v1485_v19 = vrot.slane %v1381_v9, 5  ;;  %v7517_v21 = vcombine.low %v620_v3, %v630_v11  ;;  %v1385_v3 = vld [vmem:[%s7416_s24 + $0x20] sm:$0x1]  ;;  %v1386_v9 = vld [vmem:[%s7416_s24 + $0x24] sm:$0xe] }
  0x35   : > { %6838 = vmatpush3.bf16.msra.mxu1 %v7260_v18  ;;  %6886 = vmatpush3.bf16.msra.mxu0 %v7265_v20  ;;  %v649_v18 = vrot.slane %v648_v5, 4  ;;  %v562_v20 = vld [vmem:[%s7416_s24 + $0x18] sm:$0xf] }
  0x36   : > { %6839 = vmatprep.subr.bf16.mxu1 %v7263_v22  ;;  %6825 = vmatprep.mubr.bf16.mxu1 %v7266_v23  ;;  %v1480_v23 = vrot.slane %v1478_v12, 4  ;;  %v7537_v32 = vsel %vm7503_vm5, %v5983_v15, %v1485_v19  ;;  %v1487_v33 = vrot.slane %v1485_v19, 4  ;;  %v656_v38 = vshrl.u32 %v562_v20, 16  ;;  %v1387_v15 = vld [vmem:[%s7416_s24 + $0x28] sm:$0xf] }
  0x37   : > { %6887 = vmatprep.subr.bf16.mxu0 %v7269_v24  ;;  %6809 = vmatprep.mubr.bf16.mxu0 %v7270_v30  ;;  %v644_v30 = vsel %vm7483_vm4, %v639_v17, %v643_v59  ;;  %v654_v31 = vsel %vm7483_vm4, %v649_v18, %v653_v0  ;;  %v659_v39 = vshll.u32 %v562_v20, 16  ;;  %v682_v0 = vrot.slane %v680_v53, 4  ;;  %v1388_v19 = vld [vmem:[%s7416_s24 + $0x2c] sm:$0x1] }
  0x38   : > { %v7541_v36 = vcombine.low %v644_v30, %v654_v31  ;;  %v1482_v37 = vsel %vm7503_vm5, %v1480_v23, %v1481_v13  ;;  %v658_v47 = vrot.slane %v656_v38, 4  ;;  %v7285_v13 = vld [vmem:[%s9175_s1 + $0x138] sm:$0xff]   ;;  %v1495_v18 = vrot.slane %v1385_v3, 5 }
  0x39   : > { %6840 = vmatpush3.bf16.msra.mxu1 %v7263_v22  ;;  %6888 = vmatpush3.bf16.msra.mxu0 %v7269_v24  ;;  %v7521_v22 = vsel %vm7503_vm5, %v5982_v7, %v1478_v12  ;;  %v1488_v24 = vrot.slane %v1382_v14, 5  ;;  %v661_v48 = vrot.slane %v659_v39, 5  ;;  %v686_v11 = vor.u32 %v685_v1, %v682_v0  ;;  %v571_v39 = vld [vmem:[%s7416_s24 + $0x3c] sm:$0xf] }
  0x3a   : > { %6841 = vmatprep.subr.bf16.mxu1 %v7268_v35  ;;  %6889 = vmatprep.subr.bf16.mxu0 %v7273_v46  ;;  %v6014_v41 = vcombine.low %v7521_v22, %v1482_v37  ;;  %v701_v12 = vrot.slane %v699_v2, 5  ;;  %v1492_v14 = vrot.slane %v1384_v61, 5  ;;  %v5985_v20 = vrot.slane %v1386_v9, 9  ;;  %v1390_v61 = vld [vmem:[%s7416_s24 + $0x34] sm:$0xf] }
  0x3b   : > { %v7549_v42 = vsel %vm7503_vm5, %v1487_v33, %v1488_v24  ;;  %v662_v57 = vor.u32 %v661_v48, %v658_v47  ;;  %v687_v23 = vrot.slane %v686_v11, 4  ;;  %v1499_v30 = vrot.slane %v1387_v15, 5  ;;  %v570_v33 = vld [vmem:[%s7416_s24 + $0x38] sm:$0x1]  ;;  %v573_v47 = vld [vmem:[%s7416_s24 + $0x44] sm:$0x1] }
  0x3c   : > { %6826 = vmatmul.mubr.bf16.gmra.mxu1 %v7267_v44  ;;  %6810 = vmatmul.mubr.bf16.gmra.mxu0 %v7272_v45  ;;  %v669_v44 = vshrl.u32 %v563_v25, 16  ;;  %v7279_v45 = vld [vmem:[%s9175_s1 + $0x40] sm:$0xff]   ;;  %v1494_v25 = vrot.slane %v1492_v14, 4  ;;  %v1502_v31 = vrot.slane %v1388_v19, 5  ;;  %v7287_v48 = vld [vmem:[%s9175_s1 + $0x130] sm:$0xff]   ;;  %v713_v53 = vshll.u32 %v569_v26, 16 }
  0x3d   : > { %6842 = vmatpush3.bf16.msra.mxu1 %v7268_v35  ;;  %6890 = vmatpush3.bf16.msra.mxu0 %v7273_v46  ;;  %v566_v35 = vld [vmem:[%s7416_s24 + $0x28] sm:$0xf]  ;;  %v6015_v46 = vcombine.low %v7537_v32, %v7549_v42  ;;  %v663_v4 = vrot.slane %v662_v57, 4  ;;  %v728_v57 = vshrl.u32 %v571_v39, 16  ;;  %v737_v1 = vshll.u32 %v572_v40, 16 }
  0x3e   : > { %6843 = vmatprep.subr.bf16.mxu1 %v7490_v55  ;;  %6829 = vmatprep.mubr.bf16.mxu1 %v7274_v56  ;;  %v671_v52 = vrot.slane %v669_v44, 4  ;;  %v7283_v56 = vld [vmem:[%s9175_s1 + $0x80] sm:$0xff]   ;;  %v689_v59 = vshll.u32 %v566_v35, 16  ;;  %v693_v60 = vshrl.u32 %v566_v35, 16  ;;  %v1496_v35 = vsel %vm7503_vm5, %v1494_v25, %v1495_v18  ;;  %v7289_v32 = vld [vmem:[%s9175_s1 + $0x128] sm:$0xff]  }
  0x3f   : > { %6891 = vmatprep.subr.bf16.mxu0 %v7277_v62  ;;  %6813 = vmatprep.mubr.bf16.mxu0 %v7278_v10  ;;  %v1500_v44 = vsel %vm7503_vm5, %v5985_v20, %v1499_v30  ;;  %v730_v0 = vrot.slane %v728_v57, 4  ;;  %v1391_v2 = vld [vmem:[%s7416_s24 + $0x38] sm:$0x1]  ;;  %v1394_v19 = vld [vmem:[%s7416_s24 + $0x44] sm:$0x1] }
  0x40   : > { %v672_v63 = vor.u32 %v671_v52, %v667_v50  ;;  %v691_v5 = vrot.slane %v689_v59, 5  ;;  %v695_v7 = vrot.slane %v693_v60, 4  ;;  %v731_v59 = vshll.u32 %v571_v39, 16  ;;  %v1389_v60 = vld [vmem:[%s7416_s24 + $0x30] sm:$0xe]  ;;  %v7291_v25 = vld [vmem:[%s9175_s1 + $0x120] sm:$0xff]  }
  0x41   : > { %6844 = vmatpush3.bf16.msra.mxu1 %v7490_v55  ;;  %6892 = vmatpush3.bf16.msra.mxu0 %v7277_v62  ;;  %v1383_v55 = vld [vmem:[%s7416_s24 + $0x18] sm:$0xe]  ;;  %v5986_v11 = vrot.slane %v1389_v60, 9  ;;  %v574_v20 = vld [vmem:[%s7416_s24 + $0x48] sm:$0xf] }
  0x42   : > { %6845 = vmatprep.subr.bf16.mxu1 %v7276_v16  ;;  %6893 = vmatprep.subr.bf16.mxu0 %v7281_v29  ;;  %v7282_v62 = vld [vmem:[%s9175_s1 + $0xf8] sm:$0xff]   ;;  %v5984_v8 = vrot.slane %v1383_v55, 9  ;;  %v673_v10 = vrot.slane %v672_v63, 4  ;;  %v696_v17 = vor.u32 %v695_v7, %v691_v5  ;;  %v692_v34 = vsel %vm7483_vm4, %v687_v23, %v691_v5 }
  0x43   : > { %v741_v5 = vshrl.u32 %v572_v40, 16  ;;  %v747_v7 = vshll.u32 %v573_v47, 16 }
  0x44   : > { %6830 = vmatmul.mubr.bf16.gmra.mxu1 %v7275_v27  ;;  %6814 = vmatmul.mubr.bf16.gmra.mxu0 %v7280_v28  ;;  %v678_v22 = vsel %vm7483_vm4, %v673_v10, %v677_v58  ;;  %v1493_v24 = vsel %vm7503_vm5, %v5984_v8, %v1492_v14  ;;  %v697_v28 = vrot.slane %v696_v17, 4  ;;  %v715_v58 = vrot.slane %v713_v53, 5  ;;  %v1392_v8 = vld [vmem:[%s7416_s24 + $0x3c] sm:$0xe]  ;;  %v7288_v14 = vld [vmem:[%s9175_s1 + $0xe0] sm:$0xff]  }
  0x45   : > { %6846 = vmatpush3.bf16.msra.mxu1 %v7276_v16  ;;  %6894 = vmatpush3.bf16.msra.mxu0 %v7281_v29  ;;  %v668_v16 = vsel %vm7483_vm4, %v663_v4, %v667_v50  ;;  %v7284_v29 = vld [vmem:[%s9175_s1 + $0xf0] sm:$0xff]   ;;  %v6016_v43 = vcombine.low %v1493_v24, %v1496_v35  ;;  %v733_v4 = vrot.slane %v731_v59, 5  ;;  %v739_v10 = vrot.slane %v737_v1, 5  ;;  %v7293_v53 = vld [vmem:[%s9175_s1 + $0x118] sm:$0xff]  }
  0x46   : > { %6847 = vmatprep.subr.bf16.mxu1 %v7279_v45  ;;  %6849 = vmatprep.mubr.bf16.mxu1 %v7517_v21  ;;  %v568_v21 = vld [vmem:[%s7416_s24 + $0x30] sm:$0xf]  ;;  %v5960_v27 = vcombine.low %v668_v16, %v678_v22  ;;  %v743_v17 = vrot.slane %v741_v5, 4  ;;  %v749_v18 = vrot.slane %v747_v7, 5  ;;  %v1509_v24 = vrot.slane %v1391_v2, 5 }
  0x47   : > { %6895 = vmatprep.subr.bf16.mxu0 %v7283_v56  ;;  %6897 = vmatprep.mubr.bf16.mxu0 %v6014_v41  ;;  %v704_v37 = vshrl.u32 %v568_v21, 16  ;;  %v707_v38 = vshll.u32 %v568_v21, 16  ;;  %v702_v41 = vsel %vm7483_vm4, %v697_v28, %v701_v12  ;;  %v1506_v12 = vrot.slane %v1390_v61, 5  ;;  %v576_v35 = vld [vmem:[%s7416_s24 + $0x50] sm:$0x1] }
  0x48   : > { %v5961_v49 = vcombine.low %v692_v34, %v702_v41  ;;  %v734_v16 = vor.u32 %v733_v4, %v730_v0  ;;  %v5987_v28 = vrot.slane %v1392_v8, 9  ;;  %v1516_v34 = vrot.slane %v1394_v19, 5  ;;  %v7292_v0 = vld [vmem:[%s9175_s1 + $0xd0] sm:$0xff]  }
  0x49   : > { %6848 = vmatpush3.bf16.msra.mxu1 %v7279_v45  ;;  %6896 = vmatpush3.bf16.msra.mxu0 %v7283_v56  ;;  %v1501_v45 = vrot.slane %v1499_v30, 4  ;;  %v706_v50 = vrot.slane %v704_v37, 4  ;;  %v709_v52 = vrot.slane %v707_v38, 5  ;;  %v723_v56 = vshll.u32 %v570_v33, 16  ;;  %v575_v30 = vld [vmem:[%s7416_s24 + $0x4c] sm:$0xf] }
  0x4a   : > { %6929 = vmatprep.subr.bf16.mxu1 %v7282_v62  ;;  %6977 = vmatprep.subr.bf16.mxu0 %v7285_v13  ;;  %v1507_v22 = vsel %vm7503_vm5, %v5986_v11, %v1506_v12  ;;  %v1508_v23 = vrot.slane %v1506_v12, 4  ;;  %v752_v37 = vshrl.u32 %v574_v20, 16  ;;  %v577_v38 = vld [vmem:[%s7416_s24 + $0x54] sm:$0xf]  ;;  %v1397_v5 = vld [vmem:[%s7416_s24 + $0x50] sm:$0x1] }
  0x4b   : > { %v1503_v55 = vsel %vm7503_vm5, %v1501_v45, %v1502_v31  ;;  %v725_v63 = vrot.slane %v723_v56, 5  ;;  %v7290_v45 = vld [vmem:[%s9175_s1 + $0xd8] sm:$0xff]   ;;  %v771_v56 = vshll.u32 %v576_v35, 16  ;;  %v7295_v7 = vld [vmem:[%s9175_s1 + $0x110] sm:$0xff]   ;;  %v581_v35 = vld [vmem:[%s7416_s24 + $0x64] sm:$0xf] }
  0x4c   : > { %6850 = vmatmul.mubr.bf16.vlgmr.msra.gmra.mxu1 %v7541_v36  ;;  %6898 = vmatmul.mubr.bf16.vlgmr.msra.gmra.mxu0 %v6015_v46  ;;  %v717_v36 = vshrl.u32 %v569_v26, 16  ;;  %v6017_v42 = vcombine.low %v1500_v44, %v1503_v55  ;;  %v710_v46 = vor.u32 %v709_v52, %v706_v50  ;;  %v735_v26 = vrot.slane %v734_v16, 4  ;;  %v578_v44 = vld [vmem:[%s7416_s24 + $0x58] sm:$0xf]  ;;  %v579_v52 = vld [vmem:[%s7416_s24 + $0x5c] sm:$0x1] }
  0x4d   : > { %6930 = vmatpush3.bf16.msra.mxu1 %v7282_v62  ;;  %6853 = vmatprep.mubr.bf16.mxu1 %v5960_v27  ;;  %v744_v27 = vor.u32 %v743_v17, %v739_v10  ;;  %v1510_v33 = vsel %vm7503_vm5, %v1508_v23, %v1509_v24  ;;  %v755_v50 = vshll.u32 %v574_v20, 16  ;;  %v761_v55 = vshll.u32 %v575_v30, 16  ;;  %v1398_v12 = vld [vmem:[%s7416_s24 + $0x54] sm:$0xe]  ;;  %v1400_v23 = vld [vmem:[%s7416_s24 + $0x5c] sm:$0x1] }
  0x4e   : > { %6931 = vmatprep.subr.bf16.mxu1 %v7284_v29  ;;  %6978 = vmatpush3.bf16.msra.mxu0 %v7285_v13  ;;  %v719_v62 = vrot.slane %v717_v36, 4  ;;  %v711_v3 = vrot.slane %v710_v46, 4  ;;  %v1393_v13 = vld [vmem:[%s7416_s24 + $0x40] sm:$0xf]  ;;  %v740_v40 = vsel %vm7483_vm4, %v735_v26, %v739_v10  ;;  %v765_v36 = vshrl.u32 %v575_v30, 16 }
  0x4f   : > { %6901 = vmatprep.mubr.bf16.mxu0 %v6016_v43  ;;  %6979 = vmatprep.subr.bf16.mxu0 %v7287_v48  ;;  %v745_v41 = vrot.slane %v744_v27, 4  ;;  %v6018_v43 = vcombine.low %v1507_v22, %v1510_v33  ;;  %v776_v46 = vshrl.u32 %v577_v38, 16  ;;  %v763_v60 = vrot.slane %v761_v55, 5  ;;  %v7301_v55 = vld [vmem:[%s9175_s1 + $0x100] sm:$0xff]  }
  0x50   : > { %v720_v9 = vor.u32 %v719_v62, %v715_v58  ;;  %v716_v15 = vsel %vm7483_vm4, %v711_v3, %v715_v58  ;;  %v1395_v58 = vld [vmem:[%s7416_s24 + $0x48] sm:$0xe]  ;;  %v767_v61 = vrot.slane %v765_v36, 4  ;;  %v773_v62 = vrot.slane %v771_v56, 5 }
  0x51   : > { %6932 = vmatpush3.bf16.msra.mxu1 %v7284_v29  ;;  %v1513_v29 = vrot.slane %v1393_v13, 5  ;;  %v778_v2 = vrot.slane %v776_v46, 4  ;;  %v779_v3 = vshll.u32 %v577_v38, 16  ;;  %v785_v4 = vshll.u32 %v578_v44, 16  ;;  %v7294_v13 = vld [vmem:[%s9175_s1 + $0xc8] sm:$0xff]   ;;  %v7699_v46 = vld [vmem:[%s9175_s1 + $0x178] sm:$0xff]  }
  0x52   : > { %6933 = vmatprep.subr.bf16.mxu1 %v7286_v54  ;;  %6980 = vmatpush3.bf16.msra.mxu0 %v7287_v48  ;;  %v721_v21 = vrot.slane %v720_v9, 4  ;;  %v768_v8 = vor.u32 %v767_v61, %v763_v60  ;;  %v789_v9 = vshrl.u32 %v578_v44, 16  ;;  %v795_v10 = vshll.u32 %v579_v52, 16  ;;  %v583_v44 = vld [vmem:[%s7416_s24 + $0x6c] sm:$0xf] }
  0x53   : > { %6981 = vmatprep.subr.bf16.mxu0 %v7289_v32  ;;  %v1514_v47 = vsel %vm7503_vm5, %v5987_v28, %v1513_v29  ;;  %v1515_v48 = vrot.slane %v1513_v29, 4  ;;  %v5988_v11 = vrot.slane %v1395_v58, 9  ;;  %v787_v16 = vrot.slane %v785_v4, 5  ;;  %v7297_v28 = vld [vmem:[%s9175_s1 + $0x108] sm:$0xff]   ;;  %v1402_v4 = vld [vmem:[%s7416_s24 + $0x64] sm:$0xf] }
  0x54   : > { %6854 = vmatmul.mubr.bf16.gmra.mxu1 %v5961_v49  ;;  %6902 = vmatmul.mubr.bf16.gmra.mxu0 %v6017_v42  ;;  %v726_v31 = vsel %vm7483_vm4, %v721_v21, %v725_v63  ;;  %v754_v49 = vrot.slane %v752_v37, 4  ;;  %v757_v42 = vrot.slane %v755_v50, 5  ;;  %v1396_v63 = vld [vmem:[%s7416_s24 + $0x4c] sm:$0xf]  ;;  %v769_v19 = vrot.slane %v768_v8, 4  ;;  %v7296_v37 = vld [vmem:[%s9175_s1 + $0xc0] sm:$0xff]  }
  0x55   : > { %6934 = vmatpush3.bf16.msra.mxu1 %v7286_v54  ;;  %v5962_v39 = vcombine.low %v716_v15, %v726_v31  ;;  %v750_v54 = vsel %vm7483_vm4, %v745_v41, %v749_v18  ;;  %6905 = vmatprep.mubr.bf16.mxu0 %v6018_v43  ;;  %v781_v15 = vrot.slane %v779_v3, 5  ;;  %v1520_v17 = vrot.slane %v1396_v63, 5  ;;  %v1399_v18 = vld [vmem:[%s7416_s24 + $0x58] sm:$0xf]  ;;  %v582_v43 = vld [vmem:[%s7416_s24 + $0x68] sm:$0x1] }
  0x56   : > { %6935 = vmatprep.subr.bf16.mxu1 %v7288_v14  ;;  %6982 = vmatpush3.bf16.msra.mxu0 %v7289_v32  ;;  %v5963_v57 = vcombine.low %v740_v40, %v750_v54  ;;  %v1517_v32 = vsel %vm7503_vm5, %v1515_v48, %v1516_v34  ;;  %v758_v1 = vor.u32 %v757_v42, %v754_v49  ;;  %v791_v20 = vrot.slane %v789_v9, 4  ;;  %v580_v34 = vld [vmem:[%s7416_s24 + $0x60] sm:$0xf]  ;;  %v584_v42 = vld [vmem:[%s7416_s24 + $0x70] sm:$0xf] }
  0x57   : > { %6983 = vmatprep.subr.bf16.mxu0 %v7291_v25  ;;  %6857 = vmatprep.mubr.bf16.mxu1 %v5962_v39  ;;  %v6019_v59 = vcombine.low %v1514_v47, %v1517_v32  ;;  %v797_v21 = vrot.slane %v795_v10, 5  ;;  %v1523_v22 = vrot.slane %v1397_v5, 5  ;;  %v1521_v26 = vsel %vm7503_vm5, %v5988_v11, %v1520_v17  ;;  %v1401_v63 = vld [vmem:[%s7416_s24 + $0x60] sm:$0xe]  ;;  %v1403_v10 = vld [vmem:[%s7416_s24 + $0x68] sm:$0x1] }
  0x58   : > { %v1522_v27 = vrot.slane %v1520_v17, 4  ;;  %v774_v29 = vsel %vm7483_vm4, %v769_v19, %v773_v62  ;;  %v792_v30 = vor.u32 %v791_v20, %v787_v16  ;;  %v5989_v31 = vrot.slane %v1398_v12, 9  ;;  %v585_v62 = vld [vmem:[%s7416_s24 + $0x74] sm:$0x1]  ;;  %v7708_v11 = vld [vmem:[%s9175_s1 + $0x1b8] sm:$0xff]  }
  0x59   : > { %6936 = vmatpush3.bf16.msra.mxu1 %v7288_v14  ;;  %v759_v14 = vrot.slane %v758_v1, 4  ;;  %v1527_v33 = vrot.slane %v1399_v18, 5  ;;  %v1530_v41 = vrot.slane %v1400_v23, 5  ;;  %v800_v52 = vshrl.u32 %v580_v34, 16 }
  0x5a   : > { %6937 = vmatprep.subr.bf16.mxu1 %v7290_v45  ;;  %6984 = vmatpush3.bf16.msra.mxu0 %v7291_v25  ;;  %v782_v25 = vor.u32 %v781_v15, %v778_v2  ;;  %v1524_v40 = vsel %vm7503_vm5, %v1522_v27, %v1523_v22  ;;  %v809_v54 = vshll.u32 %v581_v35, 16  ;;  %v819_v32 = vshll.u32 %v582_v43, 16 }
  0x5b   : > { %6985 = vmatprep.subr.bf16.mxu0 %v7293_v53  ;;  %v764_v24 = vsel %vm7483_vm4, %v759_v14, %v763_v60  ;;  %v6020_v47 = vcombine.low %v1521_v26, %v1524_v40  ;;  %v1528_v48 = vsel %vm7503_vm5, %v5989_v31, %v1527_v33  ;;  %v1529_v49 = vrot.slane %v1527_v33, 4  ;;  %v1406_v26 = vld [vmem:[%s7416_s24 + $0x74] sm:$0x1]  ;;  %v586_v31 = vld [vmem:[%s7416_s24 + $0x78] sm:$0xf] }
  0x5c   : > { %6858 = vmatmul.mubr.bf16.gmra.mxu1 %v5963_v57  ;;  %6906 = vmatmul.mubr.bf16.gmra.mxu0 %v6019_v59  ;;  %v5964_v38 = vcombine.low %v764_v24, %v774_v29  ;;  %v783_v39 = vrot.slane %v782_v25, 4  ;;  %v813_v57 = vshrl.u32 %v581_v35, 16  ;;  %v802_v60 = vrot.slane %v800_v52, 4 }
  0x5d   : > { %6938 = vmatpush3.bf16.msra.mxu1 %v7290_v45  ;;  %v793_v45 = vrot.slane %v792_v30, 4  ;;  %6909 = vmatprep.mubr.bf16.mxu0 %v6020_v47  ;;  %v1531_v56 = vsel %vm7503_vm5, %v1529_v49, %v1530_v41  ;;  %v821_v2 = vrot.slane %v819_v32, 5  ;;  %v824_v3 = vshrl.u32 %v583_v44, 16 }
  0x5e   : > { %6939 = vmatprep.subr.bf16.mxu1 %v7292_v0  ;;  %6986 = vmatpush3.bf16.msra.mxu0 %v7293_v53  ;;  %v788_v50 = vsel %vm7483_vm4, %v783_v39, %v787_v16  ;;  %v803_v53 = vshll.u32 %v580_v34, 16  ;;  %v6021_v59 = vcombine.low %v1528_v48, %v1531_v56  ;;  %v815_v1 = vrot.slane %v813_v57, 4  ;;  %v1404_v16 = vld [vmem:[%s7416_s24 + $0x6c] sm:$0xe]  ;;  %v588_v39 = vld [vmem:[%s7416_s24 + $0x80] sm:$0x1] }
  0x5f   : > { %6987 = vmatprep.subr.bf16.mxu0 %v7295_v7  ;;  %6861 = vmatprep.mubr.bf16.mxu1 %v5964_v38  ;;  %v798_v36 = vsel %vm7483_vm4, %v793_v45, %v797_v21  ;;  %v833_v8 = vshll.u32 %v584_v42, 16  ;;  %v837_v9 = vshrl.u32 %v584_v42, 16  ;;  %v843_v14 = vshll.u32 %v585_v62, 16  ;;  %v1405_v21 = vld [vmem:[%s7416_s24 + $0x70] sm:$0xf] }
  0x60   : > { %v5965_v58 = vcombine.low %v788_v50, %v798_v36  ;;  %v805_v61 = vrot.slane %v803_v53, 5  ;;  %v5990_v15 = vrot.slane %v1401_v63, 9  ;;  %v1534_v24 = vrot.slane %v1402_v4, 5  ;;  %v587_v38 = vld [vmem:[%s7416_s24 + $0x7c] sm:$0xf] }
  0x61   : > { %6940 = vmatpush3.bf16.msra.mxu1 %v7292_v0  ;;  %v811_v0 = vrot.slane %v809_v54, 5  ;;  %v835_v19 = vrot.slane %v833_v8, 5  ;;  %v839_v20 = vrot.slane %v837_v9, 4  ;;  %v845_v23 = vrot.slane %v843_v14, 5  ;;  %v589_v45 = vld [vmem:[%s7416_s24 + $0x84] sm:$0xf] }
  0x62   : > { %6941 = vmatprep.subr.bf16.mxu1 %v7294_v13  ;;  %6988 = vmatpush3.bf16.msra.mxu0 %v7295_v7  ;;  %v806_v5 = vor.u32 %v805_v61, %v802_v60  ;;  %v827_v7 = vshll.u32 %v583_v44, 16  ;;  %v1537_v25 = vrot.slane %v1403_v10, 5  ;;  %v5991_v30 = vrot.slane %v1404_v16, 9  ;;  %v590_v36 = vld [vmem:[%s7416_s24 + $0x88] sm:$0xf] }
  0x63   : > { %6989 = vmatprep.subr.bf16.mxu0 %v7297_v28  ;;  %v816_v12 = vor.u32 %v815_v1, %v811_v0  ;;  %v840_v29 = vor.u32 %v839_v20, %v835_v19  ;;  %v1535_v34 = vsel %vm7503_vm5, %v5990_v15, %v1534_v24  ;;  %v1536_v35 = vrot.slane %v1534_v24, 4 }
  0x64   : > { %6862 = vmatmul.mubr.bf16.gmra.mxu1 %v5965_v58  ;;  %6910 = vmatmul.mubr.bf16.gmra.mxu0 %v6021_v59  ;;  %v807_v17 = vrot.slane %v806_v5, 4  ;;  %v829_v18 = vrot.slane %v827_v7, 5  ;;  %v1544_v44 = vrot.slane %v1406_v26, 5  ;;  %v848_v50 = vshrl.u32 %v586_v31, 16  ;;  %v591_v58 = vld [vmem:[%s7416_s24 + $0x8c] sm:$0x1] }
  0x65   : > { %6942 = vmatpush3.bf16.msra.mxu1 %v7294_v13  ;;  %v826_v13 = vrot.slane %v824_v3, 4  ;;  %v817_v22 = vrot.slane %v816_v12, 4  ;;  %v841_v43 = vrot.slane %v840_v29, 4  ;;  %v1538_v47 = vsel %vm7503_vm5, %v1536_v35, %v1537_v25  ;;  %v1407_v59 = vld [vmem:[%s7416_s24 + $0x78] sm:$0xe] }
  0x66   : > { %6943 = vmatprep.subr.bf16.mxu1 %v7296_v37  ;;  %6990 = vmatpush3.bf16.msra.mxu0 %v7297_v28  ;;  %v812_v27 = vsel %vm7483_vm4, %v807_v17, %v811_v0  ;;  %v6022_v54 = vcombine.low %v1535_v34, %v1538_v47  ;;  %v850_v32 = vrot.slane %v848_v50, 4  ;;  %v857_v42 = vshll.u32 %v587_v38, 16  ;;  %v1408_v0 = vld [vmem:[%s7416_s24 + $0x7c] sm:$0xf]  ;;  %v1409_v5 = vld [vmem:[%s7416_s24 + $0x80] sm:$0x1] }
  0x67   : > { %6991 = vmatprep.subr.bf16.mxu0 %v7301_v55  ;;  %v830_v28 = vor.u32 %v829_v18, %v826_v13  ;;  %v822_v33 = vsel %vm7483_vm4, %v817_v22, %v821_v2  ;;  %v846_v53 = vsel %vm7483_vm4, %v841_v43, %v845_v23  ;;  %v861_v62 = vshrl.u32 %v587_v38, 16  ;;  %v1410_v12 = vld [vmem:[%s7416_s24 + $0x84] sm:$0xe]  ;;  %v1411_v17 = vld [vmem:[%s7416_s24 + $0x88] sm:$0xf] }
  0x68   : > { %v5966_v40 = vcombine.low %v812_v27, %v822_v33  ;;  %6913 = vmatprep.mubr.bf16.mxu0 %v6022_v54  ;;  %v867_v63 = vshll.u32 %v588_v39, 16  ;;  %v859_v1 = vrot.slane %v857_v42, 5  ;;  %v872_v2 = vshrl.u32 %v589_v45, 16  ;;  %v1412_v22 = vld [vmem:[%s7416_s24 + $0x8c] sm:$0x1] }
  0x69   : > { %6944 = vmatpush3.bf16.msra.mxu1 %v7296_v37  ;;  %v1541_v37 = vrot.slane %v1405_v21, 5  ;;  %v831_v41 = vrot.slane %v830_v28, 4  ;;  %v875_v3 = vshll.u32 %v589_v45, 16  ;;  %v881_v4 = vshll.u32 %v590_v36, 16  ;;  %v592_v27 = vld [vmem:[%s7416_s24 + $0x90] sm:$0xf] }
  0x6a   : > { %7025 = vmatprep.subr.bf16.mxu1 %v7699_v46  ;;  %6992 = vmatpush3.bf16.msra.mxu0 %v7301_v55  ;;  %v851_v55 = vshll.u32 %v586_v31, 16  ;;  %v863_v8 = vrot.slane %v861_v62, 4  ;;  %v869_v9 = vrot.slane %v867_v63, 5  ;;  %v885_v10 = vshrl.u32 %v590_v36, 16  ;;  %v593_v33 = vld [vmem:[%s7416_s24 + $0x94] sm:$0xf] }
  0x6b   : > { %7073 = vmatprep.subr.bf16.mxu0 %v7708_v11  ;;  %v1542_v48 = vsel %vm7503_vm5, %v5991_v30, %v1541_v37  ;;  %v1543_v49 = vrot.slane %v1541_v37, 4  ;;  %6865 = vmatprep.mubr.bf16.mxu1 %v5966_v40  ;;  %v836_v52 = vsel %vm7483_vm4, %v831_v41, %v835_v19  ;;  %v874_v13 = vrot.slane %v872_v2, 4  ;;  %v594_v39 = vld [vmem:[%s7416_s24 + $0x98] sm:$0x1]  ;;  %v595_v40 = vld [vmem:[%s7416_s24 + $0x9c] sm:$0xf] }
  0x6c   : > { %v5967_v56 = vcombine.low %v836_v52, %v846_v53  ;;  %v853_v61 = vrot.slane %v851_v55, 5  ;;  %v877_v14 = vrot.slane %v875_v3, 5  ;;  %v883_v15 = vrot.slane %v881_v4, 5  ;;  %v596_v36 = vld [vmem:[%s7416_s24 + $0xa0] sm:$0xf] }
  0x6d   : > { %v1545_v57 = vsel %vm7503_vm5, %v1543_v49, %v1544_v44  ;;  %v891_v16 = vshll.u32 %v591_v58, 16  ;;  %v864_v19 = vor.u32 %v863_v8, %v859_v1  ;;  %v887_v20 = vrot.slane %v885_v10, 4  ;;  %v597_v58 = vld [vmem:[%s7416_s24 + $0xa4] sm:$0x1]  ;;  %v1413_v63 = vld [vmem:[%s7416_s24 + $0x90] sm:$0xe] }
  0x6e   : > { %v6023_v60 = vcombine.low %v1542_v48, %v1545_v57  ;;  %6866 = vmatmul.mubr.bf16.gmra.mxu1 %v5967_v56  ;;  %v854_v7 = vor.u32 %v853_v61, %v850_v32  ;;  %v5992_v21 = vrot.slane %v1407_v59, 9  ;;  %v878_v23 = vor.u32 %v877_v14, %v874_v13  ;;  %v1414_v4 = vld [vmem:[%s7416_s24 + $0x94] sm:$0xf]  ;;  %v1415_v10 = vld [vmem:[%s7416_s24 + $0x98] sm:$0x1] }
  0x6f   : > { %v893_v24 = vrot.slane %v891_v16, 5  ;;  %v1548_v25 = vrot.slane %v1408_v0, 5  ;;  %v1551_v26 = vrot.slane %v1409_v5, 5  ;;  %v865_v29 = vrot.slane %v864_v19, 4  ;;  %v1416_v16 = vld [vmem:[%s7416_s24 + $0x9c] sm:$0xe] }
  0x70   : > { %6914 = vmatmul.mubr.bf16.gmra.mxu0 %v6023_v60  ;;  %v855_v18 = vrot.slane %v854_v7, 4  ;;  %v888_v30 = vor.u32 %v887_v20, %v883_v15  ;;  %v5993_v31 = vrot.slane %v1410_v12, 9  ;;  %v879_v34 = vrot.slane %v878_v23, 4 }
  0x71   : > { %v1549_v35 = vsel %vm7503_vm5, %v5992_v21, %v1548_v25  ;;  %v1550_v37 = vrot.slane %v1548_v25, 4  ;;  %v1555_v38 = vrot.slane %v1411_v17, 5  ;;  %v870_v41 = vsel %vm7483_vm4, %v865_v29, %v869_v9  ;;  %v1417_v17 = vld [vmem:[%s7416_s24 + $0xa0] sm:$0xf] }
  0x72   : > { %v860_v28 = vsel %vm7483_vm4, %v855_v18, %v859_v1  ;;  %v889_v43 = vrot.slane %v888_v30, 4  ;;  %v1558_v44 = vrot.slane %v1412_v22, 5  ;;  %v896_v45 = vshrl.u32 %v592_v27, 16  ;;  %v1418_v22 = vld [vmem:[%s7416_s24 + $0xa4] sm:$0x1] }
  0x73   : > { %v5968_v47 = vcombine.low %v860_v28, %v870_v41  ;;  %v884_v48 = vsel %vm7483_vm4, %v879_v34, %v883_v15  ;;  %v1552_v49 = vsel %vm7503_vm5, %v1550_v37, %v1551_v26  ;;  %v1556_v50 = vsel %vm7503_vm5, %v5993_v31, %v1555_v38 }
  0x74   : > { %v894_v52 = vsel %vm7483_vm4, %v889_v43, %v893_v24  ;;  %v6024_v53 = vcombine.low %v1549_v35, %v1552_v49  ;;  %v1557_v54 = vrot.slane %v1555_v38, 4  ;;  %v898_v55 = vrot.slane %v896_v45, 4  ;;  %v601_v45 = vld [vmem:[%s7416_s24 + $0xb4] sm:$0xf] }
  0x75   : > { %6869 = vmatprep.mubr.bf16.mxu1 %v5968_v47  ;;  %v5969_v56 = vcombine.low %v884_v48, %v894_v52  ;;  %v899_v57 = vshll.u32 %v592_v27, 16  ;;  %v905_v32 = vshll.u32 %v593_v33, 16  ;;  %v909_v42 = vshrl.u32 %v593_v33, 16  ;;  %v598_v27 = vld [vmem:[%s7416_s24 + $0xa8] sm:$0xf] }
  0x76   : > { %6917 = vmatprep.mubr.bf16.mxu0 %v6024_v53  ;;  %v1559_v59 = vsel %vm7503_vm5, %v1557_v54, %v1558_v44  ;;  %v915_v60 = vshll.u32 %v594_v39, 16  ;;  %v920_v61 = vshrl.u32 %v595_v40, 16  ;;  %v923_v62 = vshll.u32 %v595_v40, 16  ;;  %v599_v33 = vld [vmem:[%s7416_s24 + $0xac] sm:$0xf] }
  0x77   : > { %6870 = vmatmul.mubr.bf16.gmra.mxu1 %v5969_v56  ;;  %v6025_v0 = vcombine.low %v1556_v50, %v1559_v59  ;;  %v901_v1 = vrot.slane %v899_v57, 5  ;;  %v907_v2 = vrot.slane %v905_v32, 5  ;;  %v911_v3 = vrot.slane %v909_v42, 4  ;;  %v600_v39 = vld [vmem:[%s7416_s24 + $0xb0] sm:$0x1] }
  0x78   : > { %v917_v5 = vrot.slane %v915_v60, 5  ;;  %v922_v7 = vrot.slane %v920_v61, 4  ;;  %v925_v8 = vrot.slane %v923_v62, 5  ;;  %v929_v9 = vshll.u32 %v596_v36, 16  ;;  %v602_v52 = vld [vmem:[%s7416_s24 + $0xb8] sm:$0xf] }
  0x79   : > { %6918 = vmatmul.mubr.bf16.gmra.mxu0 %v6025_v0  ;;  %v902_v12 = vor.u32 %v901_v1, %v898_v55  ;;  %v912_v13 = vor.u32 %v911_v3, %v907_v2  ;;  %v933_v14 = vshrl.u32 %v596_v36, 16  ;;  %v939_v15 = vshll.u32 %v597_v58, 16  ;;  %v603_v56 = vld [vmem:[%s7416_s24 + $0xbc] sm:$0x1]  ;;  %v1419_v59 = vld [vmem:[%s7416_s24 + $0xa8] sm:$0xe] }
  0x7a   : > { %v926_v18 = vor.u32 %v925_v8, %v922_v7  ;;  %v931_v19 = vrot.slane %v929_v9, 5  ;;  %v5994_v20 = vrot.slane %v1413_v63, 9  ;;  %v1562_v21 = vrot.slane %v1414_v4, 5  ;;  %v1420_v0 = vld [vmem:[%s7416_s24 + $0xac] sm:$0xf] }
  0x7b   : > { %v903_v23 = vrot.slane %v902_v12, 4  ;;  %v913_v24 = vrot.slane %v912_v13, 4  ;;  %v935_v25 = vrot.slane %v933_v14, 4  ;;  %v941_v26 = vrot.slane %v939_v15, 5  ;;  %v1421_v1 = vld [vmem:[%s7416_s24 + $0xb0] sm:$0x1] }
  0x7c   : > { %v927_v28 = vrot.slane %v926_v18, 4  ;;  %v1563_v29 = vsel %vm7503_vm5, %v5994_v20, %v1562_v21  ;;  %v1564_v30 = vrot.slane %v1562_v21, 4  ;;  %v1565_v31 = vrot.slane %v1415_v10, 5  ;;  %v1422_v7 = vld [vmem:[%s7416_s24 + $0xb4] sm:$0xe] }
  0x7d   : > { %v908_v34 = vsel %vm7483_vm4, %v903_v23, %v907_v2  ;;  %v918_v35 = vsel %vm7483_vm4, %v913_v24, %v917_v5  ;;  %v936_v37 = vor.u32 %v935_v25, %v931_v19  ;;  %v5995_v38 = vrot.slane %v1416_v16, 9  ;;  %v1423_v13 = vld [vmem:[%s7416_s24 + $0xb8] sm:$0xf]  ;;  %v1424_v18 = vld [vmem:[%s7416_s24 + $0xbc] sm:$0x1] }
  0x7e   : > { %v5970_v40 = vcombine.low %v908_v34, %v918_v35  ;;  %v932_v41 = vsel %vm7483_vm4, %v927_v28, %v931_v19  ;;  %v1566_v43 = vsel %vm7503_vm5, %v1564_v30, %v1565_v31  ;;  %v1569_v44 = vrot.slane %v1417_v17, 5 }
  0x7f   : > { %v937_v47 = vrot.slane %v936_v37, 4  ;;  %v6026_v48 = vcombine.low %v1563_v29, %v1566_v43  ;;  %v1572_v49 = vrot.slane %v1418_v22, 5  ;;  %v944_v50 = vshrl.u32 %v598_v27, 16 }
  0x80   : > { %6873 = vmatprep.mubr.bf16.mxu1 %v5970_v40  ;;  %v1570_v53 = vsel %vm7503_vm5, %v5995_v38, %v1569_v44  ;;  %v1571_v54 = vrot.slane %v1569_v44, 4  ;;  %v947_v55 = vshll.u32 %v598_v27, 16  ;;  %v953_v36 = vshll.u32 %v599_v33, 16 }
  0x81   : > { %v942_v57 = vsel %vm7483_vm4, %v937_v47, %v941_v26  ;;  %6921 = vmatprep.mubr.bf16.mxu0 %v6026_v48  ;;  %v946_v32 = vrot.slane %v944_v50, 4  ;;  %v957_v42 = vshrl.u32 %v599_v33, 16  ;;  %v963_v58 = vshll.u32 %v600_v39, 16  ;;  %v6111_v47 = vld [vmem:[%s7416_s24 + $0x10] sm:$0xf] }
  0x82   : > { %v5971_v60 = vcombine.low %v932_v41, %v942_v57  ;;  %v1573_v61 = vsel %vm7503_vm5, %v1571_v54, %v1572_v49  ;;  %v949_v62 = vrot.slane %v947_v55, 5  ;;  %v955_v63 = vrot.slane %v953_v36, 5  ;;  %v6113_v55 = vld [vmem:[%s7416_s24 + $0x18] sm:$0xf] }
  0x83   : > { %v6027_v2 = vcombine.low %v1570_v53, %v1573_v61  ;;  %v959_v3 = vrot.slane %v957_v42, 4  ;;  %v965_v4 = vrot.slane %v963_v58, 5  ;;  %v968_v5 = vshrl.u32 %v601_v45, 16  ;;  %v6112_v53 = vld [vmem:[%s7416_s24 + $0x14] sm:$0x1] }
  0x84   : > { %6874 = vmatmul.mubr.bf16.gmra.mxu1 %v5971_v60  ;;  %v950_v8 = vor.u32 %v949_v62, %v946_v32  ;;  %v971_v9 = vshll.u32 %v601_v45, 16  ;;  %v977_v10 = vshll.u32 %v602_v52, 16  ;;  %v981_v12 = vshrl.u32 %v602_v52, 16  ;;  %v6110_v45 = vld [vmem:[%s7416_s24 + $0xc] sm:$0xf] }
  0x85   : > { %6922 = vmatmul.mubr.bf16.gmra.mxu0 %v6027_v2  ;;  %v960_v14 = vor.u32 %v959_v3, %v955_v63  ;;  %v970_v15 = vrot.slane %v968_v5, 4  ;;  %v987_v16 = vshll.u32 %v603_v56, 16  ;;  %v5996_v17 = vrot.slane %v1419_v59, 9  ;;  %v7298_v52 = vld [vmem:[%s7416_s24 + $0xc] sm:$0xff]   ;;  %v6114_v42 = vld [vmem:[%s7416_s24 + $0x1c] sm:$0xf] }
  0x86   : > { %v951_v19 = vrot.slane %v950_v8, 4  ;;  %v973_v20 = vrot.slane %v971_v9, 5  ;;  %v979_v21 = vrot.slane %v977_v10, 5  ;;  %v983_v22 = vrot.slane %v981_v12, 4  ;;  %v6115_v58 = vld [vmem:[%s7416_s24 + $0x20] sm:$0x1] }
  0x87   : > { %v961_v23 = vrot.slane %v960_v14, 4  ;;  %v989_v24 = vrot.slane %v987_v16, 5  ;;  %v1576_v25 = vrot.slane %v1420_v0, 5  ;;  %v1579_v26 = vrot.slane %v1421_v1, 5  ;;  %v7299_v8 = vld [vmem:[%s7416_s24 + $0x18] sm:$0xff]  }
  0x88   : > { %v956_v27 = vsel %vm7483_vm4, %v951_v19, %v955_v63  ;;  %v974_v28 = vor.u32 %v973_v20, %v970_v15  ;;  %v984_v29 = vor.u32 %v983_v22, %v979_v21  ;;  %v5997_v30 = vrot.slane %v1422_v7, 9  ;;  %v7302_v19 = vld [vmem:[%s7416_s24 + $0x24] sm:$0xff]  }
  0x89   : > { %v966_v31 = vsel %vm7483_vm4, %v961_v23, %v965_v4  ;;  %v1577_v33 = vsel %vm7503_vm5, %v5996_v17, %v1576_v25  ;;  %v1578_v34 = vrot.slane %v1576_v25, 4  ;;  %v1583_v35 = vrot.slane %v1423_v13, 5  ;;  %v6116_v23 = vld [vmem:[%s7416_s24 + $0x24] sm:$0xf] }
  0x8a   : > { %v5972_v37 = vcombine.low %v956_v27, %v966_v31  ;;  %v975_v38 = vrot.slane %v974_v28, 4  ;;  %v985_v39 = vrot.slane %v984_v29, 4  ;;  %v1586_v40 = vrot.slane %v1424_v18, 5  ;;  %v7304_v27 = vld [vmem:[%s9175_s1 + $0x170] sm:$0xff]   ;;  %v6118_v28 = vld [vmem:[%s7416_s24 + $0x2c] sm:$0x1] }
  0x8b   : > { %v1580_v41 = vsel %vm7503_vm5, %v1578_v34, %v1579_v26  ;;  %v1584_v43 = vsel %vm7503_vm5, %v5997_v30, %v1583_v35  ;;  %v1585_v44 = vrot.slane %v1583_v35, 4  ;;  %v2474_v54 = vshrl.u32 %v6110_v45, 16 }
  0x8c   : > { %6877 = vmatprep.mubr.bf16.mxu1 %v5972_v37  ;;  %v980_v48 = vsel %vm7483_vm4, %v975_v38, %v979_v21  ;;  %v990_v49 = vsel %vm7483_vm4, %v985_v39, %v989_v24  ;;  %v6028_v50 = vcombine.low %v1577_v33, %v1580_v41  ;;  %v2477_v57 = vshll.u32 %v6110_v45, 16  ;;  %v6117_v24 = vld [vmem:[%s7416_s24 + $0x28] sm:$0xf]  ;;  %v6119_v37 = vld [vmem:[%s7416_s24 + $0x30] sm:$0xf] }
  0x8d   : > { %v5973_v36 = vcombine.low %v980_v48, %v990_v49  ;;  %v1587_v56 = vsel %vm7503_vm5, %v1585_v44, %v1586_v40  ;;  %v2483_v32 = vshll.u32 %v6111_v47, 16  ;;  %v2476_v60 = vrot.slane %v2474_v54, 4  ;;  %v6121_v44 = vld [vmem:[%s7416_s24 + $0x38] sm:$0x1]  ;;  %v7308_v45 = vld [vmem:[%s9175_s1 + $0x168] sm:$0xff]   ;;  %v7303_v54 = vld [vmem:[%s7416_s24 + $0x30] sm:$0xff]  }
  0x8e   : > { %6925 = vmatprep.mubr.bf16.mxu0 %v6028_v50  ;;  %v6029_v59 = vcombine.low %v1584_v43, %v1587_v56  ;;  %v2487_v61 = vshrl.u32 %v6111_v47, 16  ;;  %v2493_v62 = vshll.u32 %v6112_v53, 16  ;;  %v2479_v63 = vrot.slane %v2477_v57, 5  ;;  %v6120_v43 = vld [vmem:[%s7416_s24 + $0x34] sm:$0xf] }
  0x8f   : > { %6878 = vmatmul.mubr.bf16.gmra.mxu1 %v5973_v36  ;;  %v2485_v0 = vrot.slane %v2483_v32, 5  ;;  %v2498_v1 = vshrl.u32 %v6113_v55, 16  ;;  %v2501_v2 = vshll.u32 %v6113_v55, 16  ;;  %v2507_v5 = vshll.u32 %v6114_v42, 16 }
  0x90   : > { %6926 = vmatmul.mubr.bf16.gmra.mxu0 %v6029_v59  ;;  %6945 = vmatprep.mubr.bf16.mxu1 %v7298_v52  ;;  %v2489_v3 = vrot.slane %v2487_v61, 4  ;;  %v2495_v4 = vrot.slane %v2493_v62, 5  ;;  %v2511_v7 = vshrl.u32 %v6114_v42, 16  ;;  %v2480_v9 = vor.u32 %v2479_v63, %v2476_v60  ;;  %v7309_v52 = vld [vmem:[%s9175_s1 + $0x1b0] sm:$0xff]  }
  0x91   : > { %v2500_v10 = vrot.slane %v2498_v1, 4  ;;  %v2503_v12 = vrot.slane %v2501_v2, 5  ;;  %v2517_v13 = vshll.u32 %v6115_v58, 16  ;;  %v2509_v15 = vrot.slane %v2507_v5, 5  ;;  %v7306_v58 = vld [vmem:[%s7416_s24 + $0x3c] sm:$0xff]  }
  0x92   : > { %v2490_v14 = vor.u32 %v2489_v3, %v2485_v0  ;;  %v2513_v16 = vrot.slane %v2511_v7, 4  ;;  %v2481_v17 = vrot.slane %v2480_v9, 4  ;;  %v2522_v29 = vshrl.u32 %v6116_v23, 16  ;;  %v7312_v2 = vld [vmem:[%s9175_s1 + $0x160] sm:$0xff]   ;;  %v7313_v7 = vld [vmem:[%s9175_s1 + $0x1a8] sm:$0xff]  }
  0x93   : > { %v2504_v18 = vor.u32 %v2503_v12, %v2500_v10  ;;  %v2519_v22 = vrot.slane %v2517_v13, 5  ;;  %v2525_v30 = vshll.u32 %v6116_v23, 16  ;;  %v2531_v34 = vshll.u32 %v6117_v24, 16  ;;  %v6122_v9 = vld [vmem:[%s7416_s24 + $0x3c] sm:$0xf] }
  0x94   : > { %v2491_v20 = vrot.slane %v2490_v14, 4  ;;  %v2514_v21 = vor.u32 %v2513_v16, %v2509_v15  ;;  %v2486_v25 = vsel %vm7483_vm4, %v2481_v17, %v2485_v0  ;;  %v2535_v35 = vshrl.u32 %v6117_v24, 16  ;;  %v6123_v10 = vld [vmem:[%s7416_s24 + $0x40] sm:$0xf]  ;;  %v6124_v12 = vld [vmem:[%s7416_s24 + $0x44] sm:$0x1] }
  0x95   : > { %v2505_v26 = vrot.slane %v2504_v18, 4  ;;  %v2524_v40 = vrot.slane %v2522_v29, 4  ;;  %v2527_v41 = vrot.slane %v2525_v30, 5  ;;  %v2533_v48 = vrot.slane %v2531_v34, 5  ;;  %v6125_v17 = vld [vmem:[%s7416_s24 + $0x48] sm:$0xf] }
  0x96   : > { %v2496_v31 = vsel %vm7483_vm4, %v2491_v20, %v2495_v4  ;;  %v2515_v33 = vrot.slane %v2514_v21, 4  ;;  %v2537_v49 = vrot.slane %v2535_v35, 4  ;;  %v2541_v50 = vshll.u32 %v6118_v28, 16  ;;  %v7307_v24 = vld [vmem:[%s7416_s24 + $0x48] sm:$0xff]   ;;  %v7316_v29 = vld [vmem:[%s9175_s1 + $0x158] sm:$0xff]  }
  0x97   : > { %6946 = vmatmul.mubr.bf16.vlgmr.msra.gmra.mxu1 %v7299_v8  ;;  %v6174_v38 = vcombine.low %v2486_v25, %v2496_v31  ;;  %v2510_v39 = vsel %vm7483_vm4, %v2505_v26, %v2509_v15  ;;  %v2528_v55 = vor.u32 %v2527_v41, %v2524_v40  ;;  %v2546_v36 = vshrl.u32 %v6119_v37, 16  ;;  %v7310_v35 = vld [vmem:[%s7416_s24 + $0x54] sm:$0xff]  }
  0x98   : > { %7026 = vmatpush3.bf16.msra.mxu1 %v7699_v46  ;;  %v2520_v47 = vsel %vm7483_vm4, %v2515_v33, %v2519_v22  ;;  %6949 = vmatprep.mubr.bf16.mxu1 %v7302_v19  ;;  %v2549_v56 = vshll.u32 %v6119_v37, 16  ;;  %v2538_v46 = vor.u32 %v2537_v49, %v2533_v48  ;;  %v2543_v57 = vrot.slane %v2541_v50, 5  ;;  %v6126_v22 = vld [vmem:[%s7416_s24 + $0x4c] sm:$0xf]  ;;  %v7317_v37 = vld [vmem:[%s9175_s1 + $0x1a0] sm:$0xff]  }
  0x99   : > { %6993 = vmatprep.mubr.bf16.mxu0 %v6174_v38  ;;  %v6175_v53 = vcombine.low %v2510_v39, %v2520_v47  ;;  %7027 = vmatprep.subr.bf16.mxu1 %v7304_v27  ;;  %v2555_v32 = vshll.u32 %v6120_v43, 16  ;;  %v2559_v42 = vshrl.u32 %v6120_v43, 16  ;;  %v2529_v59 = vrot.slane %v2528_v55, 4 }
  0x9a   : > { %v2548_v60 = vrot.slane %v2546_v36, 4  ;;  %v2551_v61 = vrot.slane %v2549_v56, 5  ;;  %v2565_v62 = vshll.u32 %v6121_v44, 16  ;;  %v2539_v63 = vrot.slane %v2538_v46, 4 }
  0x9b   : > { %6994 = vmatmul.mubr.bf16.vlgmr.msra.gmra.mxu0 %v6175_v53  ;;  %v2557_v0 = vrot.slane %v2555_v32, 5  ;;  %v2561_v1 = vrot.slane %v2559_v42, 4  ;;  %v2534_v3 = vsel %vm7483_vm4, %v2529_v59, %v2533_v48  ;;  %v2570_v15 = vshrl.u32 %v6122_v9, 16  ;;  %v7320_v48 = vld [vmem:[%s9175_s1 + $0x150] sm:$0xff]   ;;  %v6129_v32 = vld [vmem:[%s7416_s24 + $0x58] sm:$0xf] }
  0x9c   : > { %7028 = vmatpush3.bf16.msra.mxu1 %v7304_v27  ;;  %7074 = vmatpush3.bf16.msra.mxu0 %v7708_v11  ;;  %v2552_v4 = vor.u32 %v2551_v61, %v2548_v60  ;;  %v2567_v5 = vrot.slane %v2565_v62, 5  ;;  %v2544_v11 = vsel %vm7483_vm4, %v2539_v63, %v2543_v57  ;;  %v2573_v16 = vshll.u32 %v6122_v9, 16  ;;  %v6127_v27 = vld [vmem:[%s7416_s24 + $0x50] sm:$0x1]  ;;  %v6128_v57 = vld [vmem:[%s7416_s24 + $0x54] sm:$0xf] }
  0x9d   : > { %7029 = vmatprep.subr.bf16.mxu1 %v7308_v45  ;;  %7075 = vmatprep.subr.bf16.mxu0 %v7309_v52  ;;  %v2562_v8 = vor.u32 %v2561_v1, %v2557_v0  ;;  %v6176_v13 = vcombine.low %v2534_v3, %v2544_v11  ;;  %v2579_v19 = vshll.u32 %v6123_v10, 16  ;;  %v2583_v20 = vshrl.u32 %v6123_v10, 16  ;;  %v6130_v59 = vld [vmem:[%s7416_s24 + $0x5c] sm:$0x1]  ;;  %v6131_v62 = vld [vmem:[%s7416_s24 + $0x60] sm:$0xf] }
  0x9e   : > { %v2553_v14 = vrot.slane %v2552_v4, 4  ;;  %v2589_v21 = vshll.u32 %v6124_v12, 16  ;;  %v2572_v25 = vrot.slane %v2570_v15, 4  ;;  %v2575_v26 = vrot.slane %v2573_v16, 5  ;;  %v7311_v1 = vld [vmem:[%s7416_s24 + $0x60] sm:$0xff]   ;;  %v7314_v12 = vld [vmem:[%s7416_s24 + $0x6c] sm:$0xff]  }
  0x9f   : > { %6950 = vmatmul.mubr.bf16.gmra.mxu1 %v7303_v54  ;;  %v2563_v18 = vrot.slane %v2562_v8, 4  ;;  %6997 = vmatprep.mubr.bf16.mxu0 %v6176_v13  ;;  %v2594_v28 = vshrl.u32 %v6125_v17, 16  ;;  %v2581_v31 = vrot.slane %v2579_v19, 5  ;;  %v2585_v33 = vrot.slane %v2583_v20, 4  ;;  %v6132_v4 = vld [vmem:[%s7416_s24 + $0x64] sm:$0xf] }
  0xa0   : > { %6953 = vmatprep.mubr.bf16.mxu1 %v7306_v58  ;;  %7030 = vmatpush3.bf16.msra.mxu1 %v7308_v45  ;;  %v2558_v23 = vsel %vm7483_vm4, %v2553_v14, %v2557_v0  ;;  %v2591_v34 = vrot.slane %v2589_v21, 5  ;;  %v2576_v39 = vor.u32 %v2575_v26, %v2572_v25  ;;  %v2597_v41 = vshll.u32 %v6125_v17, 16  ;;  %v6133_v10 = vld [vmem:[%s7416_s24 + $0x68] sm:$0x1]  ;;  %v7325_v17 = vld [vmem:[%s9175_s1 + $0x190] sm:$0xff]  }
  0xa1   : > { %7076 = vmatpush3.bf16.msra.mxu0 %v7309_v52  ;;  %v2568_v30 = vsel %vm7483_vm4, %v2563_v18, %v2567_v5  ;;  %7031 = vmatprep.subr.bf16.mxu1 %v7312_v2  ;;  %v2596_v40 = vrot.slane %v2594_v28, 4  ;;  %v2586_v43 = vor.u32 %v2585_v33, %v2581_v31  ;;  %v2603_v44 = vshll.u32 %v6126_v22, 16  ;;  %v7321_v52 = vld [vmem:[%s9175_s1 + $0x198] sm:$0xff]   ;;  %v7324_v5 = vld [vmem:[%s9175_s1 + $0x148] sm:$0xff]   ;;  %v7328_v18 = vld [vmem:[%s9175_s1 + $0x140] sm:$0xff]  }
  0xa2   : > { %7077 = vmatprep.subr.bf16.mxu0 %v7313_v7  ;;  %v6177_v38 = vcombine.low %v2558_v23, %v2568_v30  ;;  %v2607_v45 = vshrl.u32 %v6126_v22, 16  ;;  %v2613_v47 = vshll.u32 %v6127_v27, 16  ;;  %v2577_v49 = vrot.slane %v2576_v39, 4  ;;  %v7329_v27 = vld [vmem:[%s9175_s1 + $0x188] sm:$0xff]  }
  0xa3   : > { %v2599_v50 = vrot.slane %v2597_v41, 5  ;;  %v2587_v53 = vrot.slane %v2586_v43, 4  ;;  %v2605_v54 = vrot.slane %v2603_v44, 5  ;;  %v2618_v60 = vshrl.u32 %v6128_v57, 16  ;;  %v6134_v41 = vld [vmem:[%s7416_s24 + $0x6c] sm:$0xf] }
  0xa4   : > { %7032 = vmatpush3.bf16.msra.mxu1 %v7312_v2  ;;  %6998 = vmatmul.mubr.bf16.gmra.mxu0 %v6177_v38  ;;  %v2609_v55 = vrot.slane %v2607_v45, 4  ;;  %v2615_v36 = vrot.slane %v2613_v47, 5  ;;  %v2582_v56 = vsel %vm7483_vm4, %v2577_v49, %v2581_v31  ;;  %v2621_v61 = vshll.u32 %v6128_v57, 16  ;;  %v6135_v43 = vld [vmem:[%s7416_s24 + $0x70] sm:$0xf]  ;;  %v7315_v45 = vld [vmem:[%s7416_s24 + $0x78] sm:$0xff]  }
  0xa5   : > { %7033 = vmatprep.subr.bf16.mxu1 %v7316_v29  ;;  %7078 = vmatpush3.bf16.msra.mxu0 %v7313_v7  ;;  %v2600_v46 = vor.u32 %v2599_v50, %v2596_v40  ;;  %v2592_v42 = vsel %vm7483_vm4, %v2587_v53, %v2591_v34  ;;  %v2627_v2 = vshll.u32 %v6129_v32, 16  ;;  %v2631_v3 = vshrl.u32 %v6129_v32, 16  ;;  %v6136_v47 = vld [vmem:[%s7416_s24 + $0x74] sm:$0x1] }
  0xa6   : > { %7079 = vmatprep.subr.bf16.mxu0 %v7317_v37  ;;  %v2610_v58 = vor.u32 %v2609_v55, %v2605_v54  ;;  %v6178_v63 = vcombine.low %v2582_v56, %v2592_v42  ;;  %v2620_v11 = vrot.slane %v2618_v60, 4  ;;  %v2623_v8 = vrot.slane %v2621_v61, 5  ;;  %v6137_v56 = vld [vmem:[%s7416_s24 + $0x78] sm:$0xf] }
  0xa7   : > { %6954 = vmatmul.mubr.bf16.gmra.mxu1 %v7307_v24  ;;  %v2601_v0 = vrot.slane %v2600_v46, 4  ;;  %v2637_v9 = vshll.u32 %v6130_v59, 16  ;;  %v2629_v14 = vrot.slane %v2627_v2, 5  ;;  %v2633_v15 = vrot.slane %v2631_v3, 4  ;;  %v6138_v46 = vld [vmem:[%s7416_s24 + $0x7c] sm:$0xf] }
  0xa8   : > { %6957 = vmatprep.mubr.bf16.mxu1 %v7310_v35  ;;  %7034 = vmatpush3.bf16.msra.mxu1 %v7316_v29  ;;  %v2611_v7 = vrot.slane %v2610_v58, 4  ;;  %v2642_v16 = vshrl.u32 %v6131_v62, 16  ;;  %v2624_v20 = vor.u32 %v2623_v8, %v2620_v11  ;;  %v2645_v22 = vshll.u32 %v6131_v62, 16  ;;  %v7916_v35 = vld [vmem:[%s9175_s1 + $0x1f8] sm:$0xff]   ;;  %v6139_v59 = vld [vmem:[%s7416_s24 + $0x80] sm:$0x1] }
  0xa9   : > { %7035 = vmatprep.subr.bf16.mxu1 %v7320_v48  ;;  %7080 = vmatpush3.bf16.msra.mxu0 %v7317_v37  ;;  %v2606_v13 = vsel %vm7483_vm4, %v2601_v0, %v2605_v54  ;;  %v2639_v21 = vrot.slane %v2637_v9, 5  ;;  %v2634_v24 = vor.u32 %v2633_v15, %v2629_v14  ;;  %v2651_v26 = vshll.u32 %v6132_v4, 16  ;;  %v7318_v0 = vld [vmem:[%s7416_s24 + $0x84] sm:$0xff]  }
  0xaa   : > { %7001 = vmatprep.mubr.bf16.mxu0 %v6178_v63  ;;  %7081 = vmatprep.subr.bf16.mxu0 %v7321_v52  ;;  %v2616_v19 = vsel %vm7483_vm4, %v2611_v7, %v2615_v36  ;;  %v2644_v25 = vrot.slane %v2642_v16, 4  ;;  %v2625_v28 = vrot.slane %v2624_v20, 4  ;;  %v2647_v29 = vrot.slane %v2645_v22, 5  ;;  %v7319_v20 = vld [vmem:[%s7416_s24 + $0x90] sm:$0xff]  }
  0xab   : > { %v6179_v23 = vcombine.low %v2606_v13, %v2616_v19  ;;  %v2655_v30 = vshrl.u32 %v6132_v4, 16  ;;  %v2661_v31 = vshll.u32 %v6133_v10, 16  ;;  %v2635_v33 = vrot.slane %v2634_v24, 4 }
  0xac   : > { %7036 = vmatpush3.bf16.msra.mxu1 %v7320_v48  ;;  %v2653_v34 = vrot.slane %v2651_v26, 5  ;;  %v2630_v37 = vsel %vm7483_vm4, %v2625_v28, %v2629_v14  ;;  %v2648_v38 = vor.u32 %v2647_v29, %v2644_v25  ;;  %v2666_v48 = vshrl.u32 %v6134_v41, 16  ;;  %v7941_v14 = vld [vmem:[%s9175_s1 + $0x238] sm:$0xff]   ;;  %v6141_v25 = vld [vmem:[%s7416_s24 + $0x88] sm:$0xf] }
  0xad   : > { %7037 = vmatprep.subr.bf16.mxu1 %v7324_v5  ;;  %7082 = vmatpush3.bf16.msra.mxu0 %v7321_v52  ;;  %v2657_v39 = vrot.slane %v2655_v30, 4  ;;  %v2663_v40 = vrot.slane %v2661_v31, 5  ;;  %v2640_v44 = vsel %vm7483_vm4, %v2635_v33, %v2639_v21  ;;  %v2669_v49 = vshll.u32 %v6134_v41, 16  ;;  %v7331_v52 = vld [vmem:[%s9175_s1 + $0x180] sm:$0xff]   ;;  %v6142_v26 = vld [vmem:[%s7416_s24 + $0x8c] sm:$0x1] }
  0xae   : > { %7002 = vmatmul.mubr.bf16.gmra.mxu0 %v6179_v23  ;;  %v2675_v50 = vshll.u32 %v6135_v43, 16  ;;  %7083 = vmatprep.subr.bf16.mxu0 %v7325_v17  ;;  %v6180_v53 = vcombine.low %v2630_v37, %v2640_v44  ;;  %v2649_v54 = vrot.slane %v2648_v38, 4  ;;  %v2679_v36 = vshrl.u32 %v6135_v43, 16  ;;  %v6140_v21 = vld [vmem:[%s7416_s24 + $0x84] sm:$0xf] }
  0xaf   : > { %6958 = vmatmul.mubr.bf16.gmra.mxu1 %v7311_v1  ;;  %v2658_v55 = vor.u32 %v2657_v39, %v2653_v34  ;;  %v2668_v57 = vrot.slane %v2666_v48, 4  ;;  %v2671_v32 = vrot.slane %v2669_v49, 5  ;;  %v2685_v58 = vshll.u32 %v6136_v47, 16  ;;  %v6143_v33 = vld [vmem:[%s7416_s24 + $0x90] sm:$0xf] }
  0xb0   : > { %6961 = vmatprep.mubr.bf16.mxu1 %v7314_v12  ;;  %7038 = vmatpush3.bf16.msra.mxu1 %v7324_v5  ;;  %v2677_v42 = vrot.slane %v2675_v50, 5  ;;  %v2654_v60 = vsel %vm7483_vm4, %v2649_v54, %v2653_v34  ;;  %v2681_v62 = vrot.slane %v2679_v36, 4  ;;  %v2690_v63 = vshrl.u32 %v6137_v56, 16  ;;  %v7322_v34 = vld [vmem:[%s7416_s24 + $0x9c] sm:$0xff]   ;;  %v6144_v41 = vld [vmem:[%s7416_s24 + $0x94] sm:$0xf] }
  0xb1   : > { %7039 = vmatprep.subr.bf16.mxu1 %v7328_v18  ;;  %7084 = vmatpush3.bf16.msra.mxu0 %v7325_v17  ;;  %v2659_v61 = vrot.slane %v2658_v55, 4  ;;  %v2672_v1 = vor.u32 %v2671_v32, %v2668_v57  ;;  %v2687_v2 = vrot.slane %v2685_v58, 5  ;;  %v2693_v3 = vshll.u32 %v6137_v56, 16  ;;  %v6145_v47 = vld [vmem:[%s7416_s24 + $0x98] sm:$0x1] }
  0xb2   : > { %7085 = vmatprep.subr.bf16.mxu0 %v7329_v27  ;;  %7005 = vmatprep.mubr.bf16.mxu0 %v6180_v53  ;;  %v2699_v4 = vshll.u32 %v6138_v46, 16  ;;  %v2682_v7 = vor.u32 %v2681_v62, %v2677_v42  ;;  %v2692_v11 = vrot.slane %v2690_v63, 4  ;;  %v2703_v8 = vshrl.u32 %v6138_v46, 16 }
  0xb3   : > { %v2664_v5 = vsel %vm7483_vm4, %v2659_v61, %v2663_v40  ;;  %v2673_v10 = vrot.slane %v2672_v1, 4  ;;  %v2695_v12 = vrot.slane %v2693_v3, 5  ;;  %v2709_v17 = vshll.u32 %v6139_v59, 16  ;;  %v7326_v1 = vld [vmem:[%s7416_s24 + $0xb4] sm:$0xff]   ;;  %v6146_v3 = vld [vmem:[%s7416_s24 + $0x9c] sm:$0xf] }
  0xb4   : > { %7040 = vmatpush3.bf16.msra.mxu1 %v7328_v18  ;;  %v6181_v9 = vcombine.low %v2654_v60, %v2664_v5  ;;  %v2701_v13 = vrot.slane %v2699_v4, 5  ;;  %v2683_v15 = vrot.slane %v2682_v7, 4  ;;  %v2705_v16 = vrot.slane %v2703_v8, 4  ;;  %v7323_v60 = vld [vmem:[%s7416_s24 + $0xa8] sm:$0xff]   ;;  %v6147_v4 = vld [vmem:[%s7416_s24 + $0xa0] sm:$0xf] }
  0xb5   : > { %7121 = vmatprep.subr.bf16.mxu1 %v7916_v35  ;;  %7086 = vmatpush3.bf16.msra.mxu0 %v7329_v27  ;;  %v2678_v18 = vsel %vm7483_vm4, %v2673_v10, %v2677_v42  ;;  %v2696_v19 = vor.u32 %v2695_v12, %v2692_v11  ;;  %v2711_v24 = vrot.slane %v2709_v17, 5  ;;  %v2714_v27 = vshrl.u32 %v6140_v21, 16  ;;  %v6148_v8 = vld [vmem:[%s7416_s24 + $0xa4] sm:$0x1]  ;;  %v6149_v10 = vld [vmem:[%s7416_s24 + $0xa8] sm:$0xf] }
  0xb6   : > { %7087 = vmatprep.subr.bf16.mxu0 %v7331_v52  ;;  %7006 = vmatmul.mubr.bf16.gmra.mxu0 %v6181_v9  ;;  %v2688_v22 = vsel %vm7483_vm4, %v2683_v15, %v2687_v2  ;;  %v2706_v23 = vor.u32 %v2705_v16, %v2701_v13  ;;  %v2717_v30 = vshll.u32 %v6140_v21, 16  ;;  %v2723_v31 = vshll.u32 %v6141_v25, 16  ;;  %v6150_v17 = vld [vmem:[%s7416_s24 + $0xac] sm:$0xf] }
  0xb7   : > { %6962 = vmatmul.mubr.bf16.gmra.mxu1 %v7315_v45  ;;  %v6182_v28 = vcombine.low %v2678_v18, %v2688_v22  ;;  %v2697_v29 = vrot.slane %v2696_v19, 4  ;;  %v2716_v38 = vrot.slane %v2714_v27, 4  ;;  %v2727_v39 = vshrl.u32 %v6141_v25, 16  ;;  %v6151_v22 = vld [vmem:[%s7416_s24 + $0xb0] sm:$0x1] }
  0xb8   : > { %6965 = vmatprep.mubr.bf16.mxu1 %v7318_v0  ;;  %v2707_v37 = vrot.slane %v2706_v23, 4  ;;  %v2733_v40 = vshll.u32 %v6142_v26, 16  ;;  %v2719_v44 = vrot.slane %v2717_v30, 5  ;;  %v2725_v45 = vrot.slane %v2723_v31, 5 }
  0xb9   : > { %7088 = vmatpush3.bf16.msra.mxu0 %v7331_v52  ;;  %7009 = vmatprep.mubr.bf16.mxu0 %v6182_v28  ;;  %v2702_v43 = vsel %vm7483_vm4, %v2697_v29, %v2701_v13  ;;  %v2738_v48 = vshrl.u32 %v6143_v33, 16  ;;  %v2729_v50 = vrot.slane %v2727_v39, 4  ;;  %v2741_v53 = vshll.u32 %v6143_v33, 16 }
  0xba   : > { %7169 = vmatprep.subr.bf16.mxu0 %v7941_v14  ;;  %v2712_v49 = vsel %vm7483_vm4, %v2707_v37, %v2711_v24  ;;  %v2735_v52 = vrot.slane %v2733_v40, 5  ;;  %v2720_v55 = vor.u32 %v2719_v44, %v2716_v38  ;;  %v2747_v56 = vshll.u32 %v6144_v41, 16  ;;  %v7327_v38 = vld [vmem:[%s7416_s24 + $0xc0] sm:$0xff]  }
  0xbb   : > { %v6183_v54 = vcombine.low %v2702_v43, %v2712_v49  ;;  %v2740_v36 = vrot.slane %v2738_v48, 4  ;;  %v2730_v46 = vor.u32 %v2729_v50, %v2725_v45  ;;  %v2743_v57 = vrot.slane %v2741_v53, 5  ;;  %v6152_v50 = vld [vmem:[%s7416_s24 + $0xb4] sm:$0xf] }
  0xbc   : > { %v2751_v32 = vshrl.u32 %v6144_v41, 16  ;;  %v2757_v42 = vshll.u32 %v6145_v47, 16  ;;  %v2721_v58 = vrot.slane %v2720_v55, 4  ;;  %v2749_v59 = vrot.slane %v2747_v56, 5  ;;  %v6154_v55 = vld [vmem:[%s7416_s24 + $0xbc] sm:$0x1] }
  0xbd   : > { %v2731_v61 = vrot.slane %v2730_v46, 4  ;;  %v2744_v62 = vor.u32 %v2743_v57, %v2740_v36  ;;  %v2762_v9 = vshrl.u32 %v6146_v3, 16  ;;  %v2765_v13 = vshll.u32 %v6146_v3, 16 }
  0xbe   : > { %7010 = vmatmul.mubr.bf16.gmra.mxu0 %v6183_v54  ;;  %v2753_v63 = vrot.slane %v2751_v32, 4  ;;  %v2759_v0 = vrot.slane %v2757_v42, 5  ;;  %v2726_v2 = vsel %vm7483_vm4, %v2721_v58, %v2725_v45  ;;  %v2771_v15 = vshll.u32 %v6147_v4, 16  ;;  %v6153_v54 = vld [vmem:[%s7416_s24 + $0xb8] sm:$0xf] }
  0xbf   : > { %6966 = vmatmul.mubr.bf16.gmra.mxu1 %v7319_v20  ;;  %v2736_v5 = vsel %vm7483_vm4, %v2731_v61, %v2735_v52  ;;  %v2745_v7 = vrot.slane %v2744_v62, 4  ;;  %v2775_v16 = vshrl.u32 %v6147_v4, 16  ;;  %v2764_v20 = vrot.slane %v2762_v9, 4  ;;  %v6155_v58 = vld [vmem:[%s7416_s24 + $0xc0] sm:$0xf] }
  0xc0   : > { %6969 = vmatprep.mubr.bf16.mxu1 %v7322_v34  ;;  %v2754_v11 = vor.u32 %v2753_v63, %v2749_v59  ;;  %v6184_v12 = vcombine.low %v2726_v2, %v2736_v5  ;;  %v2781_v21 = vshll.u32 %v6148_v8, 16  ;;  %v2767_v23 = vrot.slane %v2765_v13, 5  ;;  %v6198_v5 = vld [vmem:[%s7416_s24 + $0xc] sm:$0xe] }
  0xc1   : > { %v2750_v18 = vsel %vm7483_vm4, %v2745_v7, %v2749_v59  ;;  %v2773_v24 = vrot.slane %v2771_v15, 5  ;;  %v2777_v25 = vrot.slane %v2775_v16, 4  ;;  %v2786_v26 = vshrl.u32 %v6149_v10, 16  ;;  %v6156_v59 = vld [vmem:[%s7416_s24 + $0xc4] sm:$0xf] }
  0xc2   : > { %v2755_v19 = vrot.slane %v2754_v11, 4  ;;  %7013 = vmatprep.mubr.bf16.mxu0 %v6184_v12  ;;  %v2783_v28 = vrot.slane %v2781_v21, 5  ;;  %v2789_v29 = vshll.u32 %v6149_v10, 16  ;;  %v2795_v30 = vshll.u32 %v6150_v17, 16  ;;  %v6199_v10 = vld [vmem:[%s7416_s24 + $0x10] sm:$0xf] }
  0xc3   : > { %v2768_v33 = vor.u32 %v2767_v23, %v2764_v20  ;;  %v2778_v34 = vor.u32 %v2777_v25, %v2773_v24  ;;  %v2788_v37 = vrot.slane %v2786_v26, 4  ;;  %v2799_v41 = vshrl.u32 %v6150_v17, 16  ;;  %v6200_v17 = vld [vmem:[%s7416_s24 + $0x14] sm:$0x1]  ;;  %v6202_v23 = vld [vmem:[%s7416_s24 + $0x1c] sm:$0xf] }
  0xc4   : > { %v2760_v27 = vsel %vm7483_vm4, %v2755_v19, %v2759_v0  ;;  %v2791_v39 = vrot.slane %v2789_v29, 5  ;;  %v2797_v40 = vrot.slane %v2795_v30, 5  ;;  %v2805_v43 = vshll.u32 %v6151_v22, 16  ;;  %v6157_v0 = vld [vmem:[%s7416_s24 + $0xc8] sm:$0x1] }
  0xc5   : > { %v6185_v31 = vcombine.low %v2750_v18, %v2760_v27  ;;  %v2769_v44 = vrot.slane %v2768_v33, 4  ;;  %v2779_v45 = vrot.slane %v2778_v34, 4  ;;  %v2801_v48 = vrot.slane %v2799_v41, 4  ;;  %v6201_v22 = vld [vmem:[%s7416_s24 + $0x18] sm:$0xe] }
  0xc6   : > { %v2792_v47 = vor.u32 %v2791_v39, %v2788_v37  ;;  %v2807_v49 = vrot.slane %v2805_v43, 5  ;;  %v2810_v36 = vshrl.u32 %v6152_v50, 16  ;;  %v2813_v56 = vshll.u32 %v6152_v50, 16 }
  0xc7   : > { %6970 = vmatmul.mubr.bf16.gmra.mxu1 %v7323_v60  ;;  %7014 = vmatmul.mubr.bf16.gmra.mxu0 %v6185_v31  ;;  %v2774_v52 = vsel %vm7483_vm4, %v2769_v44, %v2773_v24  ;;  %v2784_v53 = vsel %vm7483_vm4, %v2779_v45, %v2783_v28  ;;  %v2802_v32 = vor.u32 %v2801_v48, %v2797_v40  ;;  %v2819_v42 = vshll.u32 %v6153_v54, 16  ;;  %v6203_v28 = vld [vmem:[%s7416_s24 + $0x20] sm:$0x1] }
  0xc8   : > { %6973 = vmatprep.mubr.bf16.mxu1 %v7326_v1  ;;  %v6186_v46 = vcombine.low %v2774_v52, %v2784_v53  ;;  %v2793_v57 = vrot.slane %v2792_v47, 4  ;;  %v2812_v60 = vrot.slane %v2810_v36, 4  ;;  %v2815_v61 = vrot.slane %v2813_v56, 5  ;;  %v6204_v53 = vld [vmem:[%s7416_s24 + $0x24] sm:$0xe] }
  0xc9   : > { %v2823_v62 = vshrl.u32 %v6153_v54, 16  ;;  %v2829_v63 = vshll.u32 %v6154_v55, 16  ;;  %v2803_v2 = vrot.slane %v2802_v32, 4  ;;  %v2821_v3 = vrot.slane %v2819_v42, 5  ;;  %v6206_v32 = vld [vmem:[%s7416_s24 + $0x2c] sm:$0x1] }
  0xca   : > { %7017 = vmatprep.mubr.bf16.mxu0 %v6186_v46  ;;  %v2798_v1 = vsel %vm7483_vm4, %v2793_v57, %v2797_v40  ;;  %v2834_v4 = vshrl.u32 %v6155_v58, 16  ;;  %v2816_v7 = vor.u32 %v2815_v61, %v2812_v60  ;;  %v2837_v9 = vshll.u32 %v6155_v58, 16  ;;  %v7332_v46 = vld [vmem:[%s7416_s24 + $0x18] sm:$0xff]   ;;  %v6205_v57 = vld [vmem:[%s7416_s24 + $0x28] sm:$0xf] }
  0xcb   : > { %v2825_v11 = vrot.slane %v2823_v62, 4  ;;  %v2831_v8 = vrot.slane %v2829_v63, 5  ;;  %v2808_v12 = vsel %vm7483_vm4, %v2803_v2, %v2807_v49  ;;  %v2843_v15 = vshll.u32 %v6156_v59, 16  ;;  %v6207_v61 = vld [vmem:[%s7416_s24 + $0x30] sm:$0xe] }
  0xcc   : > { %v2836_v13 = vrot.slane %v2834_v4, 4  ;;  %v2847_v16 = vshrl.u32 %v6156_v59, 16  ;;  %v6187_v18 = vcombine.low %v2798_v1, %v2808_v12  ;;  %v2817_v19 = vrot.slane %v2816_v7, 4  ;;  %v6208_v63 = vld [vmem:[%s7416_s24 + $0x34] sm:$0xf]  ;;  %v7338_v12 = vld [vmem:[%s9175_s1 + $0x1e8] sm:$0xff]  }
  0xcd   : > { %v2826_v20 = vor.u32 %v2825_v11, %v2821_v3  ;;  %v2839_v21 = vrot.slane %v2837_v9, 5  ;;  %v2845_v24 = vrot.slane %v2843_v15, 5  ;;  %v2853_v26 = vshll.u32 %v6157_v0, 16  ;;  %v6209_v0 = vld [vmem:[%s7416_s24 + $0x38] sm:$0x1]  ;;  %v7334_v2 = vld [vmem:[%s9175_s1 + $0x1f0] sm:$0xff]  }
  0xce   : > { %v2849_v25 = vrot.slane %v2847_v16, 4  ;;  %v6246_v27 = vrot.slane %v6198_v5, 9  ;;  %v2822_v29 = vsel %vm7483_vm4, %v2817_v19, %v2821_v3  ;;  %v3341_v33 = vrot.slane %v6199_v10, 5  ;;  %v7336_v16 = vld [vmem:[%s7416_s24 + $0x30] sm:$0xff]   ;;  %v6211_v19 = vld [vmem:[%s7416_s24 + $0x40] sm:$0xf] }
  0xcf   : > { %6974 = vmatmul.mubr.bf16.gmra.mxu1 %v7327_v38  ;;  %7018 = vmatmul.mubr.bf16.gmra.mxu0 %v6187_v18  ;;  %v2827_v30 = vrot.slane %v2826_v20, 4  ;;  %v2840_v31 = vor.u32 %v2839_v21, %v2836_v13  ;;  %v2855_v37 = vrot.slane %v2853_v26, 5  ;;  %v3344_v38 = vrot.slane %v6200_v17, 5  ;;  %v6210_v17 = vld [vmem:[%s7416_s24 + $0x3c] sm:$0xe] }
  0xd0   : > { %v2850_v34 = vor.u32 %v2849_v25, %v2845_v24  ;;  %v6247_v39 = vrot.slane %v6201_v22, 9  ;;  %v3342_v43 = vsel %vm7503_vm5, %v6246_v27, %v3341_v33  ;;  %v3343_v44 = vrot.slane %v3341_v33, 4  ;;  %v6212_v20 = vld [vmem:[%s7416_s24 + $0x44] sm:$0x1]  ;;  %v7339_v22 = vld [vmem:[%s9175_s1 + $0x230] sm:$0xff]  }
  0xd1   : > { %v2832_v40 = vsel %vm7483_vm4, %v2827_v30, %v2831_v8  ;;  %v2841_v41 = vrot.slane %v2840_v31, 4  ;;  %v3348_v48 = vrot.slane %v6202_v23, 5  ;;  %v3351_v49 = vrot.slane %v6203_v28, 5  ;;  %v7333_v8 = vld [vmem:[%s7416_s24 + $0x24] sm:$0xff]   ;;  %v6214_v25 = vld [vmem:[%s7416_s24 + $0x4c] sm:$0xf] }
  0xd2   : > { %v6188_v45 = vcombine.low %v2822_v29, %v2832_v40  ;;  %v2851_v47 = vrot.slane %v2850_v34, 4  ;;  %v3345_v52 = vsel %vm7503_vm5, %v3343_v44, %v3344_v38  ;;  %v6248_v58 = vrot.slane %v6204_v53, 9  ;;  %v6215_v27 = vld [vmem:[%s7416_s24 + $0x50] sm:$0x1]  ;;  %v7342_v30 = vld [vmem:[%s9175_s1 + $0x1e0] sm:$0xff]   ;;  %v7343_v38 = vld [vmem:[%s9175_s1 + $0x228] sm:$0xff]  }
  0xd3   : > { %v2846_v50 = vsel %vm7483_vm4, %v2841_v41, %v2845_v24  ;;  %v6278_v55 = vcombine.low %v3342_v43, %v3345_v52  ;;  %v3349_v36 = vsel %vm7503_vm5, %v6247_v39, %v3348_v48  ;;  %v3350_v56 = vrot.slane %v3348_v48, 4  ;;  %v6213_v24 = vld [vmem:[%s7416_s24 + $0x48] sm:$0xe]  ;;  %v7337_v43 = vld [vmem:[%s7416_s24 + $0x3c] sm:$0xff]   ;;  %v6217_v48 = vld [vmem:[%s7416_s24 + $0x58] sm:$0xf] }
  0xd4   : > { %7021 = vmatprep.mubr.bf16.mxu0 %v6188_v45  ;;  %v2856_v54 = vsel %vm7483_vm4, %v2851_v47, %v2855_v37  ;;  %v3355_v59 = vrot.slane %v6205_v57, 5  ;;  %v3358_v60 = vrot.slane %v6206_v32, 5  ;;  %v6249_v1 = vrot.slane %v6207_v61, 9  ;;  %v6216_v47 = vld [vmem:[%s7416_s24 + $0x54] sm:$0xe]  ;;  %v7340_v53 = vld [vmem:[%s7416_s24 + $0x48] sm:$0xff]  }
  0xd5   : > { %v6189_v42 = vcombine.low %v2846_v50, %v2856_v54  ;;  %7041 = vmatprep.mubr.bf16.mxu1 %v6278_v55  ;;  %v3352_v62 = vsel %vm7503_vm5, %v3350_v56, %v3351_v49  ;;  %v3362_v7 = vrot.slane %v6208_v63, 5  ;;  %v3365_v11 = vrot.slane %v6209_v0, 5  ;;  %v6219_v56 = vld [vmem:[%s7416_s24 + $0x60] sm:$0xe]  ;;  %v6221_v57 = vld [vmem:[%s7416_s24 + $0x68] sm:$0x1] }
  0xd6   : > { %v6279_v3 = vcombine.low %v3349_v36, %v3352_v62  ;;  %v3356_v4 = vsel %vm7503_vm5, %v6248_v58, %v3355_v59  ;;  %v3357_v5 = vrot.slane %v3355_v59, 4  ;;  %v6250_v21 = vrot.slane %v6210_v17, 9  ;;  %v7346_v32 = vld [vmem:[%s9175_s1 + $0x1d8] sm:$0xff]   ;;  %v7347_v63 = vld [vmem:[%s9175_s1 + $0x220] sm:$0xff]  }
  0xd7   : > { %7022 = vmatmul.mubr.bf16.gmra.mxu0 %v6189_v42  ;;  %v3364_v10 = vrot.slane %v3362_v7, 4  ;;  %v3363_v15 = vsel %vm7503_vm5, %v6249_v1, %v3362_v7  ;;  %v3372_v23 = vrot.slane %v6212_v20, 5  ;;  %v6251_v28 = vrot.slane %v6213_v24, 9  ;;  %v7341_v17 = vld [vmem:[%s7416_s24 + $0x54] sm:$0xff]  }
  0xd8   : > { %7089 = vmatprep.mubr.bf16.mxu0 %v7332_v46  ;;  %7042 = vmatmul.mubr.bf16.vlgmr.msra.gmra.mxu1 %v6279_v3  ;;  %v3359_v9 = vsel %vm7503_vm5, %v3357_v5, %v3358_v60  ;;  %v3376_v29 = vrot.slane %v6214_v25, 5  ;;  %v3379_v34 = vrot.slane %v6215_v27, 5  ;;  %v6252_v54 = vrot.slane %v6216_v47, 9  ;;  %v6220_v46 = vld [vmem:[%s7416_s24 + $0x64] sm:$0xf] }
  0xd9   : > { %7122 = vmatpush3.bf16.msra.mxu1 %v7916_v35  ;;  %v6280_v13 = vcombine.low %v3356_v4, %v3359_v9  ;;  %v3366_v18 = vsel %vm7503_vm5, %v3364_v10, %v3365_v11  ;;  %v3369_v35 = vrot.slane %v6211_v19, 5  ;;  %v3383_v55 = vrot.slane %v6217_v48, 5  ;;  %v6225_v20 = vld [vmem:[%s7416_s24 + $0x78] sm:$0xe]  ;;  %v7344_v25 = vld [vmem:[%s7416_s24 + $0x60] sm:$0xff]  }
  0xda   : > { %7123 = vmatprep.subr.bf16.mxu1 %v7334_v2  ;;  %v6281_v26 = vcombine.low %v3363_v15, %v3366_v18  ;;  %v3378_v37 = vrot.slane %v3376_v29, 4  ;;  %v3377_v45 = vsel %vm7503_vm5, %v6251_v28, %v3376_v29  ;;  %v6253_v61 = vrot.slane %v6219_v56, 9  ;;  %v7354_v28 = vld [vmem:[%s9175_s1 + $0x1c8] sm:$0xff]   ;;  %v6228_v48 = vld [vmem:[%s7416_s24 + $0x84] sm:$0xe] }
  0xdb   : > { %7045 = vmatprep.mubr.bf16.mxu1 %v6280_v13  ;;  %v3370_v31 = vsel %vm7503_vm5, %v6250_v21, %v3369_v35  ;;  %v3371_v33 = vrot.slane %v3369_v35, 4  ;;  %v3384_v59 = vsel %vm7503_vm5, %v6252_v54, %v3383_v55  ;;  %v3385_v60 = vrot.slane %v3383_v55, 4  ;;  %v6224_v13 = vld [vmem:[%s7416_s24 + $0x74] sm:$0x1]  ;;  %v6226_v21 = vld [vmem:[%s7416_s24 + $0x7c] sm:$0xf] }
  0xdc   : > { %v3380_v52 = vsel %vm7503_vm5, %v3378_v37, %v3379_v34  ;;  %v3390_v62 = vrot.slane %v6220_v46, 5  ;;  %v3393_v7 = vrot.slane %v6221_v57, 5  ;;  %v3400_v19 = vrot.slane %v6224_v13, 5  ;;  %v7355_v37 = vld [vmem:[%s9175_s1 + $0x210] sm:$0xff]   ;;  %v7358_v56 = vld [vmem:[%s9175_s1 + $0x1c0] sm:$0xff]  }
  0xdd   : > { %7124 = vmatpush3.bf16.msra.mxu1 %v7334_v2  ;;  %v3373_v41 = vsel %vm7503_vm5, %v3371_v33, %v3372_v23  ;;  %v6283_v0 = vcombine.low %v3377_v45, %v3380_v52  ;;  %v7350_v2 = vld [vmem:[%s9175_s1 + $0x1d0] sm:$0xff]   ;;  %v3404_v27 = vrot.slane %v6226_v21, 5  ;;  %v6256_v52 = vrot.slane %v6228_v48, 9  ;;  %v6234_v13 = vld [vmem:[%s7416_s24 + $0x9c] sm:$0xe] }
  0xde   : > { %7125 = vmatprep.subr.bf16.mxu1 %v7338_v12  ;;  %v6282_v44 = vcombine.low %v3370_v31, %v3373_v41  ;;  %v3392_v5 = vrot.slane %v3390_v62, 4  ;;  %v3391_v23 = vsel %vm7503_vm5, %v6253_v61, %v3390_v62  ;;  %v6255_v31 = vrot.slane %v6225_v20, 9  ;;  %v6231_v46 = vld [vmem:[%s7416_s24 + $0x90] sm:$0xe]  ;;  %v6232_v57 = vld [vmem:[%s7416_s24 + $0x94] sm:$0xf] }
  0xdf   : > { %7090 = vmatmul.mubr.bf16.vlgmr.msra.gmra.mxu0 %v7333_v8  ;;  %v6222_v8 = vld [vmem:[%s7416_s24 + $0x6c] sm:$0xe] }
  0xe0   : > { %7170 = vmatpush3.bf16.msra.mxu0 %v7941_v14  ;;  %7093 = vmatprep.mubr.bf16.mxu0 %v7336_v16  ;;  %v6218_v14 = vld [vmem:[%s7416_s24 + $0x5c] sm:$0x1]  ;;  %v6254_v15 = vrot.slane %v6222_v8, 9  ;;  %v3394_v24 = vsel %vm7503_vm5, %v3392_v5, %v3393_v7  ;;  %v6257_v7 = vrot.slane %v6231_v46, 9  ;;  %v7352_v46 = vld [vmem:[%s7416_s24 + $0x90] sm:$0xff]  }
  0xe1   : > { %7046 = vmatmul.mubr.bf16.gmra.mxu1 %v6281_v26  ;;  %7171 = vmatprep.subr.bf16.mxu0 %v7339_v22  ;;  %v3386_v36 = vrot.slane %v6218_v14, 5  ;;  %v7351_v16 = vld [vmem:[%s9175_s1 + $0x218] sm:$0xff]   ;;  %v6227_v26 = vld [vmem:[%s7416_s24 + $0x80] sm:$0x1]  ;;  %v6285_v41 = vcombine.low %v3391_v23, %v3394_v24  ;;  %v6229_v14 = vld [vmem:[%s7416_s24 + $0x88] sm:$0xf] }
  0xe2   : > { %7126 = vmatpush3.bf16.msra.mxu1 %v7338_v12  ;;  %7049 = vmatprep.mubr.bf16.mxu1 %v6282_v44  ;;  %v6223_v12 = vld [vmem:[%s7416_s24 + $0x70] sm:$0xf] }
  0xe3   : > { %7127 = vmatprep.subr.bf16.mxu1 %v7342_v30  ;;  %v3387_v4 = vsel %vm7503_vm5, %v3385_v60, %v3386_v36  ;;  %v3397_v18 = vrot.slane %v6223_v12, 5  ;;  %v3418_v60 = vrot.slane %v6232_v57, 5  ;;  %v7362_v12 = vld [vmem:[%s9175_s1 + $0x200] sm:$0xff]  }
  0xe4   : > { %7172 = vmatpush3.bf16.msra.mxu0 %v7339_v22  ;;  %v6284_v11 = vcombine.low %v3384_v59, %v3387_v4 }
  0xe5   : > { %7173 = vmatprep.subr.bf16.mxu0 %v7343_v38  ;;  %v3398_v29 = vsel %vm7503_vm5, %v6254_v15, %v3397_v18 }
  0xe6   : > { %7128 = vmatpush3.bf16.msra.mxu1 %v7342_v30  ;;  %v3399_v30 = vrot.slane %v3397_v18, 4  ;;  %v6236_v18 = vld [vmem:[%s7416_s24 + $0xa4] sm:$0x1] }
  0xe7   : > { %7094 = vmatmul.mubr.bf16.gmra.mxu0 %v7337_v43  ;;  %7129 = vmatprep.subr.bf16.mxu1 %v7346_v32  ;;  %v3428_v24 = vrot.slane %v6236_v18, 5 }
  0xe8   : > { %7097 = vmatprep.mubr.bf16.mxu0 %v7340_v53  ;;  %7174 = vmatpush3.bf16.msra.mxu0 %v7343_v38  ;;  %v3406_v38 = vrot.slane %v3404_v27, 4  ;;  %v3401_v43 = vsel %vm7503_vm5, %v3399_v30, %v3400_v19  ;;  %v3411_v53 = vrot.slane %v6229_v14, 5  ;;  %v6258_v19 = vrot.slane %v6234_v13, 9 }
  0xe9   : > { %7050 = vmatmul.mubr.bf16.gmra.mxu1 %v6283_v0  ;;  %7175 = vmatprep.subr.bf16.mxu0 %v7347_v63  ;;  %v6286_v47 = vcombine.low %v3398_v29, %v3401_v43  ;;  %v3405_v0 = vsel %vm7503_vm5, %v6255_v31, %v3404_v27  ;;  %v6239_v27 = vld [vmem:[%s7416_s24 + $0xb0] sm:$0x1] }
  0xea   : > { %7053 = vmatprep.mubr.bf16.mxu1 %v6284_v11  ;;  %7130 = vmatpush3.bf16.msra.mxu1 %v7346_v32  ;;  %v6233_v32 = vld [vmem:[%s7416_s24 + $0x98] sm:$0x1]  ;;  %v3413_v59 = vrot.slane %v3411_v53, 4  ;;  %v3412_v4 = vsel %vm7503_vm5, %v6256_v52, %v3411_v53  ;;  %v3435_v43 = vrot.slane %v6239_v27, 5  ;;  %v6242_v53 = vld [vmem:[%s7416_s24 + $0xbc] sm:$0x1] }
  0xeb   : > { %7131 = vmatprep.subr.bf16.mxu1 %v7350_v2  ;;  %v3421_v11 = vrot.slane %v6233_v32, 5  ;;  %v6241_v52 = vld [vmem:[%s7416_s24 + $0xb8] sm:$0xf] }
  0xec   : > { %v6819_v39 = vpop.f32.mrf.mxu1  ;;  %v8073_v40 = vpop.f32.mrf.mxu0  ;;  %7176 = vmatpush3.bf16.msra.mxu0 %v7347_v63  ;;  %v7359_v63 = vld [vmem:[%s9175_s1 + $0x208] sm:$0xff]   ;;  %v3439_v32 = vrot.slane %v6241_v52, 5 }
  0xed   : > { %542 = vst [vmem:[%s8066_s28 + $0x90] sm:$0xff] %v6819_v39  ;;  %v3407_v39 = vrot.slane %v6227_v26, 5  ;;  %7177 = vmatprep.subr.bf16.mxu0 %v7351_v16  ;;  %v6238_v26 = vld [vmem:[%s7416_s24 + $0xac] sm:$0xf] }
  0xee   : > { %v461_v49 = vpop.f32.mrf.mxu1  ;;  %v8085_v50 = vpop.f32.mrf.mxu0  ;;  %7132 = vmatpush3.bf16.msra.mxu1 %v7350_v2  ;;  %v7348_v2 = vld [vmem:[%s7416_s24 + $0x78] sm:$0xff]  }
  0xef   : > { %540 = vst [vmem:[%s8066_s28 + $0x80] sm:$0xff] %v461_v49  ;;  %v6230_v49 = vld [vmem:[%s7416_s24 + $0x8c] sm:$0x1]  ;;  %7098 = vmatmul.mubr.bf16.gmra.mxu0 %v7341_v17  ;;  %7133 = vmatprep.subr.bf16.mxu1 %v7354_v28  ;;  %v6235_v17 = vld [vmem:[%s7416_s24 + $0xa0] sm:$0xf] }
  0xf0   : > { %v6820_v42 = vpop.f32.mrf.mxu1  ;;  %v8097_v58 = vpop.f32.mrf.mxu0  ;;  %v3414_v54 = vrot.slane %v6230_v49, 5  ;;  %7101 = vmatprep.mubr.bf16.mxu0 %v7344_v25  ;;  %7178 = vmatpush3.bf16.msra.mxu0 %v7351_v16  ;;  %v3420_v16 = vrot.slane %v3418_v60, 4  ;;  %v3425_v23 = vrot.slane %v6235_v17, 5  ;;  %v6237_v25 = vld [vmem:[%s7416_s24 + $0xa8] sm:$0xe] }
  0xf1   : > { %543 = vst [vmem:[%s8066_s28 + $0x98] sm:$0xff] %v6820_v42  ;;  %7054 = vmatmul.mubr.bf16.gmra.mxu1 %v6285_v41  ;;  %v7345_v42 = vld [vmem:[%s7416_s24 + $0x6c] sm:$0xff]   ;;  %7179 = vmatprep.subr.bf16.mxu0 %v7355_v37  ;;  %v6240_v49 = vld [vmem:[%s7416_s24 + $0xb4] sm:$0xe] }
  0xf2   : > { %v464_v1 = vpop.f32.mrf.mxu1  ;;  %v8108_v3 = vpop.f32.mrf.mxu0  ;;  %7057 = vmatprep.mubr.bf16.mxu1 %v6286_v47  ;;  %7134 = vmatpush3.bf16.msra.mxu1 %v7354_v28  ;;  %v3415_v5 = vsel %vm7503_vm5, %v3413_v59, %v3414_v54  ;;  %v3432_v28 = vrot.slane %v6238_v26, 5  ;;  %v3427_v31 = vrot.slane %v3425_v23, 4  ;;  %v3426_v48 = vsel %vm7503_vm5, %v6258_v19, %v3425_v23  ;;  %v6243_v59 = vld [vmem:[%s7416_s24 + $0xc0] sm:$0xe] }
  0xf3   : > { %541 = vst [vmem:[%s8066_s28 + $0x88] sm:$0xff] %v464_v1  ;;  %v3408_v1 = vsel %vm7503_vm5, %v3406_v38, %v3407_v39  ;;  %7135 = vmatprep.subr.bf16.mxu1 %v7358_v56  ;;  %v3419_v38 = vsel %vm7503_vm5, %v6257_v7, %v3418_v60  ;;  %v3422_v39 = vsel %vm7503_vm5, %v3420_v16, %v3421_v11  ;;  %v6260_v57 = vrot.slane %v6240_v49, 9 }
  0xf4   : > { %v6823_v9 = vpop.f32.mrf.mxu1  ;;  %v8114_v10 = vpop.f32.mrf.mxu0  ;;  %7180 = vmatpush3.bf16.msra.mxu0 %v7355_v37  ;;  %v6287_v15 = vcombine.low %v3405_v0, %v3408_v1  ;;  %v7349_v37 = vld [vmem:[%s7416_s24 + $0x84] sm:$0xff]   ;;  %v3434_v41 = vrot.slane %v3432_v28, 4  ;;  %v3429_v14 = vsel %vm7503_vm5, %v3427_v31, %v3428_v24  ;;  %v3441_v11 = vrot.slane %v3439_v32, 4  ;;  %v6374_v24 = vld [vmem:[%s7416_s24 + $0x18] sm:$0xf] }
  0xf5   : > { %546 = vst [vmem:[%s8066_s28 + $0xb0] sm:$0xff] %v6823_v9  ;;  %7181 = vmatprep.subr.bf16.mxu0 %v7359_v63  ;;  %v6290_v60 = vcombine.low %v3426_v48, %v3429_v14  ;;  %v6244_v0 = vld [vmem:[%s7416_s24 + $0xc4] sm:$0xf]  ;;  %v6245_v1 = vld [vmem:[%s7416_s24 + $0xc8] sm:$0x1]  ;;  %v8230_v7 = vsel %vm7503_vm5, %v6260_v57, %v3439_v32  ;;  %v4340_v31 = vshll.u32 %v6374_v24, 16 }
  0xf6   : > { %v477_v22 = vpop.f32.mrf.mxu1  ;;  %v8125_v35 = vpop.f32.mrf.mxu0  ;;  %7136 = vmatpush3.bf16.msra.mxu1 %v7358_v56  ;;  %v6289_v56 = vcombine.low %v3419_v38, %v3422_v39 }
  0xf7   : > { %544 = vst [vmem:[%s8066_s28 + $0xa0] sm:$0xff] %v477_v22  ;;  %v6288_v22 = vcombine.low %v3412_v4, %v3415_v5  ;;  %7102 = vmatmul.mubr.bf16.gmra.mxu0 %v7345_v42  ;;  %v3442_v42 = vrot.slane %v6242_v53, 5  ;;  %v4342_v52 = vrot.slane %v4340_v31, 5  ;;  %v6378_v53 = vld [vmem:[%s7416_s24 + $0x28] sm:$0xf] }
  0xf8   : > { %v6824_v33 = vpop.f32.mrf.mxu1  ;;  %v8139_v34 = vpop.f32.mrf.mxu0  ;;  %7105 = vmatprep.mubr.bf16.mxu0 %v7348_v2  ;;  %7182 = vmatpush3.bf16.msra.mxu0 %v7359_v63  ;;  %v8222_v63 = vsel %vm7503_vm5, %v3434_v41, %v3435_v43  ;;  %v6261_v2 = vrot.slane %v6243_v59, 9 }
  0xf9   : > { %547 = vst [vmem:[%s8066_s28 + $0xb8] sm:$0xff] %v6824_v33  ;;  %v6259_v33 = vrot.slane %v6237_v25, 9  ;;  %7058 = vmatmul.mubr.bf16.gmra.mxu1 %v6287_v15  ;;  %7183 = vmatprep.subr.bf16.mxu0 %v7362_v12  ;;  %v8235_v16 = vsel %vm7503_vm5, %v3441_v11, %v3442_v42  ;;  %v6463_v11 = vld [vmem:[%s7416_s24 + $0x1c] sm:$0xf] }
  0xfa   : > { %v480_v44 = vpop.f32.mrf.mxu1  ;;  %v8147_v45 = vpop.f32.mrf.mxu0  ;;  %7061 = vmatprep.mubr.bf16.mxu1 %v6288_v22  ;;  %v6292_v23 = vcombine.low %v8230_v7, %v8235_v16  ;;  %v6462_v7 = vld [vmem:[%s7416_s24 + $0x18] sm:$0xe] }
  0xfb   : > { %545 = vst [vmem:[%s8066_s28 + $0xa8] sm:$0xff] %v480_v44 }
  0xfc   : > { %v6827_v55 = vpop.f32.mrf.mxu1  ;;  %v8153_v36 = vpop.f32.mrf.mxu0  ;;  %7184 = vmatpush3.bf16.msra.mxu0 %v7362_v12  ;;  %v3449_v12 = vrot.slane %v6245_v1, 5  ;;  %v4374_v1 = vshrl.u32 %v6378_v53, 16 }
  0xfd   : > { %550 = vst [vmem:[%s8066_s28 + $0xd0] sm:$0xff] %v6827_v55 }
  0xfe   : > { %v493_v61 = vpop.f32.mrf.mxu1  ;;  %v8163_v62 = vpop.f32.mrf.mxu0 }
  0xff   : > { %548 = vst [vmem:[%s8066_s28 + $0xc0] sm:$0xff] %v493_v61  ;;  %v8218_v61 = vsel %vm7503_vm5, %v6259_v33, %v3432_v28  ;;  %7106 = vmatmul.mubr.bf16.gmra.mxu0 %v7349_v37  ;;  %v6376_v28 = vld [vmem:[%s7416_s24 + $0x20] sm:$0x1]  ;;  %v7356_v37 = vld [vmem:[%s7416_s24 + $0xa8] sm:$0xff]  }
 0x100   : > { %v6828_v8 = vpop.f32.mrf.mxu1  ;;  %v8178_v9 = vpop.f32.mrf.mxu0  ;;  %7109 = vmatprep.mubr.bf16.mxu0 %v7352_v46  ;;  %v6291_v22 = vcombine.low %v8218_v61, %v8222_v63  ;;  %v4356_v43 = vshll.u32 %v6376_v28, 16  ;;  %v5204_v28 = vrot.slane %v6463_v11, 5 }
 0x101   : > { %551 = vst [vmem:[%s8066_s28 + $0xd8] sm:$0xff] %v6828_v8  ;;  %v3446_v8 = vrot.slane %v6244_v0, 5  ;;  %7062 = vmatmul.mubr.bf16.gmra.mxu1 %v6289_v56  ;;  %v4370_v0 = vshll.u32 %v6378_v53, 16 }
 0x102   : > { %v496_v20 = vpop.f32.mrf.mxu1  ;;  %v8187_v21 = vpop.f32.mrf.mxu0  ;;  %7065 = vmatprep.mubr.bf16.mxu1 %v6290_v60  ;;  %v4358_v32 = vrot.slane %v4356_v43, 5  ;;  %v5206_v53 = vrot.slane %v5204_v28, 4 }
 0x103   : > { %549 = vst [vmem:[%s8066_s28 + $0xc8] sm:$0xff] %v496_v20  ;;  %v8239_v17 = vsel %vm7503_vm5, %v6261_v2, %v3446_v8  ;;  %v3448_v18 = vrot.slane %v3446_v8, 4  ;;  %v7353_v20 = vld [vmem:[%s7416_s24 + $0x9c] sm:$0xff]  }
 0x104   : > { %v6831_v29 = vpop.f32.mrf.mxu1  ;;  %v8193_v30 = vpop.f32.mrf.mxu0 }
 0x105   : > { %554 = vst [vmem:[%s8066_s28 + $0xf0] sm:$0xff] %v6831_v29  ;;  %v8252_v27 = vsel %vm7503_vm5, %v3448_v18, %v3449_v12  ;;  %v4337_v29 = vshrl.u32 %v6374_v24, 16  ;;  %v4372_v18 = vrot.slane %v4370_v0, 5 }
 0x106   : > { %v509_v44 = vpop.f32.mrf.mxu1  ;;  %v8201_v47 = vpop.f32.mrf.mxu0  ;;  %v6293_v38 = vcombine.low %v8239_v17, %v8252_v27 }
 0x107   : > { %552 = vst [vmem:[%s8066_s28 + $0xe0] sm:$0xff] %v509_v44  ;;  %v6377_v44 = vld [vmem:[%s7416_s24 + $0x24] sm:$0xf]  ;;  %v4339_v49 = vrot.slane %v4337_v29, 4  ;;  %7110 = vmatmul.mubr.bf16.gmra.mxu0 %v7353_v20  ;;  %v6464_v20 = vld [vmem:[%s7416_s24 + $0x20] sm:$0x1] }
 0x108   : > { %v6832_v54 = vpop.f32.mrf.mxu1  ;;  %v8211_v55 = vpop.f32.mrf.mxu0  ;;  %v4361_v42 = vshrl.u32 %v6377_v44, 16  ;;  %v4364_v63 = vshll.u32 %v6377_v44, 16  ;;  %7113 = vmatprep.mubr.bf16.mxu0 %v7356_v37  ;;  %v5207_v43 = vrot.slane %v6464_v20, 5  ;;  %v6466_v44 = vld [vmem:[%s7416_s24 + $0x28] sm:$0xf] }
 0x109   : > { %555 = vst [vmem:[%s8066_s28 + $0xf8] sm:$0xff] %v6832_v54  ;;  %v6379_v54 = vld [vmem:[%s7416_s24 + $0x2c] sm:$0x1]  ;;  %v4343_v61 = vor.u32 %v4342_v52, %v4339_v49  ;;  %7066 = vmatmul.mubr.bf16.gmra.mxu1 %v6291_v22 }
 0x10a   : > { %v512_v4 = vpop.f32.mrf.mxu1  ;;  %v8226_v5 = vpop.f32.mrf.mxu0  ;;  %v4366_v16 = vrot.slane %v4364_v63, 5  ;;  %7069 = vmatprep.mubr.bf16.mxu1 %v6292_v23  ;;  %v6467_v22 = vld [vmem:[%s7416_s24 + $0x2c] sm:$0x1]  ;;  %v5211_v63 = vrot.slane %v6466_v44, 5 }
 0x10b   : > { %553 = vst [vmem:[%s8066_s28 + $0xe8] sm:$0xff] %v512_v4  ;;  %v4380_v4 = vshll.u32 %v6379_v54, 16  ;;  %v6380_v54 = vld [vmem:[%s7416_s24 + $0x30] sm:$0xf]  ;;  %v5214_v0 = vrot.slane %v6467_v22, 5 }
 0x10c   : > { %v6851_v13 = vpop.f32.mrf.mxu1  ;;  %v6899_v15 = vpop.f32.mrf.mxu0 }
 0x10d   : > { %v1315_v19 = vadd.f32 %v6851_v13, %v8073_v40  ;;  %v6375_v40 = vld [vmem:[%s7416_s24 + $0x1c] sm:$0xf] }
 0x10e   : > { %v1154_v25 = vpop.f32.mrf.mxu1  ;;  %v8248_v26 = vpop.f32.mrf.mxu0  ;;  %v4346_v39 = vshll.u32 %v6375_v40, 16  ;;  %v4350_v41 = vshrl.u32 %v6375_v40, 16  ;;  %v6510_v40 = vrot.slane %v6462_v7, 9 }
 0x10f   : > { %v8257_v33 = vadd.f32 %v1154_v25, %v8085_v50  ;;  %v1912_v50 = vadd.f32 %v6899_v15, %v1315_v19  ;;  %v4344_v15 = vrot.slane %v4343_v61, 4  ;;  %v4376_v19 = vrot.slane %v4374_v1, 4 }
 0x110   : > { %v6852_v48 = vpop.f32.mrf.mxu1  ;;  %v8263_v14 = vpop.f32.mrf.mxu0  ;;  %v4348_v46 = vrot.slane %v4346_v39, 5  ;;  %v4352_v57 = vrot.slane %v4350_v41, 4  ;;  %v4382_v25 = vrot.slane %v4380_v4, 5  ;;  %v8295_v52 = vsel %vm7503_vm5, %v6510_v40, %v5204_v28 }
 0x111   : > { %v8268_v56 = vadd.f32 %v6852_v48, %v8097_v58  ;;  %1944 = vst [vmem:[%s8066_s28 + $0x10] sm:$0xff] %v1912_v50  ;;  %v4363_v58 = vrot.slane %v4361_v42, 4  ;;  %v4377_v41 = vor.u32 %v4376_v19, %v4372_v18  ;;  %v7357_v48 = vld [vmem:[%s7416_s24 + $0xb4] sm:$0xff]   ;;  %v1910_v1 = vadd.f32 %v8248_v26, %v8257_v33  ;;  %v6383_v33 = vld [vmem:[%s7416_s24 + $0x3c] sm:$0xf]  ;;  %7070 = vmatmul.mubr.bf16.gmra.mxu1 %v6293_v38  ;;  %v7361_v38 = vld [vmem:[%s7416_s24 + $0xcc] sm:$0xff]  }
 0x112   : > { %v1157_v59 = vpop.f32.mrf.mxu1  ;;  %v8270_v60 = vpop.f32.mrf.mxu0  ;;  %v4353_v2 = vor.u32 %v4352_v57, %v4348_v46  ;;  %v4349_v37 = vsel %vm7483_vm4, %v4344_v15, %v4348_v46  ;;  %v7360_v57 = vld [vmem:[%s7416_s24 + $0xc0] sm:$0xff]   ;;  %v4385_v4 = vshrl.u32 %v6380_v54, 16  ;;  %7114 = vmatmul.mubr.bf16.gmra.mxu0 %v7357_v48 }
 0x113   : > { %v8276_v8 = vadd.f32 %v1157_v59, %v8108_v3  ;;  %v6465_v3 = vld [vmem:[%s7416_s24 + $0x24] sm:$0xe]  ;;  %v4367_v39 = vor.u32 %v4366_v16, %v4363_v58  ;;  %v4378_v61 = vrot.slane %v4377_v41, 4  ;;  %v6382_v58 = vld [vmem:[%s7416_s24 + $0x38] sm:$0x1]  ;;  %1942 = vst [vmem:[%s8066_s28] sm:$0xff] %v1910_v1  ;;  %7117 = vmatprep.mubr.bf16.mxu0 %v7360_v57 }
 0x114   : > { %v6855_v12 = vpop.f32.mrf.mxu1  ;;  %v8278_v13 = vpop.f32.mrf.mxu0  ;;  %v4354_v24 = vrot.slane %v4353_v2, 4  ;;  %v6511_v23 = vrot.slane %v6465_v3, 9  ;;  %v6381_v2 = vld [vmem:[%s7416_s24 + $0x34] sm:$0xf]  ;;  %v4387_v40 = vrot.slane %v4385_v4, 4 }
 0x115   : > { %v4368_v59 = vrot.slane %v4367_v39, 4  ;;  %v4383_v16 = vsel %vm7483_vm4, %v4378_v61, %v4382_v25  ;;  %v4394_v3 = vshll.u32 %v6381_v2, 16  ;;  %v4404_v39 = vshll.u32 %v6382_v58, 16  ;;  %v6385_v48 = vld [vmem:[%s7416_s24 + $0x44] sm:$0x1] }
 0x116   : > { %v8282_v29 = vpop.f32.mrf.mxu1  ;;  %v8284_v31 = vpop.f32.mrf.mxu0  ;;  %v4359_v49 = vsel %vm7483_vm4, %v4354_v24, %v4358_v32  ;;  %v8305_v32 = vsel %vm7503_vm5, %v5206_v53, %v5207_v43  ;;  %v8323_v26 = vsel %vm7503_vm5, %v6511_v23, %v5211_v63  ;;  %v5213_v24 = vrot.slane %v5211_v63, 4  ;;  %v6384_v43 = vld [vmem:[%s7416_s24 + $0x40] sm:$0xf]  ;;  %v6468_v58 = vld [vmem:[%s7416_s24 + $0x30] sm:$0xe] }
 0x117   : > { %v6438_v42 = vcombine.low %v4349_v37, %v4359_v49  ;;  %v4373_v15 = vsel %vm7483_vm4, %v4368_v59, %v4372_v18  ;;  %v6542_v19 = vcombine.low %v8295_v52, %v8305_v32  ;;  %v4388_v18 = vshll.u32 %v6380_v54, 16 }
 0x118   : > { %v8298_v50 = vpop.f32.mrf.mxu1  ;;  %v8300_v46 = vpop.f32.mrf.mxu0  ;;  %v8326_v20 = vcombine.low %v4373_v15, %v4383_v16  ;;  %v4398_v37 = vshrl.u32 %v6381_v2, 16  ;;  %v1319_v41 = vadd.f32 %v6855_v12, %v8114_v10  ;;  %v8340_v44 = vsel %vm7503_vm5, %v5213_v24, %v5214_v0  ;;  %v6469_v24 = vld [vmem:[%s7416_s24 + $0x34] sm:$0xf] }
 0x119   : > { %v4390_v22 = vrot.slane %v4388_v18, 5  ;;  %v4409_v49 = vshrl.u32 %v6383_v33, 16  ;;  %v4412_v52 = vshll.u32 %v6383_v33, 16  ;;  %7137 = vmatprep.mubr.bf16.mxu1 %v6438_v42  ;;  %v6543_v10 = vcombine.low %v8323_v26, %v8340_v44 }
 0x11a   : > { %v8311_v7 = vpop.f32.mrf.mxu1  ;;  %v8313_v11 = vpop.f32.mrf.mxu0  ;;  %v4396_v12 = vrot.slane %v4394_v3, 5  ;;  %v4400_v17 = vrot.slane %v4398_v37, 4  ;;  %v4406_v27 = vrot.slane %v4404_v39, 5  ;;  %v4418_v61 = vshll.u32 %v6384_v43, 16  ;;  %7118 = vmatmul.mubr.bf16.gmra.mxu0 %v7361_v38  ;;  %v6473_v38 = vld [vmem:[%s7416_s24 + $0x44] sm:$0x1]  ;;  %7138 = vmatmul.mubr.bf16.vlgmr.msra.gmra.mxu1 %v8326_v20 }
 0x11b   : > { %v4391_v54 = vor.u32 %v4390_v22, %v4387_v40  ;;  %v4411_v57 = vrot.slane %v4409_v49, 4  ;;  %v4414_v59 = vrot.slane %v4412_v52, 5  ;;  %v4422_v0 = vshrl.u32 %v6384_v43, 16  ;;  %v6470_v40 = vld [vmem:[%s7416_s24 + $0x38] sm:$0x1]  ;;  %7185 = vmatprep.mubr.bf16.mxu0 %v6542_v19 }
 0x11c   : > { %v8329_v28 = vpop.f32.mrf.mxu1  ;;  %v8331_v25 = vpop.f32.mrf.mxu0  ;;  %v4401_v42 = vor.u32 %v4400_v17, %v4396_v12  ;;  %v4428_v1 = vshll.u32 %v6385_v48, 16  ;;  %v1913_v2 = vadd.f32 %v8263_v14, %v8268_v56  ;;  %v4420_v16 = vrot.slane %v4418_v61, 5  ;;  %v6471_v14 = vld [vmem:[%s7416_s24 + $0x3c] sm:$0xe]  ;;  %v6472_v49 = vld [vmem:[%s7416_s24 + $0x40] sm:$0xf] }
 0x11d   : > { %v4392_v4 = vrot.slane %v4391_v54, 4  ;;  %v4415_v15 = vor.u32 %v4414_v59, %v4411_v57  ;;  %v1317_v33 = vadd.f32 %v8282_v29, %v8125_v35  ;;  %v4424_v3 = vrot.slane %v4422_v0, 4  ;;  %v6386_v54 = vld [vmem:[%s7416_s24 + $0x48] sm:$0xf] }
 0x11e   : > { %v8343_v53 = vpop.f32.mrf.mxu1  ;;  %v8345_v23 = vpop.f32.mrf.mxu0  ;;  %v4402_v18 = vrot.slane %v4401_v42, 4  ;;  %v4430_v37 = vrot.slane %v4428_v1, 5  ;;  %1945 = vst [vmem:[%s8066_s28 + $0x18] sm:$0xff] %v1913_v2  ;;  %v1911_v39 = vadd.f32 %v8270_v60, %v8276_v8  ;;  %v8373_v22 = vadd.f32 %v8298_v50, %v8139_v34  ;;  %v6388_v2 = vld [vmem:[%s7416_s24 + $0x50] sm:$0x1] }
 0x11f   : > { %v4397_v35 = vsel %vm7483_vm4, %v4392_v4, %v4396_v12  ;;  %v4416_v29 = vrot.slane %v4415_v15, 4  ;;  %v6512_v48 = vrot.slane %v6468_v58, 9  ;;  %v4425_v8 = vor.u32 %v4424_v3, %v4420_v16 }
 0x120   : > { %v8350_v63 = vpop.f32.mrf.mxu1  ;;  %v8352_v32 = vpop.f32.mrf.mxu0  ;;  %v4407_v60 = vsel %vm7483_vm4, %v4402_v18, %v4406_v27  ;;  %1943 = vst [vmem:[%s8066_s28 + $0x8] sm:$0xff] %v1911_v39  ;;  %v5218_v52 = vrot.slane %v6469_v24, 5  ;;  %v5221_v17 = vrot.slane %v6470_v40, 5  ;;  %v1916_v50 = vadd.f32 %v8278_v13, %v1319_v41  ;;  %v6387_v41 = vld [vmem:[%s7416_s24 + $0x4c] sm:$0xf] }
 0x121   : > { %v6440_v12 = vcombine.low %v4397_v35, %v4407_v60  ;;  %v4421_v34 = vsel %vm7483_vm4, %v4416_v29, %v4420_v16  ;;  %v6513_v19 = vrot.slane %v6471_v14, 9  ;;  %v4426_v57 = vrot.slane %v4425_v8, 4  ;;  %v6389_v40 = vld [vmem:[%s7416_s24 + $0x54] sm:$0xf]  ;;  %v6390_v29 = vld [vmem:[%s7416_s24 + $0x58] sm:$0xf] }
 0x122   : > { %v8365_v56 = vpop.f32.mrf.mxu1  ;;  %v8367_v43 = vpop.f32.mrf.mxu0  ;;  %v5219_v27 = vsel %vm7503_vm5, %v6512_v48, %v5218_v52  ;;  %v5220_v59 = vrot.slane %v5218_v52, 4  ;;  %v5225_v61 = vrot.slane %v6472_v49, 5  ;;  %1948 = vst [vmem:[%s8066_s28 + $0x30] sm:$0xff] %v1916_v50  ;;  %v5228_v20 = vrot.slane %v6473_v38, 5  ;;  %7186 = vmatmul.mubr.bf16.vlgmr.msra.gmra.mxu0 %v6543_v10 }
 0x123   : > { %7141 = vmatprep.mubr.bf16.mxu1 %v6440_v12  ;;  %v1318_v1 = vadd.f32 %v8311_v7, %v8147_v45  ;;  %v1914_v13 = vadd.f32 %v8284_v31, %v1317_v33  ;;  %v4433_v58 = vshrl.u32 %v6386_v54, 16  ;;  %v4431_v4 = vsel %vm7483_vm4, %v4426_v57, %v4430_v37 }
 0x124   : > { %v8387_v42 = vpop.f32.mrf.mxu1  ;;  %v8389_v0 = vpop.f32.mrf.mxu0  ;;  %v5222_v15 = vsel %vm7503_vm5, %v5220_v59, %v5221_v17  ;;  %v8403_v16 = vsel %vm7503_vm5, %v6513_v19, %v5225_v61  ;;  %v5227_v24 = vrot.slane %v5225_v61, 4  ;;  %v6441_v31 = vcombine.low %v4421_v34, %v4431_v4  ;;  %v6391_v17 = vld [vmem:[%s7416_s24 + $0x5c] sm:$0x1]  ;;  %v6474_v61 = vld [vmem:[%s7416_s24 + $0x48] sm:$0xe] }
 0x125   : > { %v6544_v7 = vcombine.low %v5219_v27, %v5222_v15  ;;  %1946 = vst [vmem:[%s8066_s28 + $0x20] sm:$0xff] %v1914_v13  ;;  %v4435_v33 = vrot.slane %v4433_v58, 4  ;;  %v4436_v3 = vshll.u32 %v6386_v54, 16  ;;  %v4442_v39 = vshll.u32 %v6387_v41, 16  ;;  %v6476_v15 = vld [vmem:[%s7416_s24 + $0x50] sm:$0x1] }
 0x126   : > { %v8406_v18 = vpop.f32.mrf.mxu1  ;;  %v8408_v45 = vpop.f32.mrf.mxu0  ;;  %v5229_v37 = vsel %vm7503_vm5, %v5227_v24, %v5228_v20  ;;  %v4446_v14 = vshrl.u32 %v6387_v41, 16  ;;  %v4452_v35 = vshll.u32 %v6388_v2, 16  ;;  %v1323_v52 = vadd.f32 %v8329_v28, %v8153_v36  ;;  %7142 = vmatmul.mubr.bf16.gmra.mxu1 %v6441_v31  ;;  %v6475_v20 = vld [vmem:[%s7416_s24 + $0x4c] sm:$0xf] }
 0x127   : > { %v6545_v60 = vcombine.low %v8403_v16, %v5229_v37  ;;  %v4438_v8 = vrot.slane %v4436_v3, 5  ;;  %v4457_v38 = vshrl.u32 %v6389_v40, 16  ;;  %7189 = vmatprep.mubr.bf16.mxu0 %v6544_v7  ;;  %v4444_v54 = vrot.slane %v4442_v39, 5 }
 0x128   : > { %v8414_v48 = vpop.f32.mrf.mxu1  ;;  %v8416_v49 = vpop.f32.mrf.mxu0  ;;  %v4448_v12 = vrot.slane %v4446_v14, 4  ;;  %v4454_v34 = vrot.slane %v4452_v35, 5  ;;  %v4460_v50 = vshll.u32 %v6389_v40, 16  ;;  %v4466_v44 = vshll.u32 %v6390_v29, 16  ;;  %v6479_v14 = vld [vmem:[%s7416_s24 + $0x5c] sm:$0x1] }
 0x129   : > { %v4439_v19 = vor.u32 %v4438_v8, %v4435_v33  ;;  %v4459_v26 = vrot.slane %v4457_v38, 4  ;;  %v4470_v10 = vshrl.u32 %v6390_v29, 16  ;;  %v4476_v28 = vshll.u32 %v6391_v17, 16 }
 0x12a   : > { %v8425_v57 = vpop.f32.mrf.mxu1  ;;  %v4449_v27 = vor.u32 %v4448_v12, %v4444_v54  ;;  %v4462_v36 = vrot.slane %v4460_v50, 5  ;;  %v1917_v59 = vadd.f32 %v8300_v46, %v8373_v22  ;;  %v8431_v13 = vpop.f32.mrf.mxu0  ;;  %v4468_v2 = vrot.slane %v4466_v44, 5  ;;  %v6477_v22 = vld [vmem:[%s7416_s24 + $0x54] sm:$0xe]  ;;  %7190 = vmatmul.mubr.bf16.gmra.mxu0 %v6545_v60  ;;  %v6392_v50 = vld [vmem:[%s7416_s24 + $0x60] sm:$0xf] }
 0x12b   : > { %v4440_v41 = vrot.slane %v4439_v19, 4  ;;  %v4472_v58 = vrot.slane %v4470_v10, 4  ;;  %v1321_v4 = vadd.f32 %v8343_v53, %v8163_v62  ;;  %v4478_v40 = vrot.slane %v4476_v28, 5  ;;  %v6478_v62 = vld [vmem:[%s7416_s24 + $0x58] sm:$0xf] }
 0x12c   : > { %v4450_v16 = vrot.slane %v4449_v27, 4  ;;  %v4463_v24 = vor.u32 %v4462_v36, %v4459_v26  ;;  %1949 = vst [vmem:[%s8066_s28 + $0x38] sm:$0xff] %v1917_v59  ;;  %v1915_v46 = vadd.f32 %v8313_v11, %v1318_v1  ;;  %v8443_v33 = vadd.f32 %v8350_v63, %v8178_v9  ;;  %v6393_v19 = vld [vmem:[%s7416_s24 + $0x64] sm:$0xf]  ;;  %v6394_v10 = vld [vmem:[%s7416_s24 + $0x68] sm:$0x1] }
 0x12d   : > { %v4445_v31 = vsel %vm7483_vm4, %v4440_v41, %v4444_v54  ;;  %v4473_v7 = vor.u32 %v4472_v58, %v4468_v2  ;;  %v6514_v3 = vrot.slane %v6474_v61, 9  ;;  %v5232_v11 = vrot.slane %v6475_v20, 5 }
 0x12e   : > { %v8446_v53 = vpop.f32.mrf.mxu1  ;;  %v4455_v37 = vsel %vm7483_vm4, %v4450_v16, %v4454_v34  ;;  %v4464_v39 = vrot.slane %v4463_v24, 4  ;;  %1947 = vst [vmem:[%s8066_s28 + $0x28] sm:$0xff] %v1915_v46  ;;  %v5235_v1 = vrot.slane %v6476_v15, 5  ;;  %v1920_v29 = vadd.f32 %v8331_v25, %v1323_v52  ;;  %v6396_v24 = vld [vmem:[%s7416_s24 + $0x70] sm:$0xf] }
 0x12f   : > { %v6442_v9 = vcombine.low %v4445_v31, %v4455_v37  ;;  %v4474_v63 = vrot.slane %v4473_v7, 4  ;;  %v6515_v8 = vrot.slane %v6477_v22, 9  ;;  %v5233_v54 = vsel %vm7503_vm5, %v6514_v3, %v5232_v11 }
 0x130   : > { %v8452_v35 = vpop.f32.mrf.mxu0  ;;  %v8455_v17 = vpop.f32.mrf.mxu1  ;;  %v4469_v38 = vsel %vm7483_vm4, %v4464_v39, %v4468_v2  ;;  %v5234_v12 = vrot.slane %v5232_v11, 4  ;;  %v5239_v34 = vrot.slane %v6478_v62, 5  ;;  %1952 = vst [vmem:[%s8066_s28 + $0x50] sm:$0xff] %v1920_v29  ;;  %v5242_v52 = vrot.slane %v6479_v14, 5 }
 0x131   : > { %7145 = vmatprep.mubr.bf16.mxu1 %v6442_v9  ;;  %v4479_v25 = vsel %vm7483_vm4, %v4474_v63, %v4478_v40  ;;  %v1322_v26 = vadd.f32 %v8365_v56, %v8187_v21  ;;  %v1918_v44 = vadd.f32 %v8345_v23, %v1321_v4  ;;  %v4481_v41 = vshrl.u32 %v6392_v50, 16  ;;  %v6395_v56 = vld [vmem:[%s7416_s24 + $0x6c] sm:$0xf]  ;;  %v6397_v40 = vld [vmem:[%s7416_s24 + $0x74] sm:$0x1] }
 0x132   : > { %v8463_v60 = vpop.f32.mrf.mxu0  ;;  %v8472_v27 = vpop.f32.mrf.mxu1  ;;  %v6443_v36 = vcombine.low %v4469_v38, %v4479_v25  ;;  %v5236_v28 = vsel %vm7503_vm5, %v5234_v12, %v5235_v1  ;;  %v5240_v59 = vsel %vm7503_vm5, %v6515_v8, %v5239_v34  ;;  %v5241_v61 = vrot.slane %v5239_v34, 4  ;;  %v6481_v12 = vld [vmem:[%s7416_s24 + $0x64] sm:$0xf] }
 0x133   : > { %v6546_v20 = vcombine.low %v5233_v54, %v5236_v28  ;;  %1950 = vst [vmem:[%s8066_s28 + $0x40] sm:$0xff] %v1918_v44  ;;  %v4484_v2 = vshll.u32 %v6392_v50, 16  ;;  %v4490_v21 = vshll.u32 %v6393_v19, 16  ;;  %v4494_v4 = vshrl.u32 %v6393_v19, 16  ;;  %v6480_v54 = vld [vmem:[%s7416_s24 + $0x60] sm:$0xe] }
 0x134   : > { %v8480_v23 = vpop.f32.mrf.mxu0  ;;  %7146 = vmatmul.mubr.bf16.gmra.mxu1 %v6443_v36  ;;  %v5243_v58 = vsel %vm7503_vm5, %v5241_v61, %v5242_v52  ;;  %v4500_v15 = vshll.u32 %v6394_v10, 16  ;;  %v1327_v16 = vadd.f32 %v8387_v42, %v8193_v30  ;;  %v4483_v22 = vrot.slane %v4481_v41, 4  ;;  %v8488_v3 = vpop.f32.mrf.mxu1  ;;  %v6482_v52 = vld [vmem:[%s7416_s24 + $0x68] sm:$0x1] }
 0x135   : > { %7193 = vmatprep.mubr.bf16.mxu0 %v6546_v20  ;;  %v6547_v46 = vcombine.low %v5240_v59, %v5243_v58  ;;  %v4486_v31 = vrot.slane %v4484_v2, 5  ;;  %v4492_v7 = vrot.slane %v4490_v21, 5  ;;  %v4496_v62 = vrot.slane %v4494_v4, 4  ;;  %v6484_v2 = vld [vmem:[%s7416_s24 + $0x70] sm:$0xf] }
 0x136   : > { %v4502_v37 = vrot.slane %v4500_v15, 5  ;;  %v4505_v39 = vshrl.u32 %v6395_v56, 16  ;;  %v4508_v11 = vshll.u32 %v6395_v56, 16  ;;  %v4514_v14 = vshll.u32 %v6396_v24, 16  ;;  %v8490_v9 = vpop.f32.mrf.mxu0  ;;  %v6485_v58 = vld [vmem:[%s7416_s24 + $0x74] sm:$0x1] }
 0x137   : > { %7194 = vmatmul.mubr.bf16.gmra.mxu0 %v6547_v46  ;;  %v4487_v1 = vor.u32 %v4486_v31, %v4483_v22  ;;  %v4518_v30 = vshrl.u32 %v6396_v24, 16  ;;  %v4524_v42 = vshll.u32 %v6397_v40, 16  ;;  %v4497_v63 = vor.u32 %v4496_v62, %v4492_v7  ;;  %v8499_v44 = vpop.f32.mrf.mxu1  ;;  %v6399_v62 = vld [vmem:[%s7416_s24 + $0x7c] sm:$0xf] }
 0x138   : > { %v4507_v29 = vrot.slane %v4505_v39, 4  ;;  %v4510_v8 = vrot.slane %v4508_v11, 5  ;;  %v8494_v38 = vadd.f32 %v8352_v32, %v8443_v33  ;;  %v4516_v50 = vrot.slane %v4514_v14, 5  ;;  %v6483_v32 = vld [vmem:[%s7416_s24 + $0x6c] sm:$0xe] }
 0x139   : > { %v4488_v34 = vrot.slane %v4487_v1, 4  ;;  %v4520_v19 = vrot.slane %v4518_v30, 4  ;;  %v4526_v25 = vrot.slane %v4524_v42, 5  ;;  %v4498_v10 = vrot.slane %v4497_v63, 4  ;;  %v8514_v21 = vpop.f32.mrf.mxu1  ;;  %v8516_v56 = vpop.f32.mrf.mxu0  ;;  %v6400_v1 = vld [vmem:[%s7416_s24 + $0x80] sm:$0x1] }
 0x13a   : > { %v4511_v36 = vor.u32 %v4510_v8, %v4507_v29  ;;  %v1325_v28 = vadd.f32 %v8406_v18, %v8201_v47  ;;  %v8504_v59 = vadd.f32 %v8367_v43, %v1322_v26  ;;  %v8511_v20 = vadd.f32 %v8414_v48, %v8211_v55 }
 0x13b   : > { %v4493_v33 = vsel %vm7483_vm4, %v4488_v34, %v4492_v7  ;;  %v4521_v61 = vor.u32 %v4520_v19, %v4516_v50  ;;  %v6516_v41 = vrot.slane %v6480_v54, 9  ;;  %v4503_v47 = vsel %vm7483_vm4, %v4498_v10, %v4502_v37  ;;  %v8524_v24 = vpop.f32.mrf.mxu0  ;;  %v6398_v7 = vld [vmem:[%s7416_s24 + $0x78] sm:$0xf]  ;;  %v8532_v37 = vpop.f32.mrf.mxu1  ;;  %v6403_v10 = vld [vmem:[%s7416_s24 + $0x8c] sm:$0x1] }
 0x13c   : > { %v4512_v43 = vrot.slane %v4511_v36, 4  ;;  %v5246_v18 = vrot.slane %v6481_v12, 5  ;;  %v5249_v26 = vrot.slane %v6482_v52, 5  ;;  %v6444_v4 = vcombine.low %v4493_v33, %v4503_v47  ;;  %v6402_v52 = vld [vmem:[%s7416_s24 + $0x88] sm:$0xf] }
 0x13d   : > { %v4522_v15 = vrot.slane %v4521_v61, 4  ;;  %v8522_v55 = vadd.f32 %v8389_v0, %v1327_v16  ;;  %v6517_v48 = vrot.slane %v6483_v32, 9  ;;  %v5253_v31 = vrot.slane %v6484_v2, 5  ;;  %v8542_v14 = vpop.f32.mrf.mxu0  ;;  %v8555_v36 = vpop.f32.mrf.mxu1 }
 0x13e   : > { %v4517_v40 = vsel %vm7483_vm4, %v4512_v43, %v4516_v50  ;;  %v5247_v46 = vsel %vm7503_vm5, %v6516_v41, %v5246_v18  ;;  %v5248_v22 = vrot.slane %v5246_v18, 4  ;;  %7149 = vmatprep.mubr.bf16.mxu1 %v6444_v4  ;;  %v5256_v16 = vrot.slane %v6485_v58, 5 }
 0x13f   : > { %v4527_v0 = vsel %vm7483_vm4, %v4522_v15, %v4526_v25  ;;  %v1326_v39 = vadd.f32 %v8425_v57, %v8226_v5  ;;  %v8539_v11 = vadd.f32 %v8408_v45, %v1325_v28  ;;  %v5254_v63 = vsel %vm7503_vm5, %v6517_v48, %v5253_v31  ;;  %v1299_v57 = vld [vmem:[%s8066_s28 + $0x90] sm:$0xff]  ;;  %v6401_v45 = vld [vmem:[%s7416_s24 + $0x84] sm:$0xf]  ;;  %v8557_v41 = vpop.f32.mrf.mxu0 }
 0x140   : > { %v6445_v30 = vcombine.low %v4517_v40, %v4527_v0  ;;  %v5250_v42 = vsel %vm7503_vm5, %v5248_v22, %v5249_v26  ;;  %v5255_v29 = vrot.slane %v5253_v31, 4  ;;  %v4529_v54 = vshrl.u32 %v6398_v7, 16  ;;  %v1297_v15 = vld [vmem:[%s8066_s28 + $0x80] sm:$0xff]  ;;  %v6486_v31 = vld [vmem:[%s7416_s24 + $0x78] sm:$0xe] }
 0x141   : > { %v6548_v8 = vcombine.low %v5247_v46, %v5250_v42  ;;  %v4532_v12 = vshll.u32 %v6398_v7, 16  ;;  %v4538_v5 = vshll.u32 %v6399_v62, 16  ;;  %v4542_v50 = vshrl.u32 %v6399_v62, 16  ;;  %v6487_v7 = vld [vmem:[%s7416_s24 + $0x7c] sm:$0xf] }
 0x142   : > { %7150 = vmatmul.mubr.bf16.gmra.mxu1 %v6445_v30  ;;  %v5257_v34 = vsel %vm7503_vm5, %v5255_v29, %v5256_v16  ;;  %v4548_v19 = vshll.u32 %v6400_v1, 16  ;;  %v1331_v25 = vadd.f32 %v8446_v53, %v1299_v57  ;;  %v4531_v32 = vrot.slane %v4529_v54, 4  ;;  %v6488_v42 = vld [vmem:[%s7416_s24 + $0x80] sm:$0x1] }
 0x143   : > { %7197 = vmatprep.mubr.bf16.mxu0 %v6548_v8  ;;  %v6549_v28 = vcombine.low %v5254_v63, %v5257_v34  ;;  %v4534_v33 = vrot.slane %v4532_v12, 5  ;;  %v4540_v61 = vrot.slane %v4538_v5, 5  ;;  %v4544_v2 = vrot.slane %v4542_v50, 4  ;;  %v6489_v12 = vld [vmem:[%s7416_s24 + $0x84] sm:$0xe] }
 0x144   : > { %v4550_v47 = vrot.slane %v4548_v19, 5  ;;  %v4553_v43 = vshrl.u32 %v6401_v45, 16  ;;  %v4556_v18 = vshll.u32 %v6401_v45, 16  ;;  %v4562_v26 = vshll.u32 %v6402_v52, 16  ;;  %v8566_v62 = vpop.f32.mrf.mxu1  ;;  %v6490_v19 = vld [vmem:[%s7416_s24 + $0x88] sm:$0xf] }
 0x145   : > { %7198 = vmatmul.mubr.bf16.gmra.mxu0 %v6549_v28  ;;  %v4535_v53 = vor.u32 %v4534_v33, %v4531_v32  ;;  %v4566_v58 = vshrl.u32 %v6402_v52, 16  ;;  %v4572_v4 = vshll.u32 %v6403_v10, 16  ;;  %v4545_v48 = vor.u32 %v4544_v2, %v4540_v61  ;;  %v8569_v63 = vpop.f32.mrf.mxu0  ;;  %v6491_v28 = vld [vmem:[%s7416_s24 + $0x8c] sm:$0x1] }
 0x146   : > { %v4555_v40 = vrot.slane %v4553_v43, 4  ;;  %v4558_v46 = vrot.slane %v4556_v18, 5  ;;  %v8562_v22 = vadd.f32 %v8416_v49, %v8511_v20  ;;  %v4564_v16 = vrot.slane %v4562_v26, 5  ;;  %v1300_v20 = vld [vmem:[%s8066_s28 + $0x98] sm:$0xff]  ;;  %v8577_v5 = vpop.f32.mrf.mxu1  ;;  %v1298_v43 = vld [vmem:[%s8066_s28 + $0x88] sm:$0xff] }
 0x147   : > { %v4536_v0 = vrot.slane %v4535_v53, 4  ;;  %v4568_v1 = vrot.slane %v4566_v58, 4  ;;  %v4574_v30 = vrot.slane %v4572_v4, 5  ;;  %v4546_v29 = vrot.slane %v4545_v48, 4  ;;  %v8585_v52 = vpop.f32.mrf.mxu0  ;;  %v6404_v4 = vld [vmem:[%s7416_s24 + $0x90] sm:$0xf] }
 0x148   : > { %v4559_v8 = vor.u32 %v4558_v46, %v4555_v40  ;;  %v1329_v54 = vadd.f32 %v1297_v15, %v8455_v17  ;;  %v8573_v49 = vadd.f32 %v8431_v13, %v1326_v39  ;;  %v8582_v34 = vadd.f32 %v8472_v27, %v1300_v20  ;;  %v8590_v32 = vpop.f32.mrf.mxu1  ;;  %v6405_v15 = vld [vmem:[%s7416_s24 + $0x94] sm:$0xf]  ;;  %v6406_v46 = vld [vmem:[%s7416_s24 + $0x98] sm:$0x1] }
 0x149   : > { %v4541_v57 = vsel %vm7483_vm4, %v4536_v0, %v4540_v61  ;;  %v4569_v45 = vor.u32 %v4568_v1, %v4564_v16  ;;  %v6518_v50 = vrot.slane %v6486_v31, 9  ;;  %v4551_v13 = vsel %vm7483_vm4, %v4546_v29, %v4550_v47  ;;  %v8596_v18 = vpop.f32.mrf.mxu0 }
 0x14a   : > { %9183 = vst [vmem:[#allocation2_spill] sm:$0xff] %v8573_v49  ;;  %v4560_v17 = vrot.slane %v4559_v8, 4  ;;  %v5260_v39 = vrot.slane %v6487_v7, 5  ;;  %v5263_v10 = vrot.slane %v6488_v42, 5  ;;  %v6446_v33 = vcombine.low %v4541_v57, %v4551_v13  ;;  %v8611_v31 = vpop.f32.mrf.mxu1  ;;  %v1303_v8 = vld [vmem:[%s8066_s28 + $0xb0] sm:$0xff] }
 0x14b   : > { %v4570_v61 = vrot.slane %v4569_v45, 4  ;;  %v8593_v27 = vadd.f32 %v8452_v35, %v1331_v25  ;;  %v6519_v2 = vrot.slane %v6489_v12, 9  ;;  %v5267_v58 = vrot.slane %v6490_v19, 5  ;;  %v6409_v19 = vld [vmem:[%s7416_s24 + $0xa4] sm:$0x1] }
 0x14c   : > { %v4565_v47 = vsel %vm7483_vm4, %v4560_v17, %v4564_v16  ;;  %v5261_v53 = vsel %vm7503_vm5, %v6518_v50, %v5260_v39  ;;  %v5262_v26 = vrot.slane %v5260_v39, 4  ;;  %7153 = vmatprep.mubr.bf16.mxu1 %v6446_v33  ;;  %v5270_v25 = vrot.slane %v6491_v28, 5  ;;  %v6408_v50 = vld [vmem:[%s7416_s24 + $0xa0] sm:$0xf] }
 0x14d   : > { %9184 = vst [vmem:[#allocation3_spill] sm:$0xff] %v8593_v27  ;;  %v4575_v35 = vsel %vm7483_vm4, %v4570_v61, %v4574_v30  ;;  %v1330_v48 = vadd.f32 %v1298_v43, %v8488_v3  ;;  %v8608_v40 = vadd.f32 %v8463_v60, %v1329_v54  ;;  %v5268_v16 = vsel %vm7503_vm5, %v6519_v2, %v5267_v58  ;;  %v8617_v30 = vpop.f32.mrf.mxu0  ;;  %v6407_v54 = vld [vmem:[%s7416_s24 + $0x9c] sm:$0xf]  ;;  %v6508_v27 = vld [vmem:[%s7416_s24 + $0xd0] sm:$0xf] }
 0x14e   : > { %v6447_v7 = vcombine.low %v4565_v47, %v4575_v35  ;;  %v5264_v0 = vsel %vm7503_vm5, %v5262_v26, %v5263_v10  ;;  %v5269_v1 = vrot.slane %v5267_v58, 4  ;;  %v4577_v3 = vshrl.u32 %v6404_v4, 16 }
 0x14f   : > { %9185 = vst [vmem:[#allocation4_spill] sm:$0xff] %v8608_v40  ;;  %v6550_v42 = vcombine.low %v5261_v53, %v5264_v0  ;;  %v4580_v29 = vshll.u32 %v6404_v4, 16  ;;  %v4586_v60 = vshll.u32 %v6405_v15, 16  ;;  %v4590_v12 = vshrl.u32 %v6405_v15, 16  ;;  %v8626_v28 = vpop.f32.mrf.mxu1  ;;  %v1301_v4 = vld [vmem:[%s8066_s28 + $0xa0] sm:$0xff] }
 0x150   : > { %7154 = vmatmul.mubr.bf16.gmra.mxu1 %v6447_v7  ;;  %v5271_v20 = vsel %vm7503_vm5, %v5269_v1, %v5270_v25  ;;  %v4596_v57 = vshll.u32 %v6406_v46, 16  ;;  %v1335_v45 = vadd.f32 %v8499_v44, %v1303_v8  ;;  %v4579_v17 = vrot.slane %v4577_v3, 4  ;;  %v8628_v47 = vpop.f32.mrf.mxu0  ;;  %v6492_v0 = vld [vmem:[%s7416_s24 + $0x90] sm:$0xe]  ;;  %v6494_v8 = vld [vmem:[%s7416_s24 + $0x98] sm:$0x1] }
 0x151   : > { %7201 = vmatprep.mubr.bf16.mxu0 %v6550_v42  ;;  %v6551_v13 = vcombine.low %v5268_v16, %v5271_v20  ;;  %v4582_v39 = vrot.slane %v4580_v29, 5  ;;  %v4588_v10 = vrot.slane %v4586_v60, 5  ;;  %v4592_v33 = vrot.slane %v4590_v12, 4  ;;  %v8631_v15 = vpop.f32.mrf.mxu1  ;;  %v6493_v16 = vld [vmem:[%s7416_s24 + $0x94] sm:$0xf] }
 0x152   : > { %v4598_v61 = vrot.slane %v4596_v57, 5  ;;  %v4601_v2 = vshrl.u32 %v6407_v54, 16  ;;  %v4604_v43 = vshll.u32 %v6407_v54, 16  ;;  %v4610_v53 = vshll.u32 %v6408_v50, 16  ;;  %v8639_v1 = vpop.f32.mrf.mxu0 }
 0x153   : > { %7202 = vmatmul.mubr.bf16.gmra.mxu0 %v6551_v13  ;;  %v4583_v44 = vor.u32 %v4582_v39, %v4579_v17  ;;  %v4614_v26 = vshrl.u32 %v6408_v50, 16  ;;  %v4620_v58 = vshll.u32 %v6409_v19, 16  ;;  %v4593_v35 = vor.u32 %v4592_v33, %v4588_v10  ;;  %v8642_v54 = vpop.f32.mrf.mxu1  ;;  %v6495_v50 = vld [vmem:[%s7416_s24 + $0x9c] sm:$0xe] }
 0x154   : > { %v4603_v25 = vrot.slane %v4601_v2, 4  ;;  %v4606_v46 = vrot.slane %v4604_v43, 5  ;;  %v8635_v7 = vadd.f32 %v8480_v23, %v8582_v34  ;;  %v4612_v3 = vrot.slane %v4610_v53, 5  ;;  %v1304_v34 = vld [vmem:[%s8066_s28 + $0xb8] sm:$0xff]  ;;  %v8650_v19 = vpop.f32.mrf.mxu0  ;;  %v6496_v2 = vld [vmem:[%s7416_s24 + $0xa0] sm:$0xf] }
 0x155   : > { %v4584_v42 = vrot.slane %v4583_v44, 4  ;;  %v4616_v29 = vrot.slane %v4614_v26, 4  ;;  %v4622_v60 = vrot.slane %v4620_v58, 5  ;;  %v4594_v20 = vrot.slane %v4593_v35, 4  ;;  %v8658_v43 = vpop.f32.mrf.mxu1  ;;  %v6497_v53 = vld [vmem:[%s7416_s24 + $0xa4] sm:$0x1] }
 0x156   : > { %9186 = vst [vmem:[#allocation5_spill] sm:$0xff] %v8635_v7  ;;  %v4607_v12 = vor.u32 %v4606_v46, %v4603_v25  ;;  %v1333_v57 = vadd.f32 %v1301_v4, %v8514_v21  ;;  %v8646_v23 = vadd.f32 %v8490_v9, %v1330_v48  ;;  %v8655_v39 = vadd.f32 %v8532_v37, %v1304_v34  ;;  %v1302_v4 = vld [vmem:[%s8066_s28 + $0xa8] sm:$0xff]  ;;  %v8669_v25 = vpop.f32.mrf.mxu0 }
 0x157   : > { %v4589_v13 = vsel %vm7483_vm4, %v4584_v42, %v4588_v10  ;;  %v4617_v17 = vor.u32 %v4616_v29, %v4612_v3  ;;  %v6520_v33 = vrot.slane %v6492_v0, 9  ;;  %v4599_v9 = vsel %vm7483_vm4, %v4594_v20, %v4598_v61  ;;  %v8667_v35 = vpop.f32.mrf.mxu1  ;;  %v6410_v42 = vld [vmem:[%s7416_s24 + $0xa8] sm:$0xf]  ;;  %v6411_v29 = vld [vmem:[%s7416_s24 + $0xac] sm:$0xf] }
 0x158   : > { %9187 = vst [vmem:[#allocation6_spill] sm:$0xff] %v8646_v23  ;;  %v4608_v21 = vrot.slane %v4607_v12, 4  ;;  %v5274_v48 = vrot.slane %v6493_v16, 5  ;;  %v5277_v44 = vrot.slane %v6494_v8, 5  ;;  %v6448_v26 = vcombine.low %v4589_v13, %v4599_v9  ;;  %v1307_v9 = vld [vmem:[%s8066_s28 + $0xd0] sm:$0xff] }
 0x159   : > { %v4618_v58 = vrot.slane %v4617_v17, 4  ;;  %v8664_v10 = vadd.f32 %v8516_v56, %v1335_v45  ;;  %v6521_v37 = vrot.slane %v6495_v50, 9  ;;  %v5281_v16 = vrot.slane %v6496_v2, 5  ;;  %v8684_v12 = vpop.f32.mrf.mxu1 }
 0x15a   : > { %v4613_v61 = vsel %vm7483_vm4, %v4608_v21, %v4612_v3  ;;  %v5275_v46 = vsel %vm7503_vm5, %v6520_v33, %v5274_v48  ;;  %v5276_v0 = vrot.slane %v5274_v48, 4  ;;  %7157 = vmatprep.mubr.bf16.mxu1 %v6448_v26  ;;  %v5284_v45 = vrot.slane %v6497_v53, 5  ;;  %v6412_v3 = vld [vmem:[%s7416_s24 + $0xb0] sm:$0x1] }
 0x15b   : > { %9188 = vst [vmem:[#allocation7_spill] sm:$0xff] %v8664_v10  ;;  %v4623_v56 = vsel %vm7483_vm4, %v4618_v58, %v4622_v60  ;;  %v1334_v8 = vadd.f32 %v1302_v4, %v8555_v36  ;;  %v8681_v20 = vadd.f32 %v8524_v24, %v1333_v57  ;;  %v5282_v13 = vsel %vm7503_vm5, %v6521_v37, %v5281_v16  ;;  %v6413_v24 = vld [vmem:[%s7416_s24 + $0xb4] sm:$0xf]  ;;  %v8692_v57 = vpop.f32.mrf.mxu1  ;;  %v8694_v21 = vpop.f32.mrf.mxu0  ;;  %v6414_v58 = vld [vmem:[%s7416_s24 + $0xb8] sm:$0xf] }
 0x15c   : > { %v6449_v34 = vcombine.low %v4613_v61, %v4623_v56  ;;  %v5278_v50 = vsel %vm7503_vm5, %v5276_v0, %v5277_v44  ;;  %v5283_v17 = vrot.slane %v5281_v16, 4  ;;  %v4625_v33 = vshrl.u32 %v6410_v42, 16  ;;  %v6415_v37 = vld [vmem:[%s7416_s24 + $0xbc] sm:$0x1]  ;;  %v6502_v10 = vld [vmem:[%s7416_s24 + $0xb8] sm:$0xf] }
 0x15d   : > { %9189 = vst [vmem:[#allocation8_spill] sm:$0xff] %v8681_v20  ;;  %v6552_v60 = vcombine.low %v5275_v46, %v5278_v50  ;;  %v4628_v2 = vshll.u32 %v6410_v42, 16  ;;  %v4634_v36 = vshll.u32 %v6411_v29, 16  ;;  %v4638_v44 = vshrl.u32 %v6411_v29, 16  ;;  %v8701_v16 = vpop.f32.mrf.mxu1  ;;  %v8703_v42 = vpop.f32.mrf.mxu0 }
 0x15e   : > { %7158 = vmatmul.mubr.bf16.gmra.mxu1 %v6449_v34  ;;  %v5285_v48 = vsel %vm7503_vm5, %v5283_v17, %v5284_v45  ;;  %v4644_v53 = vshll.u32 %v6412_v3, 16  ;;  %v1339_v26 = vadd.f32 %v8566_v62, %v1307_v9  ;;  %v4627_v61 = vrot.slane %v4625_v33, 4 }
 0x15f   : > { %7205 = vmatprep.mubr.bf16.mxu0 %v6552_v60  ;;  %v6553_v4 = vcombine.low %v5282_v13, %v5285_v48  ;;  %v4630_v46 = vrot.slane %v4628_v2, 5  ;;  %v4636_v0 = vrot.slane %v4634_v36, 5  ;;  %v4640_v56 = vrot.slane %v4638_v44, 4  ;;  %v1305_v13 = vld [vmem:[%s8066_s28 + $0xc0] sm:$0xff]  ;;  %v8706_v60 = vpop.f32.mrf.mxu1  ;;  %v8708_v33 = vpop.f32.mrf.mxu0  ;;  %v6499_v44 = vld [vmem:[%s7416_s24 + $0xac] sm:$0xf] }
 0x160   : > { %v4646_v34 = vrot.slane %v4644_v53, 5  ;;  %v4649_v29 = vshrl.u32 %v6413_v24, 16  ;;  %v4652_v45 = vshll.u32 %v6413_v24, 16  ;;  %v4658_v3 = vshll.u32 %v6414_v58, 16  ;;  %v6498_v24 = vld [vmem:[%s7416_s24 + $0xa8] sm:$0xe] }
 0x161   : > { %7206 = vmatmul.mubr.bf16.gmra.mxu0 %v6553_v4  ;;  %v4631_v62 = vor.u32 %v4630_v46, %v4627_v61  ;;  %v4662_v50 = vshrl.u32 %v6414_v58, 16  ;;  %v4668_v17 = vshll.u32 %v6415_v37, 16  ;;  %v4641_v2 = vor.u32 %v4640_v56, %v4636_v0  ;;  %v6500_v61 = vld [vmem:[%s7416_s24 + $0xb0] sm:$0x1]  ;;  %v8717_v46 = vpop.f32.mrf.mxu1  ;;  %v8719_v20 = vpop.f32.mrf.mxu0 }
 0x162   : > { %v4651_v36 = vrot.slane %v4649_v29, 4  ;;  %v4654_v9 = vrot.slane %v4652_v45, 5  ;;  %v8712_v48 = vadd.f32 %v8542_v14, %v8655_v39  ;;  %v4660_v4 = vrot.slane %v4658_v3, 5  ;;  %v1308_v39 = vld [vmem:[%s8066_s28 + $0xd8] sm:$0xff] }
 0x163   : > { %v4632_v53 = vrot.slane %v4631_v62, 4  ;;  %v4664_v58 = vrot.slane %v4662_v50, 4  ;;  %v4670_v37 = vrot.slane %v4668_v17, 5  ;;  %v4642_v56 = vrot.slane %v4641_v2, 4  ;;  %v8733_v2 = vpop.f32.mrf.mxu1 }
 0x164   : > { %9190 = vst [vmem:[#allocation9_spill] sm:$0xff] %v8712_v48  ;;  %v4655_v29 = vor.u32 %v4654_v9, %v4651_v36  ;;  %v1337_v45 = vadd.f32 %v1305_v13, %v8577_v5  ;;  %v8723_v14 = vadd.f32 %v8557_v41, %v1334_v8  ;;  %v6501_v48 = vld [vmem:[%s7416_s24 + $0xb4] sm:$0xe]  ;;  %v8730_v50 = vadd.f32 %v8590_v32, %v1308_v39  ;;  %v6503_v36 = vld [vmem:[%s7416_s24 + $0xbc] sm:$0x1] }
 0x165   : > { %v4637_v62 = vsel %vm7483_vm4, %v4632_v53, %v4636_v0  ;;  %v4665_v3 = vor.u32 %v4664_v58, %v4660_v4  ;;  %v6522_v17 = vrot.slane %v6498_v24, 9  ;;  %v4647_v5 = vsel %vm7483_vm4, %v4642_v56, %v4646_v34  ;;  %v1306_v24 = vld [vmem:[%s8066_s28 + $0xc8] sm:$0xff]  ;;  %v8742_v53 = vpop.f32.mrf.mxu0  ;;  %v8744_v58 = vpop.f32.mrf.mxu1  ;;  %v6417_v39 = vld [vmem:[%s7416_s24 + $0xc4] sm:$0xf] }
 0x166   : > { %9191 = vst [vmem:[#allocation10_spill] sm:$0xff] %v8723_v14  ;;  %v4656_v41 = vrot.slane %v4655_v29, 4  ;;  %v5288_v8 = vrot.slane %v6499_v44, 5  ;;  %v5291_v13 = vrot.slane %v6500_v61, 5  ;;  %v6450_v9 = vcombine.low %v4637_v62, %v4647_v5  ;;  %v6416_v29 = vld [vmem:[%s7416_s24 + $0xc0] sm:$0xf] }
 0x167   : > { %v4666_v14 = vrot.slane %v4665_v3, 4  ;;  %v8739_v0 = vadd.f32 %v8569_v63, %v1339_v26  ;;  %v6523_v32 = vrot.slane %v6501_v48, 9  ;;  %v5295_v56 = vrot.slane %v6502_v10, 5  ;;  %v8759_v3 = vpop.f32.mrf.mxu0 }
 0x168   : > { %v4661_v34 = vsel %vm7483_vm4, %v4656_v41, %v4660_v4  ;;  %v5289_v44 = vsel %vm7503_vm5, %v6522_v17, %v5288_v8  ;;  %v5290_v61 = vrot.slane %v5288_v8, 4  ;;  %7161 = vmatprep.mubr.bf16.mxu1 %v6450_v9  ;;  %v5298_v26 = vrot.slane %v6503_v36, 5  ;;  %v6418_v4 = vld [vmem:[%s7416_s24 + $0xc8] sm:$0x1]  ;;  %v8761_v17 = vpop.f32.mrf.mxu1  ;;  %v6419_v36 = vld [vmem:[%s7416_s24 + $0xcc] sm:$0xf] }
 0x169   : > { %9192 = vst [vmem:[#allocation11_spill] sm:$0xff] %v8739_v0  ;;  %v4671_v63 = vsel %vm7483_vm4, %v4666_v14, %v4670_v37  ;;  %v1338_v48 = vadd.f32 %v1306_v24, %v8611_v31  ;;  %v8756_v62 = vadd.f32 %v8585_v52, %v1337_v45  ;;  %v5296_v37 = vsel %vm7503_vm5, %v6523_v32, %v5295_v56  ;;  %v1311_v45 = vld [vmem:[%s8066_s28 + $0xf0] sm:$0xff]  ;;  %v8769_v9 = vpop.f32.mrf.mxu0 }
 0x16a   : > { %v6451_v10 = vcombine.low %v4661_v34, %v4671_v63  ;;  %v5292_v5 = vsel %vm7503_vm5, %v5290_v61, %v5291_v13  ;;  %v5297_v14 = vrot.slane %v5295_v56, 4  ;;  %v4673_v31 = vshrl.u32 %v6416_v29, 16  ;;  %v8771_v24 = vpop.f32.mrf.mxu1  ;;  %v6420_v63 = vld [vmem:[%s7416_s24 + $0xd0] sm:$0xf]  ;;  %v6421_v56 = vld [vmem:[%s7416_s24 + $0xd4] sm:$0x1] }
 0x16b   : > { %9193 = vst [vmem:[#allocation12_spill] sm:$0xff] %v8756_v62  ;;  %v6554_v41 = vcombine.low %v5289_v44, %v5292_v5  ;;  %v4676_v8 = vshll.u32 %v6416_v29, 16  ;;  %v4682_v52 = vshll.u32 %v6417_v39, 16  ;;  %v4686_v34 = vshrl.u32 %v6417_v39, 16  ;;  %v8778_v0 = vpop.f32.mrf.mxu0 }
 0x16c   : > { %7162 = vmatmul.mubr.bf16.gmra.mxu1 %v6451_v10  ;;  %v5299_v13 = vsel %vm7503_vm5, %v5297_v14, %v5298_v26  ;;  %v4692_v61 = vshll.u32 %v6418_v4, 16  ;;  %v1343_v32 = vadd.f32 %v8626_v28, %v1311_v45  ;;  %v4675_v29 = vrot.slane %v4673_v31, 4  ;;  %v8780_v23 = vpop.f32.mrf.mxu1 }
 0x16d   : > { %7209 = vmatprep.mubr.bf16.mxu0 %v6554_v41  ;;  %v6555_v44 = vcombine.low %v5296_v37, %v5299_v13  ;;  %v4678_v5 = vrot.slane %v4676_v8, 5  ;;  %v4684_v62 = vrot.slane %v4682_v52, 5  ;;  %v4688_v10 = vrot.slane %v4686_v34, 4  ;;  %v1309_v37 = vld [vmem:[%s8066_s28 + $0xe0] sm:$0xff] }
 0x16e   : > { %v4694_v26 = vrot.slane %v4692_v61, 5  ;;  %v4697_v39 = vshrl.u32 %v6419_v36, 16  ;;  %v4700_v4 = vshll.u32 %v6419_v36, 16  ;;  %v4706_v14 = vshll.u32 %v6420_v63, 16  ;;  %v8783_v31 = vpop.f32.mrf.mxu1  ;;  %v6504_v61 = vld [vmem:[%s7416_s24 + $0xc0] sm:$0xe]  ;;  %v8792_v7 = vpop.f32.mrf.mxu0 }
 0x16f   : > { %7210 = vmatmul.mubr.bf16.gmra.mxu0 %v6555_v44  ;;  %v4679_v28 = vor.u32 %v4678_v5, %v4675_v29  ;;  %v4710_v41 = vshrl.u32 %v6420_v63, 16  ;;  %v4716_v45 = vshll.u32 %v6421_v56, 16  ;;  %v4689_v8 = vor.u32 %v4688_v10, %v4684_v62  ;;  %v6505_v36 = vld [vmem:[%s7416_s24 + $0xc4] sm:$0xf]  ;;  %v6506_v56 = vld [vmem:[%s7416_s24 + $0xc8] sm:$0x1] }
 0x170   : > { %v4699_v52 = vrot.slane %v4697_v39, 4  ;;  %v4702_v13 = vrot.slane %v4700_v4, 5  ;;  %v8787_v34 = vadd.f32 %v8596_v18, %v8730_v50  ;;  %v4708_v29 = vrot.slane %v4706_v14, 5  ;;  %v8794_v40 = vpop.f32.mrf.mxu1  ;;  %v1312_v50 = vld [vmem:[%s8066_s28 + $0xf8] sm:$0xff]  ;;  %v8806_v49 = vpop.f32.mrf.mxu0 }
 0x171   : > { %v4680_v44 = vrot.slane %v4679_v28, 4  ;;  %v4712_v5 = vrot.slane %v4710_v41, 4  ;;  %v4718_v63 = vrot.slane %v4716_v45, 5  ;;  %v4690_v10 = vrot.slane %v4689_v8, 4 }
 0x172   : > { %9194 = vst [vmem:[#allocation13_spill] sm:$0xff] %v8787_v34  ;;  %v4703_v39 = vor.u32 %v4702_v13, %v4699_v52  ;;  %v1341_v4 = vadd.f32 %v1309_v37, %v8631_v15  ;;  %v8798_v18 = vadd.f32 %v8617_v30, %v1338_v48  ;;  %v6507_v34 = vld [vmem:[%s7416_s24 + $0xcc] sm:$0xe]  ;;  %v1344_v41 = vadd.f32 %v8642_v54, %v1312_v50  ;;  %v8808_v8 = vpop.f32.mrf.mxu1  ;;  %v6509_v52 = vld [vmem:[%s7416_s24 + $0xd4] sm:$0x1] }
 0x173   : > { %v4685_v28 = vsel %vm7483_vm4, %v4680_v44, %v4684_v62  ;;  %v4713_v14 = vor.u32 %v4712_v5, %v4708_v29  ;;  %v6524_v45 = vrot.slane %v6504_v61, 9  ;;  %v4695_v15 = vsel %vm7483_vm4, %v4690_v10, %v4694_v26  ;;  %v8816_v61 = vpop.f32.mrf.mxu0  ;;  %v1310_v10 = vld [vmem:[%s8066_s28 + $0xe8] sm:$0xff] }
 0x174   : > { %9195 = vst [vmem:[#allocation14_spill] sm:$0xff] %v8798_v18  ;;  %v4704_v30 = vrot.slane %v4703_v39, 4  ;;  %v5302_v48 = vrot.slane %v6505_v36, 5  ;;  %v5305_v37 = vrot.slane %v6506_v56, 5  ;;  %v6452_v13 = vcombine.low %v4685_v28, %v4695_v15  ;;  %v8818_v44 = vpop.f32.mrf.mxu1 }
 0x175   : > { %v4714_v18 = vrot.slane %v4713_v14, 4  ;;  %v8814_v62 = vadd.f32 %v8628_v47, %v1343_v32  ;;  %v6525_v54 = vrot.slane %v6507_v34, 9  ;;  %v5309_v56 = vrot.slane %v6508_v27, 5 }
 0x176   : > { %v4709_v5 = vsel %vm7483_vm4, %v4704_v30, %v4708_v29  ;;  %v5303_v26 = vsel %vm7503_vm5, %v6524_v45, %v5302_v48  ;;  %v5304_v36 = vrot.slane %v5302_v48, 4  ;;  %7165 = vmatprep.mubr.bf16.mxu1 %v6452_v13  ;;  %v5312_v32 = vrot.slane %v6509_v52, 5  ;;  %v3055_v29 = vpop.f32.mrf.mxu0  ;;  %v2253_v50 = vpop.f32.mrf.mxu1  ;;  %v2330_v30 = vld [vmem:[%s8066_s28 + $0x8] sm:$0xff] }
 0x177   : > { %v4719_v47 = vsel %vm7483_vm4, %v4714_v18, %v4718_v63  ;;  %v1342_v34 = vadd.f32 %v1310_v10, %v8658_v43  ;;  %v8829_v39 = vadd.f32 %v8639_v1, %v1341_v4  ;;  %v5310_v27 = vsel %vm7503_vm5, %v6525_v54, %v5309_v56  ;;  %v2331_v63 = vld [vmem:[%s8066_s28 + $0x10] sm:$0xff]  ;;  %v2329_v18 = vld [vmem:[%s8066_s28] sm:$0xff]  ;;  %v2332_v4 = vld [vmem:[%s8066_s28 + $0x18] sm:$0xff] }
 0x178   : > { %v6453_v28 = vcombine.low %v4709_v5, %v4719_v47  ;;  %v5306_v14 = vsel %vm7503_vm5, %v5304_v36, %v5305_v37  ;;  %v5311_v51 = vrot.slane %v5309_v56, 4  ;;  %v2363_v15 = vadd.f32 %v8667_v35, %v2331_v63  ;;  %v6963_v48 = vpop.f32.mrf.mxu1  ;;  %v2335_v35 = vld [vmem:[%s8066_s28 + $0x30] sm:$0xff]  ;;  %v2336_v5 = vld [vmem:[%s8066_s28 + $0x38] sm:$0xff]  ;;  %v2334_v10 = vld [vmem:[%s8066_s28 + $0x28] sm:$0xff] }
 0x179   : > { %v6556_v45 = vcombine.low %v5303_v26, %v5306_v14  ;;  %v8839_v43 = vadd.f32 %v8650_v19, %v1344_v41  ;;  %v2361_v1 = vadd.f32 %v2329_v18, %v8684_v12  ;;  %v8847_v52 = vadd.f32 %v8669_v25, %v1342_v34  ;;  %v2333_v25 = vld [vmem:[%s8066_s28 + $0x20] sm:$0xff]  ;;  %v7007_v26 = vpop.f32.mrf.mxu0  ;;  %v2339_v47 = vld [vmem:[%s8066_s28 + $0x50] sm:$0xff] }
 0x17a   : > { %7166 = vmatmul.mubr.bf16.gmra.mxu1 %v6453_v28  ;;  %v5313_v37 = vsel %vm7503_vm5, %v5311_v51, %v5312_v32  ;;  %v2364_v13 = vadd.f32 %v8692_v57, %v2332_v4  ;;  %v2362_v19 = vadd.f32 %v2330_v30, %v8701_v16  ;;  %v8853_v41 = vadd.f32 %v8694_v21, %v2363_v15  ;;  %v2266_v57 = vpop.f32.mrf.mxu1 }
 0x17b   : > { %7213 = vmatprep.mubr.bf16.mxu0 %v6556_v45  ;;  %v6557_v12 = vcombine.low %v5310_v27, %v5313_v37  ;;  %v8856_v54 = vadd.f32 %v8703_v42, %v2361_v1  ;;  %v2367_v6 = vadd.f32 %v8706_v60, %v2335_v35  ;;  %v2365_v16 = vadd.f32 %v2333_v25, %v8717_v46  ;;  %v2337_v42 = vld [vmem:[%s8066_s28 + $0x40] sm:$0xff]  ;;  %v3068_v28 = vpop.f32.mrf.mxu0 }
 0x17c   : > { %v8862_v36 = vadd.f32 %v8708_v33, %v2364_v13  ;;  %v8866_v56 = vadd.f32 %v8719_v20, %v2362_v19  ;;  %v2368_v21 = vadd.f32 %v8733_v2, %v2336_v5  ;;  %v2366_v32 = vadd.f32 %v2334_v10, %v8744_v58  ;;  %v6964_v46 = vpop.f32.mrf.mxu1 }
 0x17d   : > { %7214 = vmatmul.mubr.bf16.gmra.mxu0 %v6557_v12  ;;  %v8873_v60 = vadd.f32 %v8742_v53, %v2367_v6  ;;  %v2371_v34 = vadd.f32 %v8761_v17, %v2339_v47  ;;  %v2369_v33 = vadd.f32 %v2337_v42, %v8771_v24  ;;  %v8879_v20 = vadd.f32 %v8759_v3, %v2365_v16  ;;  %v9204_v6 = vld [vmem:[#allocation9_spill] sm:$0xff]  ;;  %v9205_v16 = vld [vmem:[#allocation10_spill] sm:$0xff] }
 0x17e   : > { %v8882_v2 = vadd.f32 %v8769_v9, %v2368_v21  ;;  %v2372_v14 = vadd.f32 %v8780_v23, %v8494_v38  ;;  %v2370_v53 = vadd.f32 %v8783_v31, %v8504_v59  ;;  %v8889_v58 = vadd.f32 %v8778_v0, %v2366_v32  ;;  %v7008_v9 = vpop.f32.mrf.mxu0  ;;  %v2269_v27 = vpop.f32.mrf.mxu1  ;;  %v9198_v31 = vld [vmem:[#allocation3_spill] sm:$0xff] }
 0x17f   : > { %v8892_v17 = vadd.f32 %v8792_v7, %v2371_v34  ;;  %v8895_v24 = vadd.f32 %v8806_v49, %v2369_v33  ;;  %v2375_v3 = vadd.f32 %v8794_v40, %v8522_v55  ;;  %v2373_v38 = vadd.f32 %v8808_v8, %v8539_v11  ;;  %v9197_v49 = vld [vmem:[#allocation2_spill] sm:$0xff]  ;;  %v9199_v55 = vld [vmem:[#allocation4_spill] sm:$0xff]  ;;  %v9200_v11 = vld [vmem:[#allocation5_spill] sm:$0xff] }
 0x180   : > { %v8900_v51 = vadd.f32 %v8816_v61, %v2372_v14  ;;  %v8904_v59 = vadd.f32 %v3055_v29, %v2370_v53  ;;  %v2376_v7 = vadd.f32 %v8818_v44, %v8562_v22  ;;  %v2374_v0 = vadd.f32 %v2253_v50, %v9197_v49  ;;  %v3071_v18 = vpop.f32.mrf.mxu0  ;;  %v6967_v45 = vpop.f32.mrf.mxu1  ;;  %v9201_v29 = vld [vmem:[#allocation6_spill] sm:$0xff]  ;;  %v9202_v44 = vld [vmem:[#allocation7_spill] sm:$0xff] }
 0x181   : > { %v8908_v23 = vadd.f32 %v7007_v26, %v2375_v3  ;;  %v2379_v63 = vadd.f32 %v6963_v48, %v9198_v31  ;;  %v2377_v40 = vadd.f32 %v2266_v57, %v9199_v55  ;;  %v8913_v61 = vadd.f32 %v3068_v28, %v2373_v38  ;;  %v9203_v48 = vld [vmem:[#allocation8_spill] sm:$0xff]  ;;  %v9206_v32 = vld [vmem:[#allocation11_spill] sm:$0xff] }
 0x182   : > { %9196 = vst [vmem:[#allocation15_spill] sm:$0xff] %v8904_v59  ;;  %v8915_v15 = vadd.f32 %v7008_v9, %v2376_v7  ;;  %v2380_v8 = vadd.f32 %v6964_v46, %v9200_v11  ;;  %v2378_v1 = vadd.f32 %v2269_v27, %v9201_v29  ;;  %v8919_v4 = vadd.f32 %v3071_v18, %v2374_v0  ;;  %v7011_v22 = vpop.f32.mrf.mxu0  ;;  %v2282_v50 = vpop.f32.mrf.mxu1  ;;  %v9207_v28 = vld [vmem:[#allocation12_spill] sm:$0xff]  ;;  %v9208_v9 = vld [vmem:[#allocation13_spill] sm:$0xff]  ;;  %v9209_v0 = vld [vmem:[#allocation14_spill] sm:$0xff] }
 0x183   : > { %v2383_v30 = vadd.f32 %v6967_v45, %v9202_v44  ;;  %v8922_v37 = vadd.f32 %v7011_v22, %v2379_v63  ;;  %v2381_v13 = vadd.f32 %v2282_v50, %v9203_v48 }
 0x184   : > { %v3084_v19 = vpop.f32.mrf.mxu0  ;;  %v6968_v35 = vpop.f32.mrf.mxu1 }
 0x185   : > { %v8925_v12 = vadd.f32 %v3084_v19, %v2377_v40  ;;  %v2384_v25 = vadd.f32 %v6968_v35, %v9204_v6 }
 0x186   : > { %v7012_v5 = vpop.f32.mrf.mxu0  ;;  %v2285_v26 = vpop.f32.mrf.mxu1 }
 0x187   : > { %v8928_v57 = vadd.f32 %v7012_v5, %v2380_v8  ;;  %v2382_v21 = vadd.f32 %v2285_v26, %v9205_v16 }
 0x188   : > { %v3087_v10 = vpop.f32.mrf.mxu0  ;;  %v6971_v47 = vpop.f32.mrf.mxu1 }
 0x189   : > { %v8931_v42 = vadd.f32 %v3087_v10, %v2378_v1  ;;  %v2387_v34 = vadd.f32 %v6971_v47, %v9206_v32 }
 0x18a   : > { %v2298_v33 = vpop.f32.mrf.mxu1  ;;  %v7015_v14 = vpop.f32.mrf.mxu0 }
 0x18b   : > { %v2385_v46 = vadd.f32 %v2298_v33, %v9207_v28  ;;  %v8935_v3 = vadd.f32 %v7015_v14, %v2383_v30 }
 0x18c   : > { %v6972_v53 = vpop.f32.mrf.mxu1  ;;  %v3100_v38 = vpop.f32.mrf.mxu0 }
 0x18d   : > { %v2388_v27 = vadd.f32 %v6972_v53, %v9208_v9  ;;  %v8938_v49 = vadd.f32 %v3100_v38, %v2381_v13 }
 0x18e   : > { %v2301_v7 = vpop.f32.mrf.mxu1  ;;  %v7016_v63 = vpop.f32.mrf.mxu0 }
 0x18f   : > { %v2386_v31 = vadd.f32 %v2301_v7, %v9209_v0  ;;  %v8941_v40 = vadd.f32 %v7016_v63, %v2384_v25 }
 0x190   : > { %v6975_v55 = vpop.f32.mrf.mxu1  ;;  %v3103_v45 = vpop.f32.mrf.mxu0 }
 0x191   : > { %v2391_v18 = vadd.f32 %v6975_v55, %v8814_v62  ;;  %v8944_v8 = vadd.f32 %v3103_v45, %v2382_v21 }
 0x192   : > { %v2314_v11 = vpop.f32.mrf.mxu1  ;;  %v7019_v44 = vpop.f32.mrf.mxu0 }
 0x193   : > { %v2389_v29 = vadd.f32 %v2314_v11, %v8829_v39  ;;  %v8948_v50 = vadd.f32 %v7019_v44, %v2387_v34 }
 0x194   : > { %v6976_v1 = vpop.f32.mrf.mxu1  ;;  %v3116_v13 = vpop.f32.mrf.mxu0 }
 0x195   : > { %v2392_v22 = vadd.f32 %v6976_v1, %v8839_v43  ;;  %v8951_v19 = vadd.f32 %v3116_v13, %v2385_v46 }
 0x196   : > { %v2317_v30 = vpop.f32.mrf.mxu1  ;;  %v7020_v35 = vpop.f32.mrf.mxu0 }
 0x197   : > { %v2390_v48 = vadd.f32 %v2317_v30, %v8847_v52  ;;  %v8953_v62 = vadd.f32 %v7020_v35, %v2388_v27 }
 0x198   : > { %v3119_v6 = vpop.f32.mrf.mxu0  ;;  %v8959_v43 = vpop.f32.mrf.mxu1 }
 0x199   : > { %v8955_v25 = vadd.f32 %v3119_v6, %v2386_v31 }
 0x19a   : > { %v7023_v5 = vpop.f32.mrf.mxu0  ;;  %v8963_v10 = vpop.f32.mrf.mxu1 }
 0x19b   : > { %v8957_v39 = vadd.f32 %v7023_v5, %v2391_v18 }
 0x19c   : > { %v3132_v26 = vpop.f32.mrf.mxu0  ;;  %v8967_v32 = vpop.f32.mrf.mxu1 }
 0x19d   : > { %v8961_v16 = vadd.f32 %v3132_v26, %v2389_v29 }
 0x19e   : > { %v7024_v21 = vpop.f32.mrf.mxu0  ;;  %v8973_v28 = vpop.f32.mrf.mxu1 }
 0x19f   : > { %v8965_v52 = vadd.f32 %v7024_v21, %v2392_v22 }
 0x1a0   : > { %v3135_v47 = vpop.f32.mrf.mxu0 }
 0x1a1   : > { %v8969_v34 = vadd.f32 %v3135_v47, %v2390_v48  ;;  %v8977_v14 = vpop.f32.mrf.mxu1 }
 0x1a2   : > { %v8971_v33 = vpop.f32.mrf.mxu0 }
 0x1a3   : > { %v8981_v9 = vpop.f32.mrf.mxu1 }
 0x1a4   : > { %v8975_v46 = vpop.f32.mrf.mxu0 }
 0x1a5   : > { %v8985_v38 = vpop.f32.mrf.mxu1 }
 0x1a6   : > { %v8979_v53 = vpop.f32.mrf.mxu0 }
 0x1a7   : > { %v8989_v0 = vpop.f32.mrf.mxu1 }
 0x1a8   : > { %v8983_v27 = vpop.f32.mrf.mxu0 }
 0x1a9   : > { %v8993_v63 = vpop.f32.mrf.mxu1 }
 0x1aa   : > { %v8987_v7 = vpop.f32.mrf.mxu0 }
 0x1ab   : > { %v8997_v18 = vpop.f32.mrf.mxu1 }
 0x1ac   : > { %v8991_v31 = vpop.f32.mrf.mxu0 }
 0x1ad   : > { %v9001_v11 = vpop.f32.mrf.mxu1 }
 0x1ae   : > { %v8995_v55 = vpop.f32.mrf.mxu0  ;;  %9210 = vst [vmem:[#allocation2_spill] sm:$0xff] %v9001_v11 }
 0x1af   : > { %v9005_v1 = vpop.f32.mrf.mxu1 }
 0x1b0   : > { %v8999_v45 = vpop.f32.mrf.mxu0  ;;  %9212 = vst [vmem:[#allocation4_spill] sm:$0xff] %v9005_v1 }
 0x1b1   : > { %v7055_v44 = vpop.f32.mrf.mxu1 }
 0x1b2   : > { %v9003_v29 = vpop.f32.mrf.mxu0  ;;  %v3787_v30 = vadd.f32 %v7055_v44, %v8908_v23 }
 0x1b3   : > { %9211 = vst [vmem:[#allocation3_spill] sm:$0xff] %v9003_v29  ;;  %v3662_v13 = vpop.f32.mrf.mxu1 }
 0x1b4   : > { %v9007_v22 = vpop.f32.mrf.mxu0  ;;  %v3785_v35 = vadd.f32 %v3662_v13, %v8913_v61 }
 0x1b5   : > { %9213 = vst [vmem:[#allocation5_spill] sm:$0xff] %v9007_v22  ;;  %v7056_v5 = vpop.f32.mrf.mxu1 }
 0x1b6   : > { %v9010_v48 = vpop.f32.mrf.mxu0  ;;  %v3788_v26 = vadd.f32 %v7056_v5, %v8915_v15 }
 0x1b7   : > { %9214 = vst [vmem:[#allocation6_spill] sm:$0xff] %v9010_v48  ;;  %v3665_v47 = vpop.f32.mrf.mxu1 }
 0x1b8   : > { %v9013_v6 = vpop.f32.mrf.mxu0  ;;  %v3786_v1 = vadd.f32 %v3665_v47, %v8919_v4 }
 0x1b9   : > { %9215 = vst [vmem:[#allocation7_spill] sm:$0xff] %v9013_v6  ;;  %v7059_v29 = vpop.f32.mrf.mxu1 }
 0x1ba   : > { %v7103_v21 = vpop.f32.mrf.mxu0  ;;  %v3791_v23 = vadd.f32 %v7059_v29, %v8922_v37 }
 0x1bb   : > { %v9016_v59 = vadd.f32 %v7103_v21, %v3787_v30  ;;  %v3678_v48 = vpop.f32.mrf.mxu1 }
 0x1bc   : > { %v4113_v22 = vpop.f32.mrf.mxu0  ;;  %v3789_v13 = vadd.f32 %v3678_v48, %v8925_v12 }
 0x1bd   : > { %v9019_v11 = vadd.f32 %v4113_v22, %v3785_v35  ;;  %v7060_v15 = vpop.f32.mrf.mxu1 }
 0x1be   : > { %v7104_v44 = vpop.f32.mrf.mxu0  ;;  %v3792_v30 = vadd.f32 %v7060_v15, %v8928_v57 }
 0x1bf   : > { %v9022_v61 = vadd.f32 %v7104_v44, %v3788_v26  ;;  %v3681_v4 = vpop.f32.mrf.mxu1 }
 0x1c0   : > { %v4116_v6 = vpop.f32.mrf.mxu0  ;;  %v3790_v22 = vadd.f32 %v3681_v4, %v8931_v42 }
 0x1c1   : > { %v9025_v5 = vadd.f32 %v4116_v6, %v3786_v1  ;;  %v7063_v37 = vpop.f32.mrf.mxu1 }
 0x1c2   : > { %v7107_v21 = vpop.f32.mrf.mxu0  ;;  %v3795_v26 = vadd.f32 %v7063_v37, %v8935_v3 }
 0x1c3   : > { %v9028_v47 = vadd.f32 %v7107_v21, %v3791_v23  ;;  %v3694_v12 = vpop.f32.mrf.mxu1 }
 0x1c4   : > { %v4129_v35 = vpop.f32.mrf.mxu0  ;;  %v3793_v1 = vadd.f32 %v3694_v12, %v8938_v49 }
 0x1c5   : > { %v9031_v29 = vadd.f32 %v4129_v35, %v3789_v13  ;;  %v7064_v57 = vpop.f32.mrf.mxu1 }
 0x1c6   : > { %v7108_v44 = vpop.f32.mrf.mxu0  ;;  %v3796_v23 = vadd.f32 %v7064_v57, %v8941_v40 }
 0x1c7   : > { %v9034_v48 = vadd.f32 %v7108_v44, %v3792_v30  ;;  %v3697_v42 = vpop.f32.mrf.mxu1 }
 0x1c8   : > { %v4132_v6 = vpop.f32.mrf.mxu0  ;;  %v3794_v13 = vadd.f32 %v3697_v42, %v8944_v8 }
 0x1c9   : > { %v9037_v15 = vadd.f32 %v4132_v6, %v3790_v22  ;;  %v7067_v3 = vpop.f32.mrf.mxu1 }
 0x1ca   : > { %v7111_v21 = vpop.f32.mrf.mxu0  ;;  %v3799_v30 = vadd.f32 %v7067_v3, %v8948_v50 }
 0x1cb   : > { %v9040_v4 = vadd.f32 %v7111_v21, %v3795_v26  ;;  %v3710_v49 = vpop.f32.mrf.mxu1 }
 0x1cc   : > { %v4145_v35 = vpop.f32.mrf.mxu0  ;;  %v3797_v22 = vadd.f32 %v3710_v49, %v8951_v19 }
 0x1cd   : > { %v9043_v37 = vadd.f32 %v4145_v35, %v3793_v1  ;;  %v7068_v40 = vpop.f32.mrf.mxu1 }
 0x1ce   : > { %v7112_v44 = vpop.f32.mrf.mxu0  ;;  %v3800_v26 = vadd.f32 %v7068_v40, %v8953_v62 }
 0x1cf   : > { %v9046_v12 = vadd.f32 %v7112_v44, %v3796_v23  ;;  %v3713_v8 = vpop.f32.mrf.mxu1 }
 0x1d0   : > { %v4148_v6 = vpop.f32.mrf.mxu0  ;;  %v3798_v1 = vadd.f32 %v3713_v8, %v8955_v25 }
 0x1d1   : > { %v9049_v57 = vadd.f32 %v4148_v6, %v3794_v13  ;;  %v7071_v50 = vpop.f32.mrf.mxu1 }
 0x1d2   : > { %v7115_v21 = vpop.f32.mrf.mxu0  ;;  %v3803_v23 = vadd.f32 %v7071_v50, %v8957_v39  ;;  %v3773_v39 = vadd.f32 %v8963_v10, %v8856_v54  ;;  %v3776_v50 = vadd.f32 %v8967_v32, %v8862_v36  ;;  %v3779_v36 = vadd.f32 %v8977_v14, %v8873_v60 }
 0x1d3   : > { %v9052_v42 = vadd.f32 %v7115_v21, %v3799_v30  ;;  %v3726_v19 = vpop.f32.mrf.mxu1  ;;  %v3775_v30 = vadd.f32 %v8959_v43, %v8853_v41  ;;  %v3780_v60 = vadd.f32 %v8985_v38, %v8882_v2 }
 0x1d4   : > { %v4161_v35 = vpop.f32.mrf.mxu0  ;;  %v3801_v13 = vadd.f32 %v3726_v19, %v8961_v16  ;;  %v4224_v54 = vadd.f32 %v8975_v46, %v3773_v39  ;;  %v4227_v32 = vadd.f32 %v8979_v53, %v3776_v50  ;;  %v4230_v14 = vadd.f32 %v8987_v7, %v3779_v36 }
 0x1d5   : > { %v9055_v3 = vadd.f32 %v4161_v35, %v3797_v22  ;;  %v7072_v62 = vpop.f32.mrf.mxu1  ;;  %v4226_v41 = vadd.f32 %v8971_v33, %v3775_v30  ;;  %v3778_v39 = vadd.f32 %v8989_v0, %v8889_v58  ;;  %v4231_v2 = vadd.f32 %v8995_v55, %v3780_v60 }
 0x1d6   : > { %v7116_v44 = vpop.f32.mrf.mxu0  ;;  %v3804_v25 = vadd.f32 %v7072_v62, %v8965_v52  ;;  %v3781_v55 = vadd.f32 %v8997_v18, %v8895_v24  ;;  %v9218_v18 = vld [vmem:[#allocation15_spill] sm:$0xff] }
 0x1d7   : > { %v9058_v49 = vadd.f32 %v7116_v44, %v3800_v26  ;;  %v3729_v22 = vpop.f32.mrf.mxu1  ;;  %v3774_v44 = vadd.f32 %v8973_v28, %v8866_v56  ;;  %v3777_v56 = vadd.f32 %v8981_v9, %v8879_v20  ;;  %v4229_v58 = vadd.f32 %v8999_v45, %v3778_v39  ;;  %v9216_v45 = vld [vmem:[#allocation2_spill] sm:$0xff] }
 0x1d8   : > { %v4164_v6 = vpop.f32.mrf.mxu0  ;;  %v3802_v26 = vadd.f32 %v3729_v22, %v8969_v34 }
 0x1d9   : > { %v9063_v40 = vadd.f32 %v4164_v6, %v3798_v1  ;;  %v4225_v28 = vadd.f32 %v8983_v27, %v3774_v44  ;;  %v4228_v9 = vadd.f32 %v8991_v31, %v3777_v56 }
 0x1da   : > { %v7119_v21 = vpop.f32.mrf.mxu0  ;;  %v7139_v16 = vpop.f32.mrf.mxu1 }
 0x1db   : > { %v9068_v8 = vadd.f32 %v7119_v21, %v3803_v23  ;;  %v5044_v10 = vadd.f32 %v7139_v16, %v4226_v41  ;;  %v3783_v41 = vadd.f32 %v8993_v63, %v8892_v17 }
 0x1dc   : > { %v4177_v35 = vpop.f32.mrf.mxu0  ;;  %v4883_v52 = vpop.f32.mrf.mxu1 }
 0x1dd   : > { %v9074_v43 = vadd.f32 %v4177_v35, %v3801_v13  ;;  %v5042_v33 = vadd.f32 %v4883_v52, %v4224_v54 }
 0x1de   : > { %v7120_v1 = vpop.f32.mrf.mxu0  ;;  %v7140_v19 = vpop.f32.mrf.mxu1 }
 0x1df   : > { %v9079_v23 = vadd.f32 %v7120_v1, %v3804_v25  ;;  %v5045_v46 = vadd.f32 %v7140_v19, %v4227_v32 }
 0x1e0   : > { %v4180_v34 = vpop.f32.mrf.mxu0  ;;  %v4886_v62 = vpop.f32.mrf.mxu1 }
 0x1e1   : > { %v9084_v13 = vadd.f32 %v4180_v34, %v3802_v26  ;;  %v5043_v53 = vadd.f32 %v4886_v62, %v4225_v28 }
 0x1e2   : > { %v7187_v6 = vpop.f32.mrf.mxu0 }
 0x1e3   : > { %v5638_v30 = vadd.f32 %v7187_v6, %v5044_v10  ;;  %v9217_v6 = vld [vmem:[#allocation3_spill] sm:$0xff] }
 0x1e4   : > { %v5477_v25 = vpop.f32.mrf.mxu0  ;;  %v4234_v62 = vadd.f32 %v9217_v6, %v3783_v41 }
 0x1e5   : > { %5670 = vst [vmem:[%s8066_s28 + $0x10] sm:$0xff] %v5638_v30  ;;  %v5636_v22 = vadd.f32 %v5477_v25, %v5042_v33  ;;  %v5771_v34 = vmul.f32 %v5638_v30, %v5638_v30  ;;  %v3784_v33 = vadd.f32 %v9216_v45, %v8900_v51 }
 0x1e6   : > { %v7143_v21 = vpop.f32.mrf.mxu1  ;;  %v7188_v26 = vpop.f32.mrf.mxu0 }
 0x1e7   : > { %5668 = vst [vmem:[%s8066_s28] sm:$0xff] %v5636_v22  ;;  %v5048_v27 = vadd.f32 %v7143_v21, %v4230_v14  ;;  %v5639_v35 = vadd.f32 %v7188_v26, %v5045_v46  ;;  %v5769_v0 = vmul.f32 %v5636_v22, %v5636_v22  ;;  %v9220_v14 = vld [vmem:[#allocation5_spill] sm:$0xff] }
 0x1e8   : > { %v4899_v20 = vpop.f32.mrf.mxu1  ;;  %v5480_v16 = vpop.f32.mrf.mxu0 }
 0x1e9   : > { %5671 = vst [vmem:[%s8066_s28 + $0x18] sm:$0xff] %v5639_v35  ;;  %v5046_v38 = vadd.f32 %v4899_v20, %v4228_v9  ;;  %v5637_v7 = vadd.f32 %v5480_v16, %v5043_v53  ;;  %v5772_v28 = vmul.f32 %v5639_v35, %v5639_v35  ;;  %v4232_v53 = vadd.f32 %v9220_v14, %v3781_v55  ;;  %v9221_v16 = vld [vmem:[#allocation6_spill] sm:$0xff] }
 0x1ea   : > { %v7144_v50 = vpop.f32.mrf.mxu1  ;;  %v7191_v1 = vpop.f32.mrf.mxu0 }
 0x1eb   : > { %5669 = vst [vmem:[%s8066_s28 + $0x8] sm:$0xff] %v5637_v7  ;;  %v5732_v31 = vadd.f32 %v5637_v7, %v5636_v22  ;;  %v5770_v44 = vmul.f32 %v5637_v7, %v5637_v7  ;;  %v5049_v54 = vadd.f32 %v7144_v50, %v4231_v2  ;;  %v5642_v10 = vadd.f32 %v7191_v1, %v5048_v27  ;;  %v9222_v1 = vld [vmem:[#allocation7_spill] sm:$0xff] }
 0x1ec   : > { %v4902_v52 = vpop.f32.mrf.mxu1  ;;  %v5493_v19 = vpop.f32.mrf.mxu0  ;;  %v4235_v50 = vadd.f32 %v9221_v16, %v3784_v33 }
 0x1ed   : > { %v5733_v36 = vadd.f32 %v5732_v31, %v5638_v30  ;;  %v5801_v32 = vadd.f32 %v5770_v44, %v5769_v0  ;;  %5674 = vst [vmem:[%s8066_s28 + $0x30] sm:$0xff] %v5642_v10  ;;  %v5047_v17 = vadd.f32 %v4902_v52, %v4229_v58  ;;  %v5640_v63 = vadd.f32 %v5493_v19, %v5046_v38  ;;  %v9219_v30 = vld [vmem:[#allocation4_spill] sm:$0xff] }
 0x1ee   : > { %v7192_v56 = vpop.f32.mrf.mxu0  ;;  %v3782_v60 = vadd.f32 %v9219_v30, %v9218_v18 }
 0x1ef   : > { %v5802_v46 = vadd.f32 %v5801_v32, %v5771_v34  ;;  %5672 = vst [vmem:[%s8066_s28 + $0x20] sm:$0xff] %v5640_v63  ;;  %v5734_v25 = vadd.f32 %v5733_v36, %v5639_v35  ;;  %v5643_v24 = vadd.f32 %v7192_v56, %v5049_v54  ;;  %v5773_v51 = vmul.f32 %v5640_v63, %v5640_v63 }
 0x1f0   : > { %v5496_v39 = vpop.f32.mrf.mxu0  ;;  %v4233_v52 = vadd.f32 %v9222_v1, %v3782_v60  ;;  %v5775_v54 = vmul.f32 %v5642_v10, %v5642_v10 }
 0x1f1   : > { %v5735_v26 = vadd.f32 %v5734_v25, %v5640_v63  ;;  %v5803_v20 = vadd.f32 %v5802_v46, %v5772_v28  ;;  %5675 = vst [vmem:[%s8066_s28 + $0x38] sm:$0xff] %v5643_v24  ;;  %v5641_v27 = vadd.f32 %v5496_v39, %v5047_v17  ;;  %v5776_v63 = vmul.f32 %v5643_v24, %v5643_v24 }
 0x1f3   : > { %v5804_v38 = vadd.f32 %v5803_v20, %v5773_v51  ;;  %5673 = vst [vmem:[%s8066_s28 + $0x28] sm:$0xff] %v5641_v27  ;;  %v5736_v7 = vadd.f32 %v5735_v26, %v5641_v27  ;;  %v5774_v41 = vmul.f32 %v5641_v27, %v5641_v27 }
 0x1f4   : > { %v7147_v21 = vpop.f32.mrf.mxu1 }
 0x1f5   : > { %v5052_v22 = vadd.f32 %v7147_v21, %v4234_v62  ;;  %v5737_v55 = vadd.f32 %v5736_v7, %v5642_v10  ;;  %v5805_v34 = vadd.f32 %v5804_v38, %v5774_v41 }
 0x1f6   : > { %v4915_v9 = vpop.f32.mrf.mxu1 }
 0x1f7   : > { %v5050_v35 = vadd.f32 %v4915_v9, %v4232_v53  ;;  %v7195_v2 = vpop.f32.mrf.mxu0  ;;  %v5806_v45 = vadd.f32 %v5805_v34, %v5775_v54  ;;  %v5738_v33 = vadd.f32 %v5737_v55, %v5643_v24 }
 0x1f8   : > { %v7148_v58 = vpop.f32.mrf.mxu1  ;;  %v5646_v0 = vadd.f32 %v7195_v2, %v5052_v22 }
 0x1f9   : > { %v5053_v31 = vadd.f32 %v7148_v58, %v4235_v50  ;;  %v5509_v44 = vpop.f32.mrf.mxu0  ;;  %v5807_v46 = vadd.f32 %v5806_v45, %v5776_v63 }
 0x1fa   : > { %5678 = vst [vmem:[%s8066_s28 + $0x50] sm:$0xff] %v5646_v0  ;;  %v4918_v19 = vpop.f32.mrf.mxu1  ;;  %v5644_v36 = vadd.f32 %v5509_v44, %v5050_v35  ;;  %v5779_v30 = vmul.f32 %v5646_v0, %v5646_v0 }
 0x1fb   : > { %v5051_v32 = vadd.f32 %v4918_v19, %v4233_v52  ;;  %v7196_v17 = vpop.f32.mrf.mxu0 }
 0x1fc   : > { %5676 = vst [vmem:[%s8066_s28 + $0x40] sm:$0xff] %v5644_v36  ;;  %v5647_v6 = vadd.f32 %v7196_v17, %v5053_v31  ;;  %v5739_v56 = vadd.f32 %v5738_v33, %v5644_v36  ;;  %v5777_v28 = vmul.f32 %v5644_v36, %v5644_v36 }
 0x1fd   : > { %v5512_v62 = vpop.f32.mrf.mxu0 }
 0x1fe   : > { %5679 = vst [vmem:[%s8066_s28 + $0x58] sm:$0xff] %v5647_v6  ;;  %v5645_v25 = vadd.f32 %v5512_v62, %v5051_v32  ;;  %v5808_v10 = vadd.f32 %v5807_v46, %v5777_v28  ;;  %v5780_v39 = vmul.f32 %v5647_v6, %v5647_v6 }
 0x200   : > { %5677 = vst [vmem:[%s8066_s28 + $0x48] sm:$0xff] %v5645_v25  ;;  %v5740_v21 = vadd.f32 %v5739_v56, %v5645_v25  ;;  %v5778_v18 = vmul.f32 %v5645_v25, %v5645_v25 }
 0x202   : > { %v7151_v60 = vpop.f32.mrf.mxu1  ;;  %v5741_v14 = vadd.f32 %v5740_v21, %v5646_v0  ;;  %v5809_v53 = vadd.f32 %v5808_v10, %v5778_v18 }
 0x203   : > { %v5056_v22 = vadd.f32 %v7151_v60, %v9016_v59 }
 0x204   : > { %v4931_v24 = vpop.f32.mrf.mxu1  ;;  %v5810_v26 = vadd.f32 %v5809_v53, %v5779_v30  ;;  %v5742_v51 = vadd.f32 %v5741_v14, %v5647_v6 }
 0x205   : > { %v5054_v20 = vadd.f32 %v4931_v24, %v9019_v11  ;;  %v7199_v9 = vpop.f32.mrf.mxu0 }
 0x206   : > { %v7152_v27 = vpop.f32.mrf.mxu1  ;;  %v5650_v16 = vadd.f32 %v7199_v9, %v5056_v22  ;;  %v5811_v50 = vadd.f32 %v5810_v26, %v5780_v39 }
 0x207   : > { %v5057_v35 = vadd.f32 %v7152_v27, %v9022_v61  ;;  %v5525_v2 = vpop.f32.mrf.mxu0 }
 0x208   : > { %5682 = vst [vmem:[%s8066_s28 + $0x70] sm:$0xff] %v5650_v16  ;;  %v4934_v38 = vpop.f32.mrf.mxu1  ;;  %v5648_v7 = vadd.f32 %v5525_v2, %v5054_v20  ;;  %v5783_v55 = vmul.f32 %v5650_v16, %v5650_v16 }
 0x209   : > { %v5055_v59 = vadd.f32 %v4934_v38, %v9025_v5  ;;  %v7200_v41 = vpop.f32.mrf.mxu0 }
 0x20a   : > { %5680 = vst [vmem:[%s8066_s28 + $0x60] sm:$0xff] %v5648_v7  ;;  %v5743_v58 = vadd.f32 %v5742_v51, %v5648_v7  ;;  %v5781_v0 = vmul.f32 %v5648_v7, %v5648_v7  ;;  %v5651_v1 = vadd.f32 %v7200_v41, %v5057_v35 }
 0x20b   : > { %v5528_v11 = vpop.f32.mrf.mxu0 }
 0x20c   : > { %v5812_v52 = vadd.f32 %v5811_v50, %v5781_v0  ;;  %5683 = vst [vmem:[%s8066_s28 + $0x78] sm:$0xff] %v5651_v1  ;;  %v5649_v31 = vadd.f32 %v5528_v11, %v5055_v59  ;;  %v5784_v5 = vmul.f32 %v5651_v1, %v5651_v1 }
 0x20e   : > { %5681 = vst [vmem:[%s8066_s28 + $0x68] sm:$0xff] %v5649_v31  ;;  %v5744_v44 = vadd.f32 %v5743_v58, %v5649_v31  ;;  %v5782_v54 = vmul.f32 %v5649_v31, %v5649_v31 }
 0x210   : > { %v7155_v61 = vpop.f32.mrf.mxu1  ;;  %v5745_v34 = vadd.f32 %v5744_v44, %v5650_v16  ;;  %v5813_v19 = vadd.f32 %v5812_v52, %v5782_v54 }
 0x211   : > { %v5060_v36 = vadd.f32 %v7155_v61, %v9028_v47 }
 0x212   : > { %v4947_v32 = vpop.f32.mrf.mxu1  ;;  %v5814_v17 = vadd.f32 %v5813_v19, %v5783_v55  ;;  %v5746_v63 = vadd.f32 %v5745_v34, %v5651_v1 }
 0x213   : > { %v5058_v45 = vadd.f32 %v4947_v32, %v9031_v29  ;;  %v7203_v33 = vpop.f32.mrf.mxu0 }
 0x214   : > { %v7156_v6 = vpop.f32.mrf.mxu1  ;;  %v5654_v62 = vadd.f32 %v7203_v33, %v5060_v36  ;;  %v5815_v56 = vadd.f32 %v5814_v17, %v5784_v5 }
 0x215   : > { %v5061_v28 = vadd.f32 %v7156_v6, %v9034_v48  ;;  %v5541_v46 = vpop.f32.mrf.mxu0 }
 0x216   : > { %5686 = vst [vmem:[%s8066_s28 + $0x90] sm:$0xff] %v5654_v62  ;;  %v4950_v25 = vpop.f32.mrf.mxu1  ;;  %v5652_v10 = vadd.f32 %v5541_v46, %v5058_v45  ;;  %v5787_v24 = vmul.f32 %v5654_v62, %v5654_v62 }
 0x217   : > { %v5059_v47 = vadd.f32 %v4950_v25, %v9037_v15  ;;  %v7204_v21 = vpop.f32.mrf.mxu0 }
 0x218   : > { %5684 = vst [vmem:[%s8066_s28 + $0x80] sm:$0xff] %v5652_v10  ;;  %v5747_v18 = vadd.f32 %v5746_v63, %v5652_v10  ;;  %v5785_v30 = vmul.f32 %v5652_v10, %v5652_v10  ;;  %v5655_v60 = vadd.f32 %v7204_v21, %v5061_v28 }
 0x219   : > { %v5544_v29 = vpop.f32.mrf.mxu0 }
 0x21a   : > { %v5816_v14 = vadd.f32 %v5815_v56, %v5785_v30  ;;  %5687 = vst [vmem:[%s8066_s28 + $0x98] sm:$0xff] %v5655_v60  ;;  %v5653_v53 = vadd.f32 %v5544_v29, %v5059_v47  ;;  %v5788_v15 = vmul.f32 %v5655_v60, %v5655_v60 }
 0x21c   : > { %5685 = vst [vmem:[%s8066_s28 + $0x88] sm:$0xff] %v5653_v53  ;;  %v5748_v22 = vadd.f32 %v5747_v18, %v5653_v53  ;;  %v5786_v39 = vmul.f32 %v5653_v53, %v5653_v53 }
 0x21e   : > { %v7159_v48 = vpop.f32.mrf.mxu1  ;;  %v5749_v26 = vadd.f32 %v5748_v22, %v5654_v62  ;;  %v5817_v51 = vadd.f32 %v5816_v14, %v5786_v39 }
 0x21f   : > { %v5064_v20 = vadd.f32 %v7159_v48, %v9040_v4 }
 0x220   : > { %v4963_v9 = vpop.f32.mrf.mxu1  ;;  %v5818_v27 = vadd.f32 %v5817_v51, %v5787_v24  ;;  %v5750_v16 = vadd.f32 %v5749_v26, %v5655_v60 }
 0x221   : > { %v5062_v50 = vadd.f32 %v4963_v9, %v9043_v37  ;;  %v7207_v35 = vpop.f32.mrf.mxu0 }
 0x222   : > { %v7160_v2 = vpop.f32.mrf.mxu1  ;;  %v5658_v38 = vadd.f32 %v7207_v35, %v5064_v20  ;;  %v5819_v7 = vadd.f32 %v5818_v27, %v5788_v15 }
 0x223   : > { %v5065_v59 = vadd.f32 %v7160_v2, %v9046_v12  ;;  %v5557_v41 = vpop.f32.mrf.mxu0 }
 0x224   : > { %5690 = vst [vmem:[%s8066_s28 + $0xb0] sm:$0xff] %v5658_v38  ;;  %v4966_v58 = vpop.f32.mrf.mxu1  ;;  %v5656_v0 = vadd.f32 %v5557_v41, %v5062_v50  ;;  %v5791_v34 = vmul.f32 %v5658_v38, %v5658_v38 }
 0x225   : > { %v5063_v4 = vadd.f32 %v4966_v58, %v9049_v57  ;;  %v7208_v1 = vpop.f32.mrf.mxu0 }
 0x226   : > { %5688 = vst [vmem:[%s8066_s28 + $0xa0] sm:$0xff] %v5656_v0  ;;  %v5751_v11 = vadd.f32 %v5750_v16, %v5656_v0  ;;  %v5789_v52 = vmul.f32 %v5656_v0, %v5656_v0  ;;  %v5659_v31 = vadd.f32 %v7208_v1, %v5065_v59 }
 0x227   : > { %v5560_v37 = vpop.f32.mrf.mxu0 }
 0x228   : > { %v5820_v44 = vadd.f32 %v5819_v7, %v5789_v52  ;;  %5691 = vst [vmem:[%s8066_s28 + $0xb8] sm:$0xff] %v5659_v31  ;;  %v5657_v54 = vadd.f32 %v5560_v37, %v5063_v4  ;;  %v5792_v57 = vmul.f32 %v5659_v31, %v5659_v31 }
 0x22a   : > { %5689 = vst [vmem:[%s8066_s28 + $0xa8] sm:$0xff] %v5657_v54  ;;  %v5752_v55 = vadd.f32 %v5751_v11, %v5657_v54  ;;  %v5790_v61 = vmul.f32 %v5657_v54, %v5657_v54 }
 0x22c   : > { %v7163_v12 = vpop.f32.mrf.mxu1  ;;  %v5753_v19 = vadd.f32 %v5752_v55, %v5658_v38  ;;  %v5821_v36 = vadd.f32 %v5820_v44, %v5790_v61 }
 0x22d   : > { %v5068_v5 = vadd.f32 %v7163_v12, %v9052_v42 }
 0x22e   : > { %v4979_v32 = vpop.f32.mrf.mxu1  ;;  %v5822_v17 = vadd.f32 %v5821_v36, %v5791_v34  ;;  %v5754_v63 = vadd.f32 %v5753_v19, %v5659_v31 }
 0x22f   : > { %v5066_v45 = vadd.f32 %v4979_v32, %v9055_v3  ;;  %v7211_v33 = vpop.f32.mrf.mxu0 }
 0x230   : > { %v7164_v6 = vpop.f32.mrf.mxu1  ;;  %v5662_v62 = vadd.f32 %v7211_v33, %v5068_v5  ;;  %v5823_v56 = vadd.f32 %v5822_v17, %v5792_v57 }
 0x231   : > { %v5069_v28 = vadd.f32 %v7164_v6, %v9058_v49  ;;  %v5573_v46 = vpop.f32.mrf.mxu0 }
 0x232   : > { %5694 = vst [vmem:[%s8066_s28 + $0xd0] sm:$0xff] %v5662_v62  ;;  %v4982_v25 = vpop.f32.mrf.mxu1  ;;  %v5660_v10 = vadd.f32 %v5573_v46, %v5066_v45  ;;  %v5795_v22 = vmul.f32 %v5662_v62, %v5662_v62 }
 0x233   : > { %v5067_v42 = vadd.f32 %v4982_v25, %v9063_v40  ;;  %v7212_v47 = vpop.f32.mrf.mxu0 }
 0x234   : > { %5692 = vst [vmem:[%s8066_s28 + $0xc0] sm:$0xff] %v5660_v10  ;;  %v5755_v21 = vadd.f32 %v5754_v63, %v5660_v10  ;;  %v5793_v18 = vmul.f32 %v5660_v10, %v5660_v10  ;;  %v5663_v30 = vadd.f32 %v7212_v47, %v5069_v28 }
 0x235   : > { %v5576_v3 = vpop.f32.mrf.mxu0 }
 0x236   : > { %v5824_v60 = vadd.f32 %v5823_v56, %v5793_v18  ;;  %5695 = vst [vmem:[%s8066_s28 + $0xd8] sm:$0xff] %v5663_v30  ;;  %v5661_v29 = vadd.f32 %v5576_v3, %v5067_v42  ;;  %v5796_v40 = vmul.f32 %v5663_v30, %v5663_v30 }
 0x238   : > { %5693 = vst [vmem:[%s8066_s28 + $0xc8] sm:$0xff] %v5661_v29  ;;  %v5756_v14 = vadd.f32 %v5755_v21, %v5661_v29  ;;  %v5794_v53 = vmul.f32 %v5661_v29, %v5661_v29 }
 0x23a   : > { %v7167_v49 = vpop.f32.mrf.mxu1  ;;  %v5757_v39 = vadd.f32 %v5756_v14, %v5662_v62  ;;  %v5825_v24 = vadd.f32 %v5824_v60, %v5794_v53 }
 0x23b   : > { %v5072_v48 = vadd.f32 %v7167_v49, %v9068_v8 }
 0x23c   : > { %v4995_v26 = vpop.f32.mrf.mxu1  ;;  %v5826_v51 = vadd.f32 %v5825_v24, %v5795_v22  ;;  %v5758_v20 = vadd.f32 %v5757_v39, %v5663_v30 }
 0x23d   : > { %v5070_v15 = vadd.f32 %v4995_v26, %v9074_v43  ;;  %v7215_v9 = vpop.f32.mrf.mxu0 }
 0x23e   : > { %v7168_v27 = vpop.f32.mrf.mxu1  ;;  %v5666_v16 = vadd.f32 %v7215_v9, %v5072_v48  ;;  %v5827_v50 = vadd.f32 %v5826_v51, %v5796_v40 }
 0x23f   : > { %v5073_v35 = vadd.f32 %v7168_v27, %v9079_v23  ;;  %v5589_v2 = vpop.f32.mrf.mxu0 }
 0x240   : > { %5698 = vst [vmem:[%s8066_s28 + $0xf0] sm:$0xff] %v5666_v16  ;;  %v4998_v38 = vpop.f32.mrf.mxu1  ;;  %v5664_v7 = vadd.f32 %v5589_v2, %v5070_v15  ;;  %v5799_v31 = vmul.f32 %v5666_v16, %v5666_v16 }
 0x241   : > { %v5071_v8 = vadd.f32 %v4998_v38, %v9084_v13  ;;  %v7216_v59 = vpop.f32.mrf.mxu0 }
 0x242   : > { %5696 = vst [vmem:[%s8066_s28 + $0xe0] sm:$0xff] %v5664_v7  ;;  %v5759_v41 = vadd.f32 %v5758_v20, %v5664_v7  ;;  %v5797_v58 = vmul.f32 %v5664_v7, %v5664_v7  ;;  %v5667_v0 = vadd.f32 %v7216_v59, %v5073_v35 }
 0x243   : > { %v5592_v43 = vpop.f32.mrf.mxu0 }
 0x244   : > { %v5828_v4 = vadd.f32 %v5827_v50, %v5797_v58  ;;  %5699 = vst [vmem:[%s8066_s28 + $0xf8] sm:$0xff] %v5667_v0  ;;  %v5665_v1 = vadd.f32 %v5592_v43, %v5071_v8  ;;  %v5800_v44 = vmul.f32 %v5667_v0, %v5667_v0 }
 0x246   : > { %5697 = vst [vmem:[%s8066_s28 + $0xe8] sm:$0xff] %v5665_v1  ;;  %v5760_v11 = vadd.f32 %v5759_v41, %v5665_v1  ;;  %v5798_v52 = vmul.f32 %v5665_v1, %v5665_v1 }
 0x248   : > { %v5761_v23 = vadd.f32 %v5760_v11, %v5666_v16  ;;  %v5829_v37 = vadd.f32 %v5828_v4, %v5798_v52 }
 0x24a   : > { %v5762_v54 = vadd.f32 %v5761_v23, %v5667_v0  ;;  %v5830_v55 = vadd.f32 %v5829_v37, %v5799_v31 }
 0x24c   : > { %v5763_v61 = vrot.slane %v5762_v54, 4  ;;  %v5831_v13 = vadd.f32 %v5830_v55, %v5800_v44 }
 0x24e   : > { %v5764_v34 = vadd.f32 %v5763_v61, %v5762_v54  ;;  %v5832_v12 = vrot.slane %v5831_v13, 4 }
 0x250   : > { %v5765_v19 = vrot.slane %v5764_v34, 2  ;;  %v5833_v36 = vadd.f32 %v5832_v12, %v5831_v13 }
 0x252   : > { %v5766_v5 = vadd.f32 %v5765_v19, %v5764_v34  ;;  %v5834_v57 = vrot.slane %v5833_v36, 2 }
 0x254   : > { %v5767_v32 = vrot.slane %v5766_v5, 1  ;;  %v5835_v17 = vadd.f32 %v5834_v57, %v5833_v36  ;;  %5841 = sbr.rel (%p6566_p5) target bundleno = 603 (0x25b), region = 32 }
 0x256   : > { %v5768_v63 = vadd.f32 %v5767_v32, %v5766_v5  ;;  %v5836_v45 = vrot.slane %v5835_v17, 1 }
 0x258   : > { %v5837_v33 = vadd.f32 %v5836_v45, %v5835_v17 }
 0x259   : > { %v7371_v6 = vmov 0.0  }
 0x25a   : > { %5842 = vst [vmem:[%s9177_s3] sm:$0x3] %v7371_v6 }
 0x25b PF: > { %vm5844_vm6 = vcmask 1040384  }
 0x25c   : > { %v5845_v56 = vsel %vm5844_vm6, %v5768_v63, %v5837_v33 }
 0x261   : > { %v5843_v62 = vld [vmem:[%s9177_s3] sm:$0x3] }
 0x262   : > { %v5846_v28 = vadd.f32 %v5845_v56, %v5843_v62 }
 0x264   : > { %5847 = vst [vmem:[%s9177_s3] sm:$0x3] %v5846_v28 }
 0x265 PF: > { %s14_s12 = sadd.s32 1, %s7369_s12  }
 0x266   : > { %p11_p6 = scmp.ge.s32.totalorder %s14_s12, 4  }
 0x268   :  { %13 = sbr.rel (!%p11_p6) target bundleno = 1 (0x1), region = 80 }

</bundles_post_ra>
